<compile_context>
chip_gen: v7x
topology: tpu7x:2x2x1
jax: 0.10.0
libtpu: 0.0.40
codegen_flags: <defaults>
</compile_context>

<pallas_src>
import functools

import jax
import jax.numpy as jnp
from jax.experimental import pallas as pl
from jax.experimental.pallas import tpu as pltpu


# ----------------------------------------------------------------------------
# In-kernel building blocks (all values stay 2-D -> no in-kernel reshapes)
# ----------------------------------------------------------------------------

def _shift_rows(x, offset):
    """T[r] = x[r + offset], zero-filled outside [0, rows)."""
    rows = x.shape[0]
    pad = jnp.zeros((abs(offset),) + x.shape[1:], x.dtype)
    if offset > 0:
        return jnp.concatenate([x[offset:], pad], axis=0)
    return jnp.concatenate([pad, x[:rows + offset]], axis=0)


def _conv_stack(a1_ref, w1, b1, w2, b2, nb):
    """conv1 + LeakyReLU + conv2 (+bias) for one tile of `nb` images.

    a1_ref: (4, nb*49, 16) bf16.  Group g = 2*ph + pw holds the conv1 im2col
    patches whose *padded* conv2 input coordinates have row parity ph and
    column parity pw; rows are ordered (n, i, j) so that the conv1 activation
    y1[n, 2i+1-ph, 2j+1-pw, :] lands at row n*49 + i*7 + j of that group.

    Returns the pre-BN conv2 activations as (nb*49, 128) float32, rows ordered
    (n, oh, ow).
    """
    rows = nb * 49
    r = jax.lax.broadcasted_iota(jnp.int32, (rows, 1), 0)
    rm49 = r % 49          # i*7 + j  within an image
    rm7 = r % 7            # j

    # conv1 (one small matmul per parity group) + bias + LeakyReLU, bf16 out.
    groups = []
    for g in range(4):
        yg = jnp.dot(a1_ref[g], w1, preferred_element_type=jnp.float32) + b1
        groups.append(jnp.where(yg > 0, yg, 0.2 * yg).astype(jnp.bfloat16))

    # Assemble the conv2 im2col LHS in VMEM.  Tap (kh, kw) reads parity group
    # (kh%2, kw%2) shifted by (dh, dw) = (floor((kh-1)/2), floor((kw-1)/2)) on
    # the 7x7 output grid; rows that would read the zero padding are masked.
    taps = []
    for kh in range(4):
        dh = (kh - 1) // 2                         # -1, 0, 0, +1
        for kw in range(4):
            dw = (kw - 1) // 2
            t = groups[2 * (kh % 2) + (kw % 2)]
            off = 7 * dh + dw
            if off != 0:
                t = _shift_rows(t, off)
            keep = None
            if dh == -1:
                keep = rm49 >= 7
            elif dh == 1:
                keep = rm49 < 42
            if dw == -1:
                keep = (rm7 >= 1) if keep is None else keep & (rm7 >= 1)
            elif dw == 1:
                keep = (rm7 < 6) if keep is None else keep & (rm7 < 6)
            if keep is not None:
                t = jnp.where(keep, t, 0)
            taps.append(t)
    lhs = jnp.concatenate(taps, axis=1)             # (rows, 1024), (kh,kw,c) order

    return jnp.dot(lhs, w2, preferred_element_type=jnp.float32) + b2   # (rows, 128)


def _linear_sigmoid(yn, wl, bl, nb):
    """Fused Linear(128*7*7 -> 1) + Sigmoid on normalized activations.

    yn: (nb*49, 128) f32 rows ordered (n, oh, ow); wl: (49, 128); bl: (1, 1).
    """
    rows = nb * 49
    wlt = jnp.concatenate([wl] * nb, axis=0)                        # (rows, 128)
    rowdot = jnp.sum(yn * wlt, axis=1, keepdims=True)               # (rows, 1)
    img = jax.lax.broadcasted_iota(jnp.int32, (nb, rows), 0)
    row = jax.lax.broadcasted_iota(jnp.int32, (nb, rows), 1)
    sel = ((row >= 49 * img) & (row < 49 * (img + 1))).astype(jnp.float32)
    logits = jnp.dot(sel, rowdot, preferred_element_type=jnp.float32) + bl
    return 1.0 / (1.0 + jnp.exp(-logits))                            # (nb, 1)


# ----------------------------------------------------------------------------
# Kernels
# ----------------------------------------------------------------------------

def _fused_kernel(a1_ref, w1_ref, b1_ref, w2_ref, b2_ref,
                  g_ref, bt_ref, wl_ref, bl_ref, o_ref, *, nb):
    """Small-batch path: whole network in one kernel, zero HBM intermediates."""
    y2 = _conv_stack(a1_ref, w1_ref[...], b1_ref[...], w2_ref[...], b2_ref[...], nb)
    # Training-mode BatchNorm with exact (two-pass) batch statistics.
    mean = jnp.mean(y2, axis=0, keepdims=True)                       # (1, 128)
    var = jnp.mean((y2 - mean) ** 2, axis=0, keepdims=True)
    scale = g_ref[...] * jax.lax.rsqrt(var + 1e-5)
    yn = (y2 - mean) * scale + bt_ref[...]
    yn = jnp.where(yn > 0, yn, 0.2 * yn)
    o_ref[...] = _linear_sigmoid(yn, wl_ref[...], bl_ref[...], nb)


def _conv_stats_kernel(a1_ref, w1_ref, b1_ref, w2_ref, b2_ref,
                       y2_ref, stats_ref, *, nb, n_valid):
    """Tiled path, pass 1: conv1+conv2 per batch tile, bf16 activations out and
    per-tile BN partial sums (grid-step indexed => batch axis stays parallel)."""
    y2 = _conv_stack(a1_ref, w1_ref[...], b1_ref[...], w2_ref[...], b2_ref[...], nb)
    y2_ref[...] = y2.astype(y2_ref.dtype)                            # bf16 round trip

    i = pl.program_id(0)
    r = jax.lax.broadcasted_iota(jnp.int32, (nb * 49, 1), 0)
    valid = (r < (n_valid - i * nb) * 49).astype(jnp.float32)        # mask padded images
    ym = y2 * valid
    s1 = jnp.sum(ym, axis=0, keepdims=True)                          # (1, 128)  sum y
    s2 = jnp.sum(ym * y2, axis=0, keepdims=True)                     # (1, 128)  sum y^2
    stats_ref[...] = jnp.concatenate([s1, s2], axis=0)[None]         # (1, 2, 128)


def _head_kernel(y2_ref, stats_ref, g_ref, bt_ref, wl_ref, bl_ref, o_ref,
                 *, nb, count):
    """Tiled path, pass 2: BN normalize + LeakyReLU + Linear + Sigmoid per tile."""
    s = jnp.sum(stats_ref[...], axis=0)                              # (2, 128)
    inv_count = 1.0 / count
    mean = s[0:1] * inv_count
    ex2 = s[1:2] * inv_count
    # TODO(synk): E[y^2]-E[y]^2 can lose precision for large activation means;
    # acceptable here, switch to shifted sums if tighter PyTorch parity is needed.
    var = jnp.maximum(ex2 - mean * mean, 0.0)
    scale = g_ref[...] * jax.lax.rsqrt(var + 1e-5)
    shift = bt_ref[...] - mean * scale
    yn = y2_ref[...].astype(jnp.float32) * scale + shift
    yn = jnp.where(yn > 0, yn, 0.2 * yn)
    o_ref[...] = _linear_sigmoid(yn, wl_ref[...], bl_ref[...], nb)


# ----------------------------------------------------------------------------
# pallas_call wrappers
# ----------------------------------------------------------------------------

_VMEM_LIMIT = 32 * 1024 * 1024   # safe on v5e/v6e (128 MiB) and v7x (64 MiB physical)
_FUSED_MAX_BATCH = 16            # whole network fits comfortably in VMEM
_NB = 32                         # batch-tile => 6272-row conv matmul tiles


def _const_spec(shape):
    nd = len(shape)
    return pl.BlockSpec(tuple(shape), lambda i, _nd=nd: (0,) * _nd)


def _fused_call(a1g, w1, b1, w2, b2, gamma, beta, wl, bl, n):
    args = (a1g, w1, b1, w2, b2, gamma, beta, wl, bl)
    return pl.pallas_call(
        functools.partial(_fused_kernel, nb=n),
        out_shape=jax.ShapeDtypeStruct((n, 1), jnp.float32),
        grid=(1,),
        in_specs=[_const_spec(a.shape) for a in args],
        out_specs=_const_spec((n, 1)),
        compiler_params=pltpu.CompilerParams(vmem_limit_bytes=_VMEM_LIMIT),
    )(*args)


def _conv_call(a1g, w1, b1, w2, b2, nb, n_valid):
    npad = a1g.shape[1] // 49
    t = npad // nb
    return pl.pallas_call(
        functools.partial(_conv_stats_kernel, nb=nb, n_valid=n_valid),
        out_shape=(jax.ShapeDtypeStruct((npad * 49, 128), jnp.bfloat16),
                   jax.ShapeDtypeStruct((t, 2, 128), jnp.float32)),
        grid=(t,),
        in_specs=[
            pl.BlockSpec((4, nb * 49, 16), lambda i: (0, i, 0)),
            _const_spec(w1.shape),
            _const_spec(b1.shape),
            _const_spec(w2.shape),
            _const_spec(b2.shape),
        ],
        out_specs=(
            pl.BlockSpec((nb * 49, 128), lambda i: (i, 0)),
            pl.BlockSpec((1, 2, 128), lambda i: (i, 0, 0)),
        ),
        compiler_params=pltpu.CompilerParams(
            dimension_semantics=("parallel",),
            vmem_limit_bytes=_VMEM_LIMIT,
        ),
    )(a1g, w1, b1, w2, b2)


def _head_call(y2, stats, gamma, beta, wl, bl, nb, count):
    npad = y2.shape[0] // 49
    t = npad // nb
    return pl.pallas_call(
        functools.partial(_head_kernel, nb=nb, count=float(count)),
        out_shape=jax.ShapeDtypeStruct((npad, 1), jnp.float32),
        grid=(t,),
        in_specs=[
            pl.BlockSpec((nb * 49, 128), lambda i: (i, 0)),
            _const_spec(stats.shape),
            _const_spec(gamma.shape),
            _const_spec(beta.shape),
            _const_spec(wl.shape),
            _const_spec(bl.shape),
        ],
        out_specs=pl.BlockSpec((nb, 1), lambda i: (i, 0)),
        compiler_params=pltpu.CompilerParams(
            dimension_semantics=("parallel",),
            vmem_limit_bytes=_VMEM_LIMIT,
        ),
    )(y2, stats, gamma, beta, wl, bl)


# ----------------------------------------------------------------------------
# Host-side glue (conv1 im2col on the tiny input stays in XLA)
# ----------------------------------------------------------------------------

def _round_up(x, m):
    return (x + m - 1) // m * m


def _conv1_patches_grouped(x_nhwc):
    """(N,28,28,1) f32 -> (4, N*49, 16) bf16 conv1 im2col, parity-grouped rows.

    Group g = 2*ph + pw, row n*49 + i*7 + j holds the patch of conv1 output
    position (oh1, ow1) = (2i+1-ph, 2j+1-pw); columns are in (kh, kw) order.
    """
    n = x_nhwc.shape[0]
    xp = jnp.pad(x_nhwc, ((0, 0), (1, 1), (1, 1), (0, 0)))
    cols = [xp[:, i:i + 28:2, j:j + 28:2, :] for i in range(4) for j in range(4)]
    p = jnp.concatenate(cols, axis=-1)                        # (N,14,14,16)
    subs = [p[:, (1 - ph)::2, (1 - pw)::2, :].reshape(n * 49, 16)
            for ph in (0, 1) for pw in (0, 1)]
    return jnp.stack(subs, axis=0).astype(jnp.bfloat16)       # (4, N*49, 16)


@jax.jit
def discriminator_forward(x, params):
    n = x.shape[0]
    x_nhwc = jnp.transpose(x, (0, 2, 3, 1))                   # (N,28,28,1)

    w1 = params["w1"].transpose(2, 3, 1, 0).reshape(16, 64).astype(jnp.bfloat16)
    b1 = params["b1"].reshape(1, 64)
    w2 = params["w2"].transpose(2, 3, 1, 0).reshape(1024, 128).astype(jnp.bfloat16)
    b2 = params["b2"].reshape(1, 128)
    gamma = params["bn_gamma"].reshape(1, 128)
    beta = params["bn_beta"].reshape(1, 128)
    # PyTorch flattens (C,H,W); permute the Linear weight once to (H,W,C) order.
    wl = params["wl"].reshape(128, 7, 7).transpose(1, 2, 0).reshape(49, 128)
    bl = params["bl"].reshape(1, 1)

    if n <= _FUSED_MAX_BATCH:
        a1g = _conv1_patches_grouped(x_nhwc)
        return _fused_call(a1g, w1, b1, w2, b2, gamma, beta, wl, bl, n)

    npad = _round_up(n, _NB)
    x_nhwc = jnp.pad(x_nhwc, ((0, npad - n), (0, 0), (0, 0), (0, 0)))
    a1g = _conv1_patches_grouped(x_nhwc)
    y2, stats = _conv_call(a1g, w1, b1, w2, b2, _NB, n)
    out = _head_call(y2, stats, gamma, beta, wl, bl, _NB, n * 49)
    return out[:n]


# ----------------------------------------------------------------------------
# Pure-JAX reference (forward semantics of the PyTorch module)
# ----------------------------------------------------------------------------

def reference_forward(x, params):
    y = jax.lax.conv_general_dilated(
        x, params["w1"], window_strides=(2, 2), padding=((1, 1), (1, 1)),
        dimension_numbers=("NCHW", "OIHW", "NCHW"))
    y = y + params["b1"].reshape(1, -1, 1, 1)
    y = jnp.where(y > 0, y, 0.2 * y)
    y = jax.lax.conv_general_dilated(
        y, params["w2"], window_strides=(2, 2), padding=((1, 1), (1, 1)),
        dimension_numbers=("NCHW", "OIHW", "NCHW"))
    y = y + params["b2"].reshape(1, -1, 1, 1)
    mean = jnp.mean(y, axis=(0, 2, 3), keepdims=True)
    var = jnp.mean((y - mean) ** 2, axis=(0, 2, 3), keepdims=True)
    y = (y - mean) * jax.lax.rsqrt(var + 1e-5)
    y = y * params["bn_gamma"].reshape(1, -1, 1, 1) + params["bn_beta"].reshape(1, -1, 1, 1)
    y = jnp.where(y > 0, y, 0.2 * y)
    y = y.reshape(y.shape[0], -1)
    y = y @ params["wl"].T + params["bl"]
    return jax.nn.sigmoid(y)


# ----------------------------------------------------------------------------
# Deterministic parameter init (shapes follow nn.Module __init__)
# ----------------------------------------------------------------------------

def init_params(key):
    ks = jax.random.split(key, 6)
    return {
        "w1": jax.random.normal(ks[0], (64, 1, 4, 4), jnp.float32) * 0.05,
        "b1": jax.random.normal(ks[1], (64,), jnp.float32) * 0.01,
        "w2": jax.random.normal(ks[2], (128, 64, 4, 4), jnp.float32) * 0.02,
        "b2": jax.random.normal(ks[3], (128,), jnp.float32) * 0.01,
        "bn_gamma": jnp.ones((128,), jnp.float32),
        "bn_beta": jnp.zeros((128,), jnp.float32),
        "wl": jax.random.normal(ks[4], (1, 128 * 7 * 7), jnp.float32) * 0.01,
        "bl": jax.random.normal(ks[5], (1,), jnp.float32) * 0.01,
    }


if __name__ == "__main__":
    key = jax.random.PRNGKey(0)
    pkey, xkey1, xkey2 = jax.random.split(key, 3)
    params = init_params(pkey)

    # Small batch -> fully fused single-kernel path.
    x_small = jax.random.normal(xkey1, (2, 1, 28, 28), jnp.float32)
    out_small = jax.block_until_ready(discriminator_forward(x_small, params))
    ref_small = reference_forward(x_small, params)
    assert out_small.shape == (2, 1)
    assert bool(jnp.all(jnp.isfinite(out_small)))
    assert bool(jnp.all((out_small >= 0.0) & (out_small <= 1.0)))
    assert float(jnp.max(jnp.abs(out_small - ref_small))) < 3e-2

    # Larger batch -> tiled conv-stack + gridded head path (exercises grid,
    # batch padding and the BN partial-sum masking).
    x_big = jax.random.normal(xkey2, (37, 1, 28, 28), jnp.float32)
    out_big = jax.block_until_ready(discriminator_forward(x_big, params))
    ref_big = reference_forward(x_big, params)
    assert out_big.shape == (37, 1)
    assert bool(jnp.all(jnp.isfinite(out_big)))
    assert float(jnp.max(jnp.abs(out_big - ref_big))) < 3e-2

    print("KERNEL_OK")
</pallas_src>

<mosaic_0001>
module attributes {stable_mosaic.version = 11 : i64} {
  func.func @_fused_kernel(%arg0: i32, %arg1: memref<4x98x16xbf16, #tpu.memory_space<vmem>>, %arg2: memref<16x64xbf16, #tpu.memory_space<vmem>>, %arg3: memref<1x64xf32, #tpu.memory_space<vmem>>, %arg4: memref<1024x128xbf16, #tpu.memory_space<vmem>>, %arg5: memref<1x128xf32, #tpu.memory_space<vmem>>, %arg6: memref<1x128xf32, #tpu.memory_space<vmem>>, %arg7: memref<1x128xf32, #tpu.memory_space<vmem>>, %arg8: memref<49x128xf32, #tpu.memory_space<vmem>>, %arg9: memref<1x1xf32, #tpu.memory_space<vmem>>, %arg10: memref<2x1xf32, #tpu.memory_space<vmem>>) attributes {dimension_semantics = [#tpu.dimension_semantics<arbitrary>], iteration_bounds = array<i64: 1>, scalar_prefetch = 0 : i64, scratch_operands = 0 : i64, tpu.core_type = #tpu.core_type<tc>, window_params = [{pipeline_mode = #tpu.pipeline_mode<synchronous>, transform_indices = @transform_0, window_bounds = array<i64: 4, 98, 16>}, {pipeline_mode = #tpu.pipeline_mode<synchronous>, transform_indices = @transform_1, window_bounds = array<i64: 16, 64>}, {pipeline_mode = #tpu.pipeline_mode<synchronous>, transform_indices = @transform_2, window_bounds = array<i64: 1, 64>}, {pipeline_mode = #tpu.pipeline_mode<synchronous>, transform_indices = @transform_3, window_bounds = array<i64: 1024, 128>}, {pipeline_mode = #tpu.pipeline_mode<synchronous>, transform_indices = @transform_4, window_bounds = array<i64: 1, 128>}, {pipeline_mode = #tpu.pipeline_mode<synchronous>, transform_indices = @transform_5, window_bounds = array<i64: 1, 128>}, {pipeline_mode = #tpu.pipeline_mode<synchronous>, transform_indices = @transform_6, window_bounds = array<i64: 1, 128>}, {pipeline_mode = #tpu.pipeline_mode<synchronous>, transform_indices = @transform_7, window_bounds = array<i64: 49, 128>}, {pipeline_mode = #tpu.pipeline_mode<synchronous>, transform_indices = @transform_8, window_bounds = array<i64: 1, 1>}, {pipeline_mode = #tpu.pipeline_mode<synchronous>, transform_indices = @transform_9, window_bounds = array<i64: 2, 1>}]} {
    %c0 = arith.constant 0 : index
    %c0_0 = arith.constant 0 : index
    %0 = vector.load %arg2[%c0, %c0_0] : memref<16x64xbf16, #tpu.memory_space<vmem>>, vector<16x64xbf16>
    %c0_1 = arith.constant 0 : index
    %c0_2 = arith.constant 0 : index
    %1 = vector.load %arg3[%c0_1, %c0_2] : memref<1x64xf32, #tpu.memory_space<vmem>>, vector<1x64xf32>
    %c0_3 = arith.constant 0 : index
    %c0_4 = arith.constant 0 : index
    %2 = vector.load %arg4[%c0_3, %c0_4] : memref<1024x128xbf16, #tpu.memory_space<vmem>>, vector<1024x128xbf16>
    %c0_5 = arith.constant 0 : index
    %c0_6 = arith.constant 0 : index
    %3 = vector.load %arg5[%c0_5, %c0_6] : memref<1x128xf32, #tpu.memory_space<vmem>>, vector<1x128xf32>
    %4 = tpu.iota {dimensions = array<i32: 0>} : vector<98x1xi32>
    %c49_i32 = arith.constant 49 : i32
    %c0_i32 = arith.constant 0 : i32
    %5 = arith.cmpi eq, %c49_i32, %c0_i32 : i32
    %c1_i32 = arith.constant 1 : i32
    %6 = arith.select %5, %c1_i32, %c49_i32 : i32
    %7 = vector.broadcast %6 : i32 to vector<98x1xi32>
    %8 = arith.remsi %4, %7 : vector<98x1xi32>
    %c0_i32_7 = arith.constant 0 : i32
    %9 = vector.broadcast %c0_i32_7 : i32 to vector<98x1xi32>
    %10 = arith.cmpi ne, %8, %9 : vector<98x1xi32>
    %c0_i32_8 = arith.constant 0 : i32
    %11 = vector.broadcast %c0_i32_8 : i32 to vector<98x1xi32>
    %12 = arith.cmpi slt, %8, %11 : vector<98x1xi32>
    %c0_i32_9 = arith.constant 0 : i32
    %13 = arith.cmpi slt, %6, %c0_i32_9 : i32
    %14 = vector.broadcast %13 : i1 to vector<98x1xi1>
    %15 = vector.broadcast %14 : vector<98x1xi1> to vector<98x1xi1>
    %16 = arith.xori %12, %15 : vector<98x1xi1>
    %17 = arith.andi %16, %10 : vector<98x1xi1>
    %18 = vector.broadcast %6 : i32 to vector<98x1xi32>
    %19 = arith.addi %8, %18 : vector<98x1xi32>
    %20 = arith.select %17, %19, %8 : vector<98x1xi1>, vector<98x1xi32>
    %c7_i32 = arith.constant 7 : i32
    %c0_i32_10 = arith.constant 0 : i32
    %21 = arith.cmpi eq, %c7_i32, %c0_i32_10 : i32
    %c1_i32_11 = arith.constant 1 : i32
    %22 = arith.select %21, %c1_i32_11, %c7_i32 : i32
    %23 = vector.broadcast %22 : i32 to vector<98x1xi32>
    %24 = arith.remsi %4, %23 : vector<98x1xi32>
    %c0_i32_12 = arith.constant 0 : i32
    %25 = vector.broadcast %c0_i32_12 : i32 to vector<98x1xi32>
    %26 = arith.cmpi ne, %24, %25 : vector<98x1xi32>
    %c0_i32_13 = arith.constant 0 : i32
    %27 = vector.broadcast %c0_i32_13 : i32 to vector<98x1xi32>
    %28 = arith.cmpi slt, %24, %27 : vector<98x1xi32>
    %c0_i32_14 = arith.constant 0 : i32
    %29 = arith.cmpi slt, %22, %c0_i32_14 : i32
    %30 = vector.broadcast %29 : i1 to vector<98x1xi1>
    %31 = vector.broadcast %30 : vector<98x1xi1> to vector<98x1xi1>
    %32 = arith.xori %28, %31 : vector<98x1xi1>
    %33 = arith.andi %32, %26 : vector<98x1xi1>
    %34 = vector.broadcast %22 : i32 to vector<98x1xi32>
    %35 = arith.addi %24, %34 : vector<98x1xi32>
    %36 = arith.select %33, %35, %24 : vector<98x1xi1>, vector<98x1xi32>
    %c0_15 = arith.constant 0 : index
    %c0_16 = arith.constant 0 : index
    %c0_17 = arith.constant 0 : index
    %37 = vector.load %arg1[%c0_15, %c0_16, %c0_17] : memref<4x98x16xbf16, #tpu.memory_space<vmem>>, vector<1x98x16xbf16>
    %38 = vector.shape_cast %37 : vector<1x98x16xbf16> to vector<98x16xbf16>
    %cst = arith.constant dense<0.000000e+00> : vector<98x64xf32>
    %39 = tpu.matmul %38, %0, %cst {dimension_numbers = #tpu.dot_dimension_numbers<[1], [0], [0], [1], [0, 0, 1, 1], [], []>} : vector<98x16xbf16>, vector<16x64xbf16>, vector<98x64xf32> -> vector<98x64xf32>
    %40 = vector.broadcast %1 : vector<1x64xf32> to vector<98x64xf32>
    %41 = arith.addf %39, %40 : vector<98x64xf32>
    %cst_18 = arith.constant 0.000000e+00 : f32
    %42 = vector.broadcast %cst_18 : f32 to vector<98x64xf32>
    %43 = arith.cmpf ogt, %41, %42 : vector<98x64xf32>
    %cst_19 = arith.constant 2.000000e-01 : f32
    %44 = vector.broadcast %cst_19 : f32 to vector<98x64xf32>
    %45 = arith.mulf %44, %41 : vector<98x64xf32>
    %46 = arith.select %43, %41, %45 : vector<98x64xi1>, vector<98x64xf32>
    %47 = arith.truncf %46 : vector<98x64xf32> to vector<98x64xbf16>
    %c1 = arith.constant 1 : index
    %c0_20 = arith.constant 0 : index
    %c0_21 = arith.constant 0 : index
    %48 = vector.load %arg1[%c1, %c0_20, %c0_21] : memref<4x98x16xbf16, #tpu.memory_space<vmem>>, vector<1x98x16xbf16>
    %49 = vector.shape_cast %48 : vector<1x98x16xbf16> to vector<98x16xbf16>
    %cst_22 = arith.constant dense<0.000000e+00> : vector<98x64xf32>
    %50 = tpu.matmul %49, %0, %cst_22 {dimension_numbers = #tpu.dot_dimension_numbers<[1], [0], [0], [1], [0, 0, 1, 1], [], []>} : vector<98x16xbf16>, vector<16x64xbf16>, vector<98x64xf32> -> vector<98x64xf32>
    %51 = vector.broadcast %1 : vector<1x64xf32> to vector<98x64xf32>
    %52 = arith.addf %50, %51 : vector<98x64xf32>
    %cst_23 = arith.constant 0.000000e+00 : f32
    %53 = vector.broadcast %cst_23 : f32 to vector<98x64xf32>
    %54 = arith.cmpf ogt, %52, %53 : vector<98x64xf32>
    %cst_24 = arith.constant 2.000000e-01 : f32
    %55 = vector.broadcast %cst_24 : f32 to vector<98x64xf32>
    %56 = arith.mulf %55, %52 : vector<98x64xf32>
    %57 = arith.select %54, %52, %56 : vector<98x64xi1>, vector<98x64xf32>
    %58 = arith.truncf %57 : vector<98x64xf32> to vector<98x64xbf16>
    %c2 = arith.constant 2 : index
    %c0_25 = arith.constant 0 : index
    %c0_26 = arith.constant 0 : index
    %59 = vector.load %arg1[%c2, %c0_25, %c0_26] : memref<4x98x16xbf16, #tpu.memory_space<vmem>>, vector<1x98x16xbf16>
    %60 = vector.shape_cast %59 : vector<1x98x16xbf16> to vector<98x16xbf16>
    %cst_27 = arith.constant dense<0.000000e+00> : vector<98x64xf32>
    %61 = tpu.matmul %60, %0, %cst_27 {dimension_numbers = #tpu.dot_dimension_numbers<[1], [0], [0], [1], [0, 0, 1, 1], [], []>} : vector<98x16xbf16>, vector<16x64xbf16>, vector<98x64xf32> -> vector<98x64xf32>
    %62 = vector.broadcast %1 : vector<1x64xf32> to vector<98x64xf32>
    %63 = arith.addf %61, %62 : vector<98x64xf32>
    %cst_28 = arith.constant 0.000000e+00 : f32
    %64 = vector.broadcast %cst_28 : f32 to vector<98x64xf32>
    %65 = arith.cmpf ogt, %63, %64 : vector<98x64xf32>
    %cst_29 = arith.constant 2.000000e-01 : f32
    %66 = vector.broadcast %cst_29 : f32 to vector<98x64xf32>
    %67 = arith.mulf %66, %63 : vector<98x64xf32>
    %68 = arith.select %65, %63, %67 : vector<98x64xi1>, vector<98x64xf32>
    %69 = arith.truncf %68 : vector<98x64xf32> to vector<98x64xbf16>
    %c3 = arith.constant 3 : index
    %c0_30 = arith.constant 0 : index
    %c0_31 = arith.constant 0 : index
    %70 = vector.load %arg1[%c3, %c0_30, %c0_31] : memref<4x98x16xbf16, #tpu.memory_space<vmem>>, vector<1x98x16xbf16>
    %71 = vector.shape_cast %70 : vector<1x98x16xbf16> to vector<98x16xbf16>
    %cst_32 = arith.constant dense<0.000000e+00> : vector<98x64xf32>
    %72 = tpu.matmul %71, %0, %cst_32 {dimension_numbers = #tpu.dot_dimension_numbers<[1], [0], [0], [1], [0, 0, 1, 1], [], []>} : vector<98x16xbf16>, vector<16x64xbf16>, vector<98x64xf32> -> vector<98x64xf32>
    %73 = vector.broadcast %1 : vector<1x64xf32> to vector<98x64xf32>
    %74 = arith.addf %72, %73 : vector<98x64xf32>
    %cst_33 = arith.constant 0.000000e+00 : f32
    %75 = vector.broadcast %cst_33 : f32 to vector<98x64xf32>
    %76 = arith.cmpf ogt, %74, %75 : vector<98x64xf32>
    %cst_34 = arith.constant 2.000000e-01 : f32
    %77 = vector.broadcast %cst_34 : f32 to vector<98x64xf32>
    %78 = arith.mulf %77, %74 : vector<98x64xf32>
    %79 = arith.select %76, %74, %78 : vector<98x64xi1>, vector<98x64xf32>
    %80 = arith.truncf %79 : vector<98x64xf32> to vector<98x64xbf16>
    %cst_35 = arith.constant 0.000000e+00 : bf16
    %81 = vector.broadcast %cst_35 : bf16 to vector<8x64xbf16>
    %82 = vector.extract_strided_slice %47 {offsets = [0, 0], sizes = [90, 64], strides = [1, 1]} : vector<98x64xbf16> to vector<90x64xbf16>
    %83 = tpu.concatenate %81, %82 in 0 : vector<8x64xbf16>, vector<90x64xbf16> -> vector<98x64xbf16>
    %c7_i32_36 = arith.constant 7 : i32
    %84 = vector.broadcast %c7_i32_36 : i32 to vector<98x1xi32>
    %85 = arith.cmpi sge, %20, %84 : vector<98x1xi32>
    %c1_i32_37 = arith.constant 1 : i32
    %86 = vector.broadcast %c1_i32_37 : i32 to vector<98x1xi32>
    %87 = arith.cmpi sge, %36, %86 : vector<98x1xi32>
    %88 = arith.andi %85, %87 : vector<98x1xi1>
    %c0_i32_38 = arith.constant 0 : i32
    %89 = arith.sitofp %c0_i32_38 : i32 to bf16
    %90 = vector.shape_cast %88 : vector<98x1xi1> to vector<98x1xi1>
    %91 = vector.broadcast %90 : vector<98x1xi1> to vector<98x64xi1>
    %92 = vector.broadcast %89 : bf16 to vector<98x64xbf16>
    %93 = arith.select %91, %83, %92 : vector<98x64xi1>, vector<98x64xbf16>
    %cst_39 = arith.constant 0.000000e+00 : bf16
    %94 = vector.broadcast %cst_39 : bf16 to vector<7x64xbf16>
    %95 = vector.extract_strided_slice %58 {offsets = [0, 0], sizes = [91, 64], strides = [1, 1]} : vector<98x64xbf16> to vector<91x64xbf16>
    %96 = tpu.concatenate %94, %95 in 0 : vector<7x64xbf16>, vector<91x64xbf16> -> vector<98x64xbf16>
    %c7_i32_40 = arith.constant 7 : i32
    %97 = vector.broadcast %c7_i32_40 : i32 to vector<98x1xi32>
    %98 = arith.cmpi sge, %20, %97 : vector<98x1xi32>
    %c0_i32_41 = arith.constant 0 : i32
    %99 = arith.sitofp %c0_i32_41 : i32 to bf16
    %100 = vector.shape_cast %98 : vector<98x1xi1> to vector<98x1xi1>
    %101 = vector.broadcast %100 : vector<98x1xi1> to vector<98x64xi1>
    %102 = vector.broadcast %99 : bf16 to vector<98x64xbf16>
    %103 = arith.select %101, %96, %102 : vector<98x64xi1>, vector<98x64xbf16>
    %cst_42 = arith.constant 0.000000e+00 : bf16
    %104 = vector.broadcast %cst_42 : bf16 to vector<7x64xbf16>
    %105 = vector.extract_strided_slice %47 {offsets = [0, 0], sizes = [91, 64], strides = [1, 1]} : vector<98x64xbf16> to vector<91x64xbf16>
    %106 = tpu.concatenate %104, %105 in 0 : vector<7x64xbf16>, vector<91x64xbf16> -> vector<98x64xbf16>
    %c7_i32_43 = arith.constant 7 : i32
    %107 = vector.broadcast %c7_i32_43 : i32 to vector<98x1xi32>
    %108 = arith.cmpi sge, %20, %107 : vector<98x1xi32>
    %c0_i32_44 = arith.constant 0 : i32
    %109 = arith.sitofp %c0_i32_44 : i32 to bf16
    %110 = vector.shape_cast %108 : vector<98x1xi1> to vector<98x1xi1>
    %111 = vector.broadcast %110 : vector<98x1xi1> to vector<98x64xi1>
    %112 = vector.broadcast %109 : bf16 to vector<98x64xbf16>
    %113 = arith.select %111, %106, %112 : vector<98x64xi1>, vector<98x64xbf16>
    %cst_45 = arith.constant 0.000000e+00 : bf16
    %114 = vector.broadcast %cst_45 : bf16 to vector<6x64xbf16>
    %115 = vector.extract_strided_slice %58 {offsets = [0, 0], sizes = [92, 64], strides = [1, 1]} : vector<98x64xbf16> to vector<92x64xbf16>
    %116 = tpu.concatenate %114, %115 in 0 : vector<6x64xbf16>, vector<92x64xbf16> -> vector<98x64xbf16>
    %c7_i32_46 = arith.constant 7 : i32
    %117 = vector.broadcast %c7_i32_46 : i32 to vector<98x1xi32>
    %118 = arith.cmpi sge, %20, %117 : vector<98x1xi32>
    %c6_i32 = arith.constant 6 : i32
    %119 = vector.broadcast %c6_i32 : i32 to vector<98x1xi32>
    %120 = arith.cmpi slt, %36, %119 : vector<98x1xi32>
    %121 = arith.andi %118, %120 : vector<98x1xi1>
    %c0_i32_47 = arith.constant 0 : i32
    %122 = arith.sitofp %c0_i32_47 : i32 to bf16
    %123 = vector.shape_cast %121 : vector<98x1xi1> to vector<98x1xi1>
    %124 = vector.broadcast %123 : vector<98x1xi1> to vector<98x64xi1>
    %125 = vector.broadcast %122 : bf16 to vector<98x64xbf16>
    %126 = arith.select %124, %116, %125 : vector<98x64xi1>, vector<98x64xbf16>
    %cst_48 = arith.constant 0.000000e+00 : bf16
    %127 = vector.broadcast %cst_48 : bf16 to vector<1x64xbf16>
    %128 = vector.extract_strided_slice %69 {offsets = [0, 0], sizes = [97, 64], strides = [1, 1]} : vector<98x64xbf16> to vector<97x64xbf16>
    %129 = tpu.concatenate %127, %128 in 0 : vector<1x64xbf16>, vector<97x64xbf16> -> vector<98x64xbf16>
    %c1_i32_49 = arith.constant 1 : i32
    %130 = vector.broadcast %c1_i32_49 : i32 to vector<98x1xi32>
    %131 = arith.cmpi sge, %36, %130 : vector<98x1xi32>
    %c0_i32_50 = arith.constant 0 : i32
    %132 = arith.sitofp %c0_i32_50 : i32 to bf16
    %133 = vector.shape_cast %131 : vector<98x1xi1> to vector<98x1xi1>
    %134 = vector.broadcast %133 : vector<98x1xi1> to vector<98x64xi1>
    %135 = vector.broadcast %132 : bf16 to vector<98x64xbf16>
    %136 = arith.select %134, %129, %135 : vector<98x64xi1>, vector<98x64xbf16>
    %cst_51 = arith.constant 0.000000e+00 : bf16
    %137 = vector.broadcast %cst_51 : bf16 to vector<1x64xbf16>
    %138 = vector.extract_strided_slice %80 {offsets = [1, 0], sizes = [97, 64], strides = [1, 1]} : vector<98x64xbf16> to vector<97x64xbf16>
    %139 = tpu.concatenate %138, %137 in 0 : vector<97x64xbf16>, vector<1x64xbf16> -> vector<98x64xbf16>
    %c6_i32_52 = arith.constant 6 : i32
    %140 = vector.broadcast %c6_i32_52 : i32 to vector<98x1xi32>
    %141 = arith.cmpi slt, %36, %140 : vector<98x1xi32>
    %c0_i32_53 = arith.constant 0 : i32
    %142 = arith.sitofp %c0_i32_53 : i32 to bf16
    %143 = vector.shape_cast %141 : vector<98x1xi1> to vector<98x1xi1>
    %144 = vector.broadcast %143 : vector<98x1xi1> to vector<98x64xi1>
    %145 = vector.broadcast %142 : bf16 to vector<98x64xbf16>
    %146 = arith.select %144, %139, %145 : vector<98x64xi1>, vector<98x64xbf16>
    %cst_54 = arith.constant 0.000000e+00 : bf16
    %147 = vector.broadcast %cst_54 : bf16 to vector<1x64xbf16>
    %148 = vector.extract_strided_slice %47 {offsets = [0, 0], sizes = [97, 64], strides = [1, 1]} : vector<98x64xbf16> to vector<97x64xbf16>
    %149 = tpu.concatenate %147, %148 in 0 : vector<1x64xbf16>, vector<97x64xbf16> -> vector<98x64xbf16>
    %c1_i32_55 = arith.constant 1 : i32
    %150 = vector.broadcast %c1_i32_55 : i32 to vector<98x1xi32>
    %151 = arith.cmpi sge, %36, %150 : vector<98x1xi32>
    %c0_i32_56 = arith.constant 0 : i32
    %152 = arith.sitofp %c0_i32_56 : i32 to bf16
    %153 = vector.shape_cast %151 : vector<98x1xi1> to vector<98x1xi1>
    %154 = vector.broadcast %153 : vector<98x1xi1> to vector<98x64xi1>
    %155 = vector.broadcast %152 : bf16 to vector<98x64xbf16>
    %156 = arith.select %154, %149, %155 : vector<98x64xi1>, vector<98x64xbf16>
    %cst_57 = arith.constant 0.000000e+00 : bf16
    %157 = vector.broadcast %cst_57 : bf16 to vector<1x64xbf16>
    %158 = vector.extract_strided_slice %58 {offsets = [1, 0], sizes = [97, 64], strides = [1, 1]} : vector<98x64xbf16> to vector<97x64xbf16>
    %159 = tpu.concatenate %158, %157 in 0 : vector<97x64xbf16>, vector<1x64xbf16> -> vector<98x64xbf16>
    %c6_i32_58 = arith.constant 6 : i32
    %160 = vector.broadcast %c6_i32_58 : i32 to vector<98x1xi32>
    %161 = arith.cmpi slt, %36, %160 : vector<98x1xi32>
    %c0_i32_59 = arith.constant 0 : i32
    %162 = arith.sitofp %c0_i32_59 : i32 to bf16
    %163 = vector.shape_cast %161 : vector<98x1xi1> to vector<98x1xi1>
    %164 = vector.broadcast %163 : vector<98x1xi1> to vector<98x64xi1>
    %165 = vector.broadcast %162 : bf16 to vector<98x64xbf16>
    %166 = arith.select %164, %159, %165 : vector<98x64xi1>, vector<98x64xbf16>
    %cst_60 = arith.constant 0.000000e+00 : bf16
    %167 = vector.broadcast %cst_60 : bf16 to vector<6x64xbf16>
    %168 = vector.extract_strided_slice %69 {offsets = [6, 0], sizes = [92, 64], strides = [1, 1]} : vector<98x64xbf16> to vector<92x64xbf16>
    %169 = tpu.concatenate %168, %167 in 0 : vector<92x64xbf16>, vector<6x64xbf16> -> vector<98x64xbf16>
    %c42_i32 = arith.constant 42 : i32
    %170 = vector.broadcast %c42_i32 : i32 to vector<98x1xi32>
    %171 = arith.cmpi slt, %20, %170 : vector<98x1xi32>
    %c1_i32_61 = arith.constant 1 : i32
    %172 = vector.broadcast %c1_i32_61 : i32 to vector<98x1xi32>
    %173 = arith.cmpi sge, %36, %172 : vector<98x1xi32>
    %174 = arith.andi %171, %173 : vector<98x1xi1>
    %c0_i32_62 = arith.constant 0 : i32
    %175 = arith.sitofp %c0_i32_62 : i32 to bf16
    %176 = vector.shape_cast %174 : vector<98x1xi1> to vector<98x1xi1>
    %177 = vector.broadcast %176 : vector<98x1xi1> to vector<98x64xi1>
    %178 = vector.broadcast %175 : bf16 to vector<98x64xbf16>
    %179 = arith.select %177, %169, %178 : vector<98x64xi1>, vector<98x64xbf16>
    %cst_63 = arith.constant 0.000000e+00 : bf16
    %180 = vector.broadcast %cst_63 : bf16 to vector<7x64xbf16>
    %181 = vector.extract_strided_slice %80 {offsets = [7, 0], sizes = [91, 64], strides = [1, 1]} : vector<98x64xbf16> to vector<91x64xbf16>
    %182 = tpu.concatenate %181, %180 in 0 : vector<91x64xbf16>, vector<7x64xbf16> -> vector<98x64xbf16>
    %c42_i32_64 = arith.constant 42 : i32
    %183 = vector.broadcast %c42_i32_64 : i32 to vector<98x1xi32>
    %184 = arith.cmpi slt, %20, %183 : vector<98x1xi32>
    %c0_i32_65 = arith.constant 0 : i32
    %185 = arith.sitofp %c0_i32_65 : i32 to bf16
    %186 = vector.shape_cast %184 : vector<98x1xi1> to vector<98x1xi1>
    %187 = vector.broadcast %186 : vector<98x1xi1> to vector<98x64xi1>
    %188 = vector.broadcast %185 : bf16 to vector<98x64xbf16>
    %189 = arith.select %187, %182, %188 : vector<98x64xi1>, vector<98x64xbf16>
    %cst_66 = arith.constant 0.000000e+00 : bf16
    %190 = vector.broadcast %cst_66 : bf16 to vector<7x64xbf16>
    %191 = vector.extract_strided_slice %69 {offsets = [7, 0], sizes = [91, 64], strides = [1, 1]} : vector<98x64xbf16> to vector<91x64xbf16>
    %192 = tpu.concatenate %191, %190 in 0 : vector<91x64xbf16>, vector<7x64xbf16> -> vector<98x64xbf16>
    %c42_i32_67 = arith.constant 42 : i32
    %193 = vector.broadcast %c42_i32_67 : i32 to vector<98x1xi32>
    %194 = arith.cmpi slt, %20, %193 : vector<98x1xi32>
    %c0_i32_68 = arith.constant 0 : i32
    %195 = arith.sitofp %c0_i32_68 : i32 to bf16
    %196 = vector.shape_cast %194 : vector<98x1xi1> to vector<98x1xi1>
    %197 = vector.broadcast %196 : vector<98x1xi1> to vector<98x64xi1>
    %198 = vector.broadcast %195 : bf16 to vector<98x64xbf16>
    %199 = arith.select %197, %192, %198 : vector<98x64xi1>, vector<98x64xbf16>
    %cst_69 = arith.constant 0.000000e+00 : bf16
    %200 = vector.broadcast %cst_69 : bf16 to vector<8x64xbf16>
    %201 = vector.extract_strided_slice %80 {offsets = [8, 0], sizes = [90, 64], strides = [1, 1]} : vector<98x64xbf16> to vector<90x64xbf16>
    %202 = tpu.concatenate %201, %200 in 0 : vector<90x64xbf16>, vector<8x64xbf16> -> vector<98x64xbf16>
    %c42_i32_70 = arith.constant 42 : i32
    %203 = vector.broadcast %c42_i32_70 : i32 to vector<98x1xi32>
    %204 = arith.cmpi slt, %20, %203 : vector<98x1xi32>
    %c6_i32_71 = arith.constant 6 : i32
    %205 = vector.broadcast %c6_i32_71 : i32 to vector<98x1xi32>
    %206 = arith.cmpi slt, %36, %205 : vector<98x1xi32>
    %207 = arith.andi %204, %206 : vector<98x1xi1>
    %c0_i32_72 = arith.constant 0 : i32
    %208 = arith.sitofp %c0_i32_72 : i32 to bf16
    %209 = vector.shape_cast %207 : vector<98x1xi1> to vector<98x1xi1>
    %210 = vector.broadcast %209 : vector<98x1xi1> to vector<98x64xi1>
    %211 = vector.broadcast %208 : bf16 to vector<98x64xbf16>
    %212 = arith.select %210, %202, %211 : vector<98x64xi1>, vector<98x64xbf16>
    %213 = tpu.concatenate %93, %103, %113, %126, %136, %80, %69, %146, %156, %58, %47, %166, %179, %189, %199, %212 in 1 : vector<98x64xbf16>, vector<98x64xbf16>, vector<98x64xbf16>, vector<98x64xbf16>, vector<98x64xbf16>, vector<98x64xbf16>, vector<98x64xbf16>, vector<98x64xbf16>, vector<98x64xbf16>, vector<98x64xbf16>, vector<98x64xbf16>, vector<98x64xbf16>, vector<98x64xbf16>, vector<98x64xbf16>, vector<98x64xbf16>, vector<98x64xbf16> -> vector<98x1024xbf16>
    %cst_73 = arith.constant dense<0.000000e+00> : vector<98x128xf32>
    %214 = tpu.matmul %213, %2, %cst_73 {dimension_numbers = #tpu.dot_dimension_numbers<[1], [0], [0], [1], [0, 0, 1, 1], [], []>} : vector<98x1024xbf16>, vector<1024x128xbf16>, vector<98x128xf32> -> vector<98x128xf32>
    %215 = vector.broadcast %3 : vector<1x128xf32> to vector<98x128xf32>
    %216 = arith.addf %214, %215 : vector<98x128xf32>
    %cst_74 = arith.constant dense<0.000000e+00> : vector<128xf32>
    %217 = vector.multi_reduction <add>, %216, %cst_74 [0] : vector<98x128xf32> to vector<128xf32>
    %218 = vector.shape_cast %217 : vector<128xf32> to vector<1x128xf32>
    %cst_75 = arith.constant 9.800000e+01 : f32
    %219 = vector.broadcast %cst_75 : f32 to vector<1x128xf32>
    %220 = arith.divf %218, %219 : vector<1x128xf32>
    %221 = vector.broadcast %220 : vector<1x128xf32> to vector<98x128xf32>
    %222 = arith.subf %216, %221 : vector<98x128xf32>
    %223 = arith.mulf %222, %222 : vector<98x128xf32>
    %cst_76 = arith.constant dense<0.000000e+00> : vector<128xf32>
    %224 = vector.multi_reduction <add>, %223, %cst_76 [0] : vector<98x128xf32> to vector<128xf32>
    %225 = vector.shape_cast %224 : vector<128xf32> to vector<1x128xf32>
    %cst_77 = arith.constant 9.800000e+01 : f32
    %226 = vector.broadcast %cst_77 : f32 to vector<1x128xf32>
    %227 = arith.divf %225, %226 : vector<1x128xf32>
    %c0_78 = arith.constant 0 : index
    %c0_79 = arith.constant 0 : index
    %228 = vector.load %arg6[%c0_78, %c0_79] : memref<1x128xf32, #tpu.memory_space<vmem>>, vector<1x128xf32>
    %cst_80 = arith.constant 9.99999974E-6 : f32
    %229 = vector.broadcast %cst_80 : f32 to vector<1x128xf32>
    %230 = arith.addf %227, %229 : vector<1x128xf32>
    %231 = math.rsqrt %230 : vector<1x128xf32>
    %232 = arith.mulf %228, %231 : vector<1x128xf32>
    %233 = vector.broadcast %220 : vector<1x128xf32> to vector<98x128xf32>
    %234 = arith.subf %216, %233 : vector<98x128xf32>
    %235 = vector.broadcast %232 : vector<1x128xf32> to vector<98x128xf32>
    %236 = arith.mulf %234, %235 : vector<98x128xf32>
    %c0_81 = arith.constant 0 : index
    %c0_82 = arith.constant 0 : index
    %237 = vector.load %arg7[%c0_81, %c0_82] : memref<1x128xf32, #tpu.memory_space<vmem>>, vector<1x128xf32>
    %238 = vector.broadcast %237 : vector<1x128xf32> to vector<98x128xf32>
    %239 = arith.addf %236, %238 : vector<98x128xf32>
    %cst_83 = arith.constant 0.000000e+00 : f32
    %240 = vector.broadcast %cst_83 : f32 to vector<98x128xf32>
    %241 = arith.cmpf ogt, %239, %240 : vector<98x128xf32>
    %cst_84 = arith.constant 2.000000e-01 : f32
    %242 = vector.broadcast %cst_84 : f32 to vector<98x128xf32>
    %243 = arith.mulf %242, %239 : vector<98x128xf32>
    %244 = arith.select %241, %239, %243 : vector<98x128xi1>, vector<98x128xf32>
    %c0_85 = arith.constant 0 : index
    %c0_86 = arith.constant 0 : index
    %245 = vector.load %arg8[%c0_85, %c0_86] : memref<49x128xf32, #tpu.memory_space<vmem>>, vector<49x128xf32>
    %c0_87 = arith.constant 0 : index
    %c0_88 = arith.constant 0 : index
    %246 = vector.load %arg9[%c0_87, %c0_88] : memref<1x1xf32, #tpu.memory_space<vmem>>, vector<1x1xf32>
    %247 = tpu.concatenate %245, %245 in 0 : vector<49x128xf32>, vector<49x128xf32> -> vector<98x128xf32>
    %248 = arith.mulf %244, %247 : vector<98x128xf32>
    %cst_89 = arith.constant dense<0.000000e+00> : vector<98xf32>
    %249 = vector.multi_reduction <add>, %248, %cst_89 [1] : vector<98x128xf32> to vector<98xf32>
    %250 = vector.shape_cast %249 : vector<98xf32> to vector<98x1xf32>
    %251 = tpu.iota {dimensions = array<i32: 0>} : vector<2x98xi32>
    %252 = tpu.iota {dimensions = array<i32: 1>} : vector<2x98xi32>
    %c49_i32_90 = arith.constant 49 : i32
    %253 = vector.broadcast %c49_i32_90 : i32 to vector<2x98xi32>
    %254 = arith.muli %253, %251 : vector<2x98xi32>
    %255 = arith.cmpi sge, %252, %254 : vector<2x98xi32>
    %c1_i32_91 = arith.constant 1 : i32
    %256 = vector.broadcast %c1_i32_91 : i32 to vector<2x98xi32>
    %257 = arith.addi %251, %256 : vector<2x98xi32>
    %c49_i32_92 = arith.constant 49 : i32
    %258 = vector.broadcast %c49_i32_92 : i32 to vector<2x98xi32>
    %259 = arith.muli %258, %257 : vector<2x98xi32>
    %260 = arith.cmpi slt, %252, %259 : vector<2x98xi32>
    %261 = arith.andi %255, %260 : vector<2x98xi1>
    %262 = arith.extui %261 : vector<2x98xi1> to vector<2x98xi32>
    %263 = arith.sitofp %262 : vector<2x98xi32> to vector<2x98xf32>
    %cst_93 = arith.constant dense<0.000000e+00> : vector<2x1xf32>
    %264 = tpu.matmul %263, %250, %cst_93 {dimension_numbers = #tpu.dot_dimension_numbers<[1], [0], [0], [1], [0, 0, 1, 1], [], []>} : vector<2x98xf32>, vector<98x1xf32>, vector<2x1xf32> -> vector<2x1xf32>
    %265 = vector.broadcast %246 : vector<1x1xf32> to vector<2x1xf32>
    %266 = arith.addf %264, %265 : vector<2x1xf32>
    %cst_94 = arith.constant 0.000000e+00 : f32
    %267 = vector.broadcast %cst_94 : f32 to vector<2x1xf32>
    %268 = arith.subf %267, %266 : vector<2x1xf32>
    %269 = math.exp %268 : vector<2x1xf32>
    %cst_95 = arith.constant 1.000000e+00 : f32
    %270 = vector.broadcast %cst_95 : f32 to vector<2x1xf32>
    %271 = arith.addf %270, %269 : vector<2x1xf32>
    %cst_96 = arith.constant 1.000000e+00 : f32
    %272 = vector.broadcast %cst_96 : f32 to vector<2x1xf32>
    %273 = arith.divf %272, %271 : vector<2x1xf32>
    %c0_97 = arith.constant 0 : index
    %c0_98 = arith.constant 0 : index
    %274 = vector.load %arg10[%c0_97, %c0_98] : memref<2x1xf32, #tpu.memory_space<vmem>>, vector<2x1xf32>
    tpu.vector_store %arg10[%c0_97, %c0_98], %273 {strides = array<i32>} : memref<2x1xf32, #tpu.memory_space<vmem>>, vector<2x1xf32>,
    return
  }
  func.func @transform_0(%arg0: i32) -> (i32, i32, i32) {
    %c0_i32 = arith.constant 0 : i32
    %c0_i32_0 = arith.constant 0 : i32
    %c0_i32_1 = arith.constant 0 : i32
    %c0_i32_2 = arith.constant 0 : i32
    return %c0_i32, %c0_i32_0, %c0_i32_1 : i32, i32, i32
  }
  func.func @transform_1(%arg0: i32) -> (i32, i32) {
    %c0_i32 = arith.constant 0 : i32
    %c0_i32_0 = arith.constant 0 : i32
    %c0_i32_1 = arith.constant 0 : i32
    return %c0_i32, %c0_i32_0 : i32, i32
  }
  func.func @transform_2(%arg0: i32) -> (i32, i32) {
    %c0_i32 = arith.constant 0 : i32
    %c0_i32_0 = arith.constant 0 : i32
    %c0_i32_1 = arith.constant 0 : i32
    return %c0_i32, %c0_i32_0 : i32, i32
  }
  func.func @transform_3(%arg0: i32) -> (i32, i32) {
    %c0_i32 = arith.constant 0 : i32
    %c0_i32_0 = arith.constant 0 : i32
    %c0_i32_1 = arith.constant 0 : i32
    return %c0_i32, %c0_i32_0 : i32, i32
  }
  func.func @transform_4(%arg0: i32) -> (i32, i32) {
    %c0_i32 = arith.constant 0 : i32
    %c0_i32_0 = arith.constant 0 : i32
    %c0_i32_1 = arith.constant 0 : i32
    return %c0_i32, %c0_i32_0 : i32, i32
  }
  func.func @transform_5(%arg0: i32) -> (i32, i32) {
    %c0_i32 = arith.constant 0 : i32
    %c0_i32_0 = arith.constant 0 : i32
    %c0_i32_1 = arith.constant 0 : i32
    return %c0_i32, %c0_i32_0 : i32, i32
  }
  func.func @transform_6(%arg0: i32) -> (i32, i32) {
    %c0_i32 = arith.constant 0 : i32
    %c0_i32_0 = arith.constant 0 : i32
    %c0_i32_1 = arith.constant 0 : i32
    return %c0_i32, %c0_i32_0 : i32, i32
  }
  func.func @transform_7(%arg0: i32) -> (i32, i32) {
    %c0_i32 = arith.constant 0 : i32
    %c0_i32_0 = arith.constant 0 : i32
    %c0_i32_1 = arith.constant 0 : i32
    return %c0_i32, %c0_i32_0 : i32, i32
  }
  func.func @transform_8(%arg0: i32) -> (i32, i32) {
    %c0_i32 = arith.constant 0 : i32
    %c0_i32_0 = arith.constant 0 : i32
    %c0_i32_1 = arith.constant 0 : i32
    return %c0_i32, %c0_i32_0 : i32, i32
  }
  func.func @transform_9(%arg0: i32) -> (i32, i32) {
    %c0_i32 = arith.constant 0 : i32
    %c0_i32_0 = arith.constant 0 : i32
    %c0_i32_1 = arith.constant 0 : i32
    return %c0_i32, %c0_i32_0 : i32, i32
  }
}

</mosaic_0001>

<bundles_post_ra>
// kernel: discriminator_forward.1
= control target key start
LH: loop header
LB: loop body
LE: loop exit
PB: predicated region body
PF: predicated region fallthrough
CT: control target
= control target key end

     0   :  { %v9220_v0 = vmov 0.0   ;;  %vm9205_vm0 = vmmov 0   ;;  %vm696_vm1 = vcmask 130048   ;;  %v9219_v25 = vlaneseq  ;;  %s5011_s11 = smov 64   ;;  %s9195_s1 = inlined_call_operand.vmem [shape: bf16[16,64], index: 1, kind: input, shape index: {}]   ;;  %s9196_s0 = inlined_call_operand.vmem [shape: bf16[4,98,16], index: 0, kind: input, shape index: {}]   ;;  %s9197_s3 = inlined_call_operand.vmem [shape: bf16[1024,128], index: 3, kind: input, shape index: {}]   ;;  %s9198_s2 = inlined_call_operand.vmem [shape: f32[1,64], index: 2, kind: input, shape index: {}]   ;;  %s9199_s4 = inlined_call_operand.vmem [shape: f32[1,128], index: 4, kind: input, shape index: {}]   ;;  %s9200_s5 = inlined_call_operand.vmem [shape: f32[1,128], index: 5, kind: input, shape index: {}]   ;;  %s9201_s6 = inlined_call_operand.vmem [shape: f32[1,128], index: 6, kind: input, shape index: {}]   ;;  %s9202_s7 = inlined_call_operand.vmem [shape: f32[49,128], index: 7, kind: input, shape index: {}]   ;;  %s9203_s8 = inlined_call_operand.<no memory space> [shape: f32[1,1], index: 8, kind: input, shape index: {}]   ;;  %s9204_s9 = inlined_call_operand.vmem [shape: f32[2,1], index: 9, kind: output, shape index: {}]  }
   0x1   :  { %4714 = vmatprep.subr.bf16.mxu1 %v9220_v0  ;;  %v4908_v1 = vld [vmem:[%s9195_s1] sm:$0xff]   ;;  %4716 = vmatprep.mubr.msk.bf16.mxu1 %vm9205_vm0, %v9220_v0  ;;  %v4909_v2 = vld [vmem:[%s9196_s0 + $0x34] sm:$0xff]   ;;  %v4924_v6 = vld [vmem:[%s9196_s0 + $0x8] sm:$0xff]   ;;  %v9225_v40 = vmov 0  }
   0x2   :  { %4684 = vmatprep.subr.bf16.mxu0 %v9220_v0  ;;  %4686 = vmatprep.mubr.msk.bf16.mxu0 %vm9205_vm0, %v9220_v0  ;;  %v4910_v3 = vld [vmem:[%s9196_s0 + $0x3c] sm:$0xff]   ;;  %v4911_v5 = vld [vmem:[%s9196_s0 + $0x44] sm:$0xff]   ;;  %v4912_v7 = vld [vmem:[%s9196_s0 + $0x4c] sm:$0xff]   ;;  %v5211_v26 = vshrl.u32 %v9219_v25, 7  ;;  %v9559_v25 = vmov 0 }
   0x3   :  { %4715 = vmatpush3.bf16.msra.mxu1 %v4908_v1  ;;  %4685 = vmatpush3.bf16.msra.mxu0 %v4908_v1  ;;  %v4923_v4 = vld [vmem:[%s9196_s0] sm:$0xff]   ;;  %v4925_v8 = vld [vmem:[%s9196_s0 + $0x10] sm:$0xff]   ;;  %v4926_v10 = vld [vmem:[%s9196_s0 + $0x18] sm:$0xff]  }
   0x4   :  { %4774 = vmatprep.subr.bf16.mxu1 %v9220_v0  ;;  %4744 = vmatprep.subr.bf16.mxu0 %v9220_v0  ;;  %v4913_v9 = vld [vmem:[%s9196_s0 + $0x54] sm:$0xff]   ;;  %v4914_v11 = vld [vmem:[%s9196_s0 + $0x5c] sm:$0xff]   ;;  %v4915_v13 = vld [vmem:[%s9196_s0 + $0x64] ss:$0 sps:$4 sm:$0x11]   ;;  %9473 = vst [vmem:[#allocation3_spill] sm:$0xff] %v5211_v26 }
   0x5   :  { %v4927_v12 = vld [vmem:[%s9196_s0 + $0x20] sm:$0xff]   ;;  %v4928_v14 = vld [vmem:[%s9196_s0 + $0x28] sm:$0xff]   ;;  %v4929_v16 = vld [vmem:[%s9196_s0 + $0x30] ss:$0 sps:$4 sm:$0x11]   ;;  %v171_v29 = vadd.s32 8, %v5211_v26 }
   0x6   :  { %4717 = vmatmul.mubr.msk.bf16.vlgmr.msra.gmra.mrb[0].mxu1 %vm696_vm1, %v4909_v2  ;;  %4687 = vmatmul.mubr.msk.bf16.vlgmr.msra.gmra.mrb[0].mxu0 %vm696_vm1, %v4923_v4  ;;  %v4916_v15 = vld [vmem:[%s9196_s0 + $0x9c] sm:$0xff]   ;;  %v4917_v17 = vld [vmem:[%s9196_s0 + $0xa4] sm:$0xff]   ;;  %v4918_v19 = vld [vmem:[%s9196_s0 + $0xac] sm:$0xff]   ;;  %v5226_v30 = vmul.u32.u64.low 2454267026, %v5211_v26  ;;  %v5227_v31 = vmul.u32.u64.high 2454267026, %v5211_v26, %v5226_v30  ;;  %v5259_v47 = vadd.s32 16, %v5211_v26 }
   0x7   :  { %4720 = vmatprep.mubr.msk.bf16.mxu1 %vm9205_vm0, %v9220_v0  ;;  %4775 = vmatpush3.bf16.msra.mxu1 %v4908_v1  ;;  %v4930_v18 = vld [vmem:[%s9196_s0 + $0x68] sm:$0xff]   ;;  %v4931_v20 = vld [vmem:[%s9196_s0 + $0x70] sm:$0xff]   ;;  %v4932_v22 = vld [vmem:[%s9196_s0 + $0x78] sm:$0xff]   ;;  %v5230_v32 = vmul.u32.u64.low 2454267026, %v171_v29  ;;  %v5231_v33 = vmul.u32.u64.high 2454267026, %v171_v29, %v5230_v32  ;;  %v5265_v50 = vadd.s32 24, %v5211_v26 }
   0x8   :  { %4690 = vmatprep.mubr.msk.bf16.mxu0 %vm9205_vm0, %v9220_v0  ;;  %4745 = vmatpush3.bf16.msra.mxu0 %v4908_v1  ;;  %v4919_v21 = vld [vmem:[%s9196_s0 + $0xb4] sm:$0xff]   ;;  %v4920_v23 = vld [vmem:[%s9196_s0 + $0xbc] sm:$0xff]   ;;  %v4921_v27 = vld [vmem:[%s9196_s0 + $0xc4] sm:$0xff]   ;;  %v5239_v35 = vmul.u32.u64.low 2804876602, %v5211_v26  ;;  %v5240_v36 = vmul.u32.u64.high 2804876602, %v5211_v26, %v5239_v35 }
   0x9   :  { %v4933_v24 = vld [vmem:[%s9196_s0 + $0x80] sm:$0xff]   ;;  %v4934_v28 = vld [vmem:[%s9196_s0 + $0x88] sm:$0xff]   ;;  %v5242_v37 = vmul.u32.u64.low 2804876602, %v171_v29  ;;  %v5243_v38 = vmul.u32.u64.high 2804876602, %v171_v29, %v5242_v37  ;;  %vm397_vm2 = vc.u32 %v5226_v30, 2454267026 }
   0xa   :  { %v4922_v34 = vld [vmem:[%s9196_s0 + $0xcc] ss:$0 sps:$4 sm:$0x11]   ;;  %v4935_v39 = vld [vmem:[%s9196_s0 + $0x90] sm:$0xff]   ;;  %vm411_vm3 = vc.u32 %v5230_v32, 2454267026 }
   0xb   :  { %v398_v41 = vsel %vm397_vm2, 1, %v9225_v40  ;;  %v412_v42 = vsel %vm411_vm3, 1, %v9225_v40  ;;  %v189_v44 = vshrl.u32 %v5240_v36, 5  ;;  %v200_v46 = vshrl.u32 %v5243_v38, 5 }
   0xc   :  { %v399_v43 = vadd.s32 %v5227_v31, %v398_v41  ;;  %v413_v45 = vadd.s32 %v5231_v33, %v412_v42  ;;  %v4936_v48 = vld [vmem:[%s9196_s0 + $0x98] ss:$0 sps:$4 sm:$0x11]   ;;  %v5268_v54 = vmul.u32.u64.low 2454267026, %v5259_v47  ;;  %v5269_v55 = vmul.u32.u64.high 2454267026, %v5259_v47, %v5268_v54 }
   0xd   :  { %v190_v51 = vmul.u32 49, %v189_v44  ;;  %v201_v53 = vmul.u32 49, %v200_v46 }
   0xe   :  { %4721 = vmatmul.mubr.msk.bf16.gmra.mrb[4].mxu1 %vm696_vm1, %v4910_v3  ;;  %4691 = vmatmul.mubr.msk.bf16.gmra.mrb[4].mxu0 %vm696_vm1, %v4924_v6  ;;  %v400_v49 = vshrl.u32 %v399_v43, 2  ;;  %v414_v52 = vshrl.u32 %v413_v45, 2  ;;  %v5273_v56 = vmul.u32.u64.low 2804876602, %v5259_v47  ;;  %v5274_v57 = vmul.u32.u64.high 2804876602, %v5259_v47, %v5273_v56 }
   0xf   :  { %4724 = vmatprep.mubr.msk.bf16.mxu1 %vm9205_vm0, %v9220_v0  ;;  %4694 = vmatprep.mubr.msk.bf16.mxu0 %vm9205_vm0, %v9220_v0  ;;  %v5277_v59 = vmul.u32.u64.low 2454267026, %v5265_v50  ;;  %v5278_v60 = vmul.u32.u64.high 2454267026, %v5265_v50, %v5277_v59  ;;  %v191_v61 = vsub.s32 %v5211_v26, %v190_v51  ;;  %v202_v63 = vsub.s32 %v171_v29, %v201_v53 }
  0x10   :  { %v401_v58 = vmul.u32 7, %v400_v49  ;;  %v415_v62 = vmul.u32 7, %v414_v52  ;;  %vm425_vm4 = vc.u32 %v5268_v54, 2454267026  ;;  %v211_v6 = vshrl.u32 %v5274_v57, 5 }
  0x11   :  { %v5282_v1 = vmul.u32.u64.low 2804876602, %v5265_v50  ;;  %v5283_v2 = vmul.u32.u64.high 2804876602, %v5265_v50, %v5282_v1  ;;  %vm439_vm5 = vc.u32 %v5277_v59, 2454267026  ;;  %vm326_vm6 = vcmp.ne.s32.totalorder %v191_v61, 0 }
  0x12   :  { %v402_v3 = vsub.s32 %v5211_v26, %v401_v58  ;;  %v416_v4 = vsub.s32 %v171_v29, %v415_v62  ;;  %vm327_vm7 = vcmp.ne.s32.totalorder %v202_v63, 0  ;;  %vm339_vm8 = vcmp.lt.s32.totalorder %v191_v61, 0 }
  0x13   :  { %vm340_vm9 = vcmp.lt.s32.totalorder %v202_v63, 0  ;;  %vm352_vm14 = vmand %vm339_vm8, %vm326_vm6  ;;  %v5344_v45 = vadd.s32 48, %v5211_v26 }
  0x14   :  { %vm573_vm10 = vcmp.ne.s32.totalorder %v402_v3, 0  ;;  %vm586_vm11 = vcmp.lt.s32.totalorder %v402_v3, 0  ;;  %vm574_vm12 = vcmp.ne.s32.totalorder %v416_v4, 0  ;;  %vm587_vm13 = vcmp.lt.s32.totalorder %v416_v4, 0 }
  0x15   :  { %vm599_vm15 = vmand %vm586_vm11, %vm573_vm10 }
  0x16   :  { %4725 = vmatmul.mubr.msk.bf16.gmra.mrb[8].mxu1 %vm696_vm1, %v4911_v5  ;;  %4695 = vmatmul.mubr.msk.bf16.gmra.mrb[8].mxu0 %vm696_vm1, %v4925_v8  ;;  %v426_v5 = vsel %vm425_vm4, 1, %v9225_v40  ;;  %v5290_v8 = vadd.s32 32, %v5211_v26  ;;  %vm600_vm2 = vmand %vm587_vm13, %vm574_vm12 }
  0x17   :  { %4728 = vmatprep.mubr.msk.bf16.mxu1 %vm9205_vm0, %v9220_v0  ;;  %4698 = vmatprep.mubr.msk.bf16.mxu0 %vm9205_vm0, %v9220_v0 }
  0x1e   :  { %4729 = vmatmul.mubr.msk.bf16.gmra.mrb[12].mxu1 %vm696_vm1, %v4912_v7  ;;  %4699 = vmatmul.mubr.msk.bf16.gmra.mrb[12].mxu0 %vm696_vm1, %v4926_v10  ;;  %v440_v7 = vsel %vm439_vm5, 1, %v9225_v40  ;;  %v365_v10 = vadd.s32 49, %v191_v61 }
  0x1f   :  { %4732 = vmatprep.mubr.msk.bf16.mxu1 %vm9205_vm0, %v9220_v0  ;;  %4702 = vmatprep.mubr.msk.bf16.mxu0 %vm9205_vm0, %v9220_v0 }
  0x26   :  { %4733 = vmatmul.mubr.msk.bf16.gmra.mrb[16].mxu1 %vm696_vm1, %v4913_v9  ;;  %4703 = vmatmul.mubr.msk.bf16.gmra.mrb[16].mxu0 %vm696_vm1, %v4927_v12  ;;  %v427_v9 = vadd.s32 %v5269_v55, %v426_v5  ;;  %v222_v12 = vshrl.u32 %v5283_v2, 5  ;;  %v5366_v54 = vmul.u32.u64.low 2454267026, %v5344_v45  ;;  %v5367_v55 = vmul.u32.u64.high 2454267026, %v5344_v45, %v5366_v54 }
  0x27   :  { %4736 = vmatprep.mubr.msk.bf16.mxu1 %vm9205_vm0, %v9220_v0  ;;  %4706 = vmatprep.mubr.msk.bf16.mxu0 %vm9205_vm0, %v9220_v0  ;;  %v5391_v1 = vmul.u32.u64.low 2804876602, %v5344_v45  ;;  %v5392_v2 = vmul.u32.u64.high 2804876602, %v5344_v45, %v5391_v1 }
  0x2e   :  { %4737 = vmatmul.mubr.msk.bf16.gmra.mrb[20].mxu1 %vm696_vm1, %v4914_v11  ;;  %4707 = vmatmul.mubr.msk.bf16.gmra.mrb[20].mxu0 %vm696_vm1, %v4928_v14  ;;  %v612_v11 = vadd.s32 7, %v402_v3 }
  0x2f   :  { %4740 = vmatprep.mubr.msk.bf16.mxu1 %vm9205_vm0, %v9220_v0  ;;  %4710 = vmatprep.mubr.msk.bf16.mxu0 %vm9205_vm0, %v9220_v0 }
  0x36   :  { %4741 = vmatmul.mubr.msk.bf16.gmra.mrb[24].mxu1 %vm696_vm1, %v4915_v13  ;;  %4711 = vmatmul.mubr.msk.bf16.gmra.mrb[24].mxu0 %vm696_vm1, %v4929_v16  ;;  %v441_v13 = vadd.s32 %v5278_v60, %v440_v7  ;;  %v212_v16 = vmul.u32 49, %v211_v6 }
  0x37   :  { %4776 = vmatprep.mubr.msk.bf16.mxu1 %vm9205_vm0, %v9220_v0  ;;  %4746 = vmatprep.mubr.msk.bf16.mxu0 %vm9205_vm0, %v9220_v0 }
  0x38   :  { %v213_v29 = vsub.s32 %v5259_v47, %v212_v16 }
  0x3a   :  { %vm328_vm8 = vcmp.ne.s32.totalorder %v213_v29, 0 }
  0x3e   :  { %4777 = vmatmul.mubr.msk.bf16.vlgmr.msra.gmra.mrb[28].mxu1 %vm696_vm1, %v4916_v15  ;;  %4747 = vmatmul.mubr.msk.bf16.vlgmr.msra.gmra.mrb[28].mxu0 %vm696_vm1, %v4930_v18  ;;  %v5297_v14 = vmul.u32.u64.low 2804876602, %v5290_v8  ;;  %v5298_v15 = vmul.u32.u64.high 2804876602, %v5290_v8, %v5297_v14 }
  0x3f   :  { %4780 = vmatprep.mubr.msk.bf16.mxu1 %vm9205_vm0, %v9220_v0  ;;  %4750 = vmatprep.mubr.msk.bf16.mxu0 %vm9205_vm0, %v9220_v0 }
  0x40   :  { %v233_v36 = vshrl.u32 %v5298_v15, 5 }
  0x42   :  { %v234_v49 = vmul.u32 49, %v233_v36 }
  0x44   :  { %v5379_v58 = vsub.s32 %v5290_v8, %v234_v49 }
  0x46   :  { %4781 = vmatmul.mubr.msk.bf16.gmra.mrb[32].mxu1 %vm696_vm1, %v4917_v17  ;;  %4751 = vmatmul.mubr.msk.bf16.gmra.mrb[32].mxu0 %vm696_vm1, %v4931_v20  ;;  %v5301_v17 = vmul.u32.u64.low 2454267026, %v5290_v8  ;;  %v5302_v18 = vmul.u32.u64.high 2454267026, %v5290_v8, %v5301_v17  ;;  %v613_v20 = vadd.s32 7, %v416_v4 }
  0x47   :  { %4784 = vmatprep.mubr.msk.bf16.mxu1 %vm9205_vm0, %v9220_v0  ;;  %4754 = vmatprep.mubr.msk.bf16.mxu0 %vm9205_vm0, %v9220_v0 }
  0x48   :  { %vm453_vm3 = vc.u32 %v5301_v17, 2454267026  ;;  %v5320_v33 = vsel %vm600_vm2, %v613_v20, %v416_v4 }
  0x49   :  { %9477 = vst [vmem:[#allocation7_spill] sm:$0xff] %v5320_v33  ;;  %v454_v37 = vsel %vm453_vm3, 1, %v9225_v40 }
  0x4a   :  { %v455_v44 = vadd.s32 %v5302_v18, %v454_v37  ;;  %v5496_v37 = vadd.s32 72, %v5211_v26 }
  0x4c   :  { %v456_v53 = vshrl.u32 %v455_v44, 2 }
  0x4e   :  { %4785 = vmatmul.mubr.msk.bf16.gmra.mrb[36].mxu1 %vm696_vm1, %v4918_v19  ;;  %4755 = vmatmul.mubr.msk.bf16.gmra.mrb[36].mxu0 %vm696_vm1, %v4932_v22  ;;  %v366_v19 = vadd.s32 49, %v202_v63  ;;  %v5307_v22 = vadd.s32 40, %v5211_v26  ;;  %v457_v5 = vmul.u32 7, %v456_v53 }
  0x4f   :  { %4788 = vmatprep.mubr.msk.bf16.mxu1 %vm9205_vm0, %v9220_v0  ;;  %4758 = vmatprep.mubr.msk.bf16.mxu0 %vm9205_vm0, %v9220_v0 }
  0x50   :  { %v5315_v30 = vmul.u32.u64.low 2804876602, %v5307_v22  ;;  %v5316_v31 = vmul.u32.u64.high 2804876602, %v5307_v22, %v5315_v30  ;;  %v5331_v41 = vmul.u32.u64.low 2454267026, %v5307_v22  ;;  %v5332_v42 = vmul.u32.u64.high 2454267026, %v5307_v22, %v5331_v41 }
  0x52   :  { %v244_v51 = vshrl.u32 %v5316_v31, 5  ;;  %vm467_vm3 = vc.u32 %v5331_v41, 2454267026  ;;  %v5483_v31 = vadd.s32 64, %v5211_v26 }
  0x54   :  { %v245_v62 = vmul.u32 49, %v244_v51 }
  0x56   :  { %4789 = vmatmul.mubr.msk.bf16.gmra.mrb[40].mxu1 %vm696_vm1, %v4919_v21  ;;  %4759 = vmatmul.mubr.msk.bf16.gmra.mrb[40].mxu0 %vm696_vm1, %v4933_v24  ;;  %v428_v21 = vshrl.u32 %v427_v9, 2  ;;  %v5311_v24 = vsel %vm599_vm15, %v612_v11, %v402_v3  ;;  %v246_v15 = vsub.s32 %v5307_v22, %v245_v62 }
  0x57   :  { %4792 = vmatprep.mubr.msk.bf16.mxu1 %vm9205_vm0, %v9220_v0  ;;  %4762 = vmatprep.mubr.msk.bf16.mxu0 %vm9205_vm0, %v9220_v0  ;;  %9475 = vst [vmem:[#allocation5_spill] sm:$0xff] %v5311_v24  ;;  %vm9207_vm5 = vcmp.lt.s32.totalorder %v5311_v24, 6 }
  0x58   :  { %v370_v44 = vadd.s32 49, %v246_v15 }
  0x5e   :  { %4793 = vmatmul.mubr.msk.bf16.gmra.mrb[44].mxu1 %vm696_vm1, %v4920_v23  ;;  %4763 = vmatmul.mubr.msk.bf16.gmra.mrb[44].mxu0 %vm696_vm1, %v4934_v28  ;;  %v5309_v23 = vsel %vm352_vm14, %v365_v10, %v191_v61  ;;  %v442_v28 = vshrl.u32 %v441_v13, 2 }
  0x5f   :  { %4796 = vmatprep.mubr.msk.bf16.mxu1 %vm9205_vm0, %v9220_v0  ;;  %4766 = vmatprep.mubr.msk.bf16.mxu0 %vm9205_vm0, %v9220_v0  ;;  %9474 = vst [vmem:[#allocation4_spill] sm:$0xff] %v5309_v23  ;;  %vm9211_vm4 = vcmp.ge.s32.totalorder %v5309_v23, 7 }
  0x60   :  { %v443_v35 = vmul.u32 7, %v442_v28  ;;  %vm5338_vm10 = vmand %vm9211_vm4, %vm9207_vm5 }
  0x61   :  { %vm1909_vm15 = vmpackc.low %vm5338_vm10, %vm5338_vm10  ;;  %vm9492_vm10 = vcmp.lt.s32.totalorder %v5311_v24, 6 }
  0x62   :  { %v5408_v9 = vsel %vm1909_vm15, 65537, %v9225_v40 }
  0x66   :  { %4797 = vmatmul.mubr.msk.bf16.gmra.mrb[48].mxu1 %vm696_vm1, %v4921_v27  ;;  %4767 = vmatmul.mubr.msk.bf16.gmra.mrb[48].mxu0 %vm696_vm1, %v4935_v39  ;;  %v223_v27 = vmul.u32 49, %v222_v12 }
  0x67   :  { %4800 = vmatprep.mubr.msk.bf16.mxu1 %vm9205_vm0, %v9220_v0  ;;  %4770 = vmatprep.mubr.msk.bf16.mxu0 %vm9205_vm0, %v9220_v0 }
  0x68   :  { %v224_v38 = vsub.s32 %v5265_v50, %v223_v27 }
  0x6a   :  { %vm329_vm12 = vcmp.ne.s32.totalorder %v224_v38, 0  ;;  %vm342_vm13 = vcmp.lt.s32.totalorder %v224_v38, 0  ;;  %v368_v52 = vadd.s32 49, %v224_v38 }
  0x6b   :  { %vm5383_vm5 = vmand %vm342_vm13, %vm329_vm12  ;;  %vm481_vm13 = vc.u32 %v5366_v54, 2454267026 }
  0x6c   :  { %v5428_v13 = vsel %vm5383_vm5, %v368_v52, %v224_v38  ;;  %vm9495_vm5 = vcmp.lt.s32.totalorder %v5320_v33, 6  ;;  %v5525_v51 = vmul.u32.u64.low 2454267026, %v5483_v31  ;;  %v5526_v52 = vmul.u32.u64.high 2454267026, %v5483_v31, %v5525_v51 }
  0x6d   :  { %9489 = vst [vmem:[#allocation9_spill] sm:$0xff] %v5428_v13  ;;  %vm5452_vm15 = vmpackc.low %vm9495_vm5, %vm9495_vm5  ;;  %v5627_v38 = vadd.s32 80, %v5211_v26 }
  0x6e   :  { %4801 = vmatmul.mubr.msk.bf16.gmra.mrb[52].mxu1 %vm696_vm1, %v4922_v34  ;;  %4771 = vmatmul.mubr.msk.bf16.gmra.mrb[52].mxu0 %vm696_vm1, %v4936_v48  ;;  %vm353_vm1 = vmand %vm340_vm9, %vm327_vm7  ;;  %v429_v34 = vmul.u32 7, %v428_v21  ;;  %vm9206_vm7 = vcmp.lt.s32.totalorder %v5320_v33, 6  ;;  %vm341_vm9 = vcmp.lt.s32.totalorder %v213_v29, 0  ;;  %v444_v48 = vsub.s32 %v5265_v50, %v443_v35 }
  0x6f   :  { %v5318_v32 = vsel %vm353_vm1, %v366_v19, %v202_v63  ;;  %vm354_vm14 = vmand %vm341_vm9, %vm328_vm8  ;;  %v5363_v50 = vadd.s32 56, %v5211_v26  ;;  %v468_v63 = vsel %vm467_vm3, 1, %v9225_v40  ;;  %v482_v19 = vsel %vm481_vm13, 1, %v9225_v40 }
  0x70   :  { %9476 = vst [vmem:[#allocation6_spill] sm:$0xff] %v5318_v32  ;;  %vm9208_vm6 = vcmp.ge.s32.totalorder %v5318_v32, 7  ;;  %v430_v39 = vsub.s32 %v5259_v47, %v429_v34  ;;  %v367_v47 = vadd.s32 49, %v213_v29  ;;  %vm5372_vm8 = vmpackc.low %vm9211_vm4, %vm9211_vm4  ;;  %vm576_vm9 = vcmp.ne.s32.totalorder %v444_v48, 0 }
  0x71   :  { %vm5350_vm11 = vmand %vm9208_vm6, %vm9206_vm7  ;;  %vm589_vm7 = vcmp.lt.s32.totalorder %v444_v48, 0  ;;  %v615_v61 = vadd.s32 7, %v444_v48  ;;  %v5395_v3 = vmul.u32.u64.low 2804876602, %v5363_v50  ;;  %v5396_v4 = vmul.u32.u64.high 2804876602, %v5363_v50, %v5395_v3 }
  0x72   :  { %vm575_vm1 = vcmp.ne.s32.totalorder %v430_v39, 0  ;;  %vm588_vm2 = vcmp.lt.s32.totalorder %v430_v39, 0  ;;  %vm1910_vm0 = vmpackc.low %vm5350_vm11, %vm5350_vm11  ;;  %v5376_v57 = vsel %vm354_vm14, %v367_v47, %v213_v29  ;;  %v614_v60 = vadd.s32 7, %v430_v39 }
  0x73   :  { %9484 = vst [vmem:[#allocation8_spill] sm:$0xff] %v5376_v57  ;;  %vm601_vm14 = vmand %vm588_vm2, %vm575_vm1  ;;  %v5399_v6 = vmul.u32.u64.low 2454267026, %v5363_v50  ;;  %v5400_v7 = vmul.u32.u64.high 2454267026, %v5363_v50, %v5399_v6  ;;  %v469_v10 = vadd.s32 %v5332_v42, %v468_v63  ;;  %v5417_v11 = vsel %vm1910_vm0, 65537, %v9225_v40 }
  0x74   :  { %vm602_vm12 = vmand %vm589_vm7, %vm576_vm9  ;;  %v5430_v14 = vsel %vm601_vm14, %v614_v60, %v430_v39  ;;  %v5436_v16 = vsel %vm5372_vm8, 65537, %v9225_v40  ;;  %vm9209_vm0 = vcmp.ge.s32.totalorder %v5376_v57, 7  ;;  %vm330_vm1 = vcmp.ne.s32.totalorder %v5379_v58, 0 }
  0x75   :  { %vm5422_vm7 = vmpackc.low %vm9208_vm6, %vm9208_vm6  ;;  %9490 = vst [vmem:[#allocation10_spill] sm:$0xff] %v5430_v14  ;;  %v5438_v17 = vsel %vm602_vm12, %v615_v61, %v444_v48  ;;  %vm343_vm2 = vcmp.lt.s32.totalorder %v5379_v58, 0  ;;  %v458_v21 = vsub.s32 %v5290_v8, %v457_v5  ;;  %vm495_vm3 = vc.u32 %v5399_v6, 2454267026 }
  0x76   :  { %9491 = vst [vmem:[#allocation11_spill] sm:$0xff] %v5438_v17  ;;  %vm5444_vm11 = vmpackc.low %vm9492_vm10, %vm9492_vm10  ;;  %v5462_v27 = vsel %vm5422_vm7, 65537, %v9225_v40  ;;  %vm9210_vm8 = vcmp.ge.s32.totalorder %v5428_v13, 7  ;;  %vm9214_vm9 = vcmp.lt.s32.totalorder %v5430_v14, 6  ;;  %v470_v29 = vshrl.u32 %v469_v10, 2 }
  0x77   :  { %vm5469_vm14 = vmpackc.low %vm9209_vm0, %vm9209_vm0  ;;  %vm9212_vm12 = vcmp.lt.s32.totalorder %v5438_v17, 6  ;;  %vm331_vm7 = vcmp.ne.s32.totalorder %v246_v15, 0  ;;  %v483_v30 = vadd.s32 %v5367_v55, %v482_v19  ;;  %vm344_vm10 = vcmp.lt.s32.totalorder %v246_v15, 0 }
  0x78   :  { %vm5477_vm13 = vmpackc.low %vm9210_vm8, %vm9210_vm8  ;;  %v255_v35 = vshrl.u32 %v5392_v2, 5  ;;  %v496_v36 = vsel %vm495_vm3, 1, %v9225_v40  ;;  %v369_v39 = vadd.s32 49, %v5379_v58  ;;  %v266_v41 = vshrl.u32 %v5396_v4, 5 }
  0x79   :  { %vm5489_vm5 = vmand %vm343_vm2, %vm330_vm1  ;;  %vm577_vm1 = vcmp.ne.s32.totalorder %v458_v21, 0  ;;  %vm590_vm2 = vcmp.lt.s32.totalorder %v458_v21, 0  ;;  %v5519_v43 = vsel %vm5444_vm11, 65537, %v9225_v40  ;;  %v471_v46 = vmul.u32 7, %v470_v29 }
  0x7a   :  { %vm5502_vm6 = vmand %vm9209_vm0, %vm9214_vm9  ;;  %v616_v47 = vadd.s32 7, %v458_v21  ;;  %v484_v48 = vshrl.u32 %v483_v30, 2  ;;  %v497_v49 = vadd.s32 %v5400_v7, %v496_v36  ;;  %v5531_v53 = vsel %vm5452_vm15, 65537, %v9225_v40 }
  0x7b   :  { %vm5512_vm3 = vmand %vm9210_vm8, %vm9212_vm12  ;;  %v256_v54 = vmul.u32 49, %v255_v35  ;;  %v5534_v55 = vmul.u32.u64.low 2454267026, %v5496_v37  ;;  %v5535_v56 = vmul.u32.u64.high 2454267026, %v5496_v37, %v5534_v55  ;;  %v5543_v59 = vsel %vm5489_vm5, %v369_v39, %v5379_v58 }
  0x7c   :  { %vm357_vm0 = vmand %vm344_vm10, %vm331_vm7  ;;  %9508 = vst [vmem:[#allocation12_spill] sm:$0xff] %v5543_v59  ;;  %v267_v60 = vmul.u32 49, %v266_v41  ;;  %v5546_v61 = vmul.u32.u64.low 2804876602, %v5483_v31  ;;  %v5547_v62 = vmul.u32.u64.high 2804876602, %v5483_v31, %v5546_v61  ;;  %v5555_v1 = vsub.s32 %v5307_v22, %v471_v46 }
  0x7d   :  { %vm603_vm11 = vmand %vm590_vm2, %vm577_vm1  ;;  %v5552_v63 = vsel %vm357_vm0, %v370_v44, %v246_v15  ;;  %v5558_v2 = vmul.u32.u64.low 2804876602, %v5496_v37  ;;  %v5559_v3 = vmul.u32.u64.high 2804876602, %v5496_v37, %v5558_v2  ;;  %v485_v4 = vmul.u32 7, %v484_v48 }
  0x7e   :  { %vm1911_vm7 = vmpackc.low %vm5502_vm6, %vm5502_vm6  ;;  %9509 = vst [vmem:[#allocation13_spill] sm:$0xff] %v5552_v63  ;;  %v5561_v58 = vsel %vm603_vm11, %v616_v47, %v458_v21  ;;  %v498_v5 = vshrl.u32 %v497_v49, 2  ;;  %vm509_vm10 = vc.u32 %v5525_v51, 2454267026  ;;  %v5566_v6 = vsel %vm5469_vm14, 65537, %v9225_v40 }
  0x7f   :  { %vm1912_vm15 = vmpackc.low %vm5512_vm3, %vm5512_vm3  ;;  %9510 = vst [vmem:[#allocation14_spill] sm:$0xff] %v5561_v58  ;;  %v5571_v7 = vsel %vm5477_vm13, 65537, %v9225_v40  ;;  %v257_v22 = vsub.s32 %v5344_v45, %v256_v54  ;;  %vm523_vm0 = vc.u32 %v5534_v55, 2454267026  ;;  %v5580_v10 = vsel %vm1911_vm7, 65537, %v9225_v40 }
  0x80   :  { %v5583_v12 = vsel %vm1912_vm15, 65537, %v9225_v40  ;;  %vm9213_vm14 = vcmp.ge.s32.totalorder %v5543_v59, 7  ;;  %v268_v15 = vsub.s32 %v5363_v50, %v267_v60  ;;  %vm5590_vm13 = vmpackc.low %vm9214_vm9, %vm9214_vm9  ;;  %vm578_vm5 = vcmp.ne.s32.totalorder %v5555_v1, 0 }
  0x81   :  { %vm9216_vm6 = vcmp.ge.s32.totalorder %v5552_v63, 7  ;;  %vm9215_vm1 = vcmp.lt.s32.totalorder %v5561_v58, 6  ;;  %v510_v19 = vsel %vm509_vm10, 1, %v9225_v40  ;;  %vm5601_vm2 = vmpackc.low %vm9212_vm12, %vm9212_vm12  ;;  %vm591_vm3 = vcmp.lt.s32.totalorder %v5555_v1, 0 }
  0x82   :  { %v486_v21 = vsub.s32 %v5344_v45, %v485_v4  ;;  %v499_v28 = vmul.u32 7, %v498_v5  ;;  %v524_v29 = vsel %vm523_vm0, 1, %v9225_v40  ;;  %v617_v8 = vadd.s32 7, %v5555_v1  ;;  %vm5613_vm11 = vmpackc.low %vm9213_vm14, %vm9213_vm14 }
  0x83   :  { %vm332_vm7 = vcmp.ne.s32.totalorder %v257_v22, 0  ;;  %vm345_vm15 = vcmp.lt.s32.totalorder %v257_v22, 0  ;;  %v371_v34 = vadd.s32 49, %v257_v22  ;;  %vm5620_vm10 = vmpackc.low %vm9216_vm6, %vm9216_vm6  ;;  %vm333_vm0 = vcmp.ne.s32.totalorder %v268_v15, 0 }
  0x84   :  { %v277_v35 = vshrl.u32 %v5547_v62, 5  ;;  %v511_v36 = vadd.s32 %v5526_v52, %v510_v19  ;;  %vm5633_vm8 = vmand %vm9213_vm14, %vm9215_vm1  ;;  %vm346_vm4 = vcmp.lt.s32.totalorder %v268_v15, 0  ;;  %v372_v41 = vadd.s32 49, %v268_v15 }
  0x85   :  { %v525_v42 = vadd.s32 %v5535_v56, %v524_v29  ;;  %v5639_v44 = vadd.s32 88, %v5211_v26  ;;  %vm5645_vm12 = vmand %vm591_vm3, %vm578_vm5  ;;  %v500_v47 = vsub.s32 %v5363_v50, %v499_v28  ;;  %vm579_vm14 = vcmp.ne.s32.totalorder %v486_v21, 0  ;;  %v4947_v50 = vld [vmem:[%s9197_s3 + $0x68] sm:$0xff]  }
  0x86   :  { %vm592_vm9 = vcmp.lt.s32.totalorder %v486_v21, 0  ;;  %v288_v48 = vshrl.u32 %v5559_v3, 5  ;;  %vm5653_vm1 = vmand %vm345_vm15, %vm332_vm7  ;;  %v5658_v51 = vmul.u32.u64.low 2804876602, %v5627_v38  ;;  %v5659_v52 = vmul.u32.u64.high 2804876602, %v5627_v38, %v5658_v51 }
  0x87   :  { %v5662_v54 = vmul.u32.u64.low 2804876602, %v5639_v44  ;;  %v5663_v55 = vmul.u32.u64.high 2804876602, %v5639_v44, %v5662_v54  ;;  %vm5666_vm5 = vmand %vm346_vm4, %vm333_vm0  ;;  %v278_v56 = vmul.u32 49, %v277_v35  ;;  %v512_v60 = vshrl.u32 %v511_v36, 2 }
  0x88   :  { %v5671_v61 = vmul.u32.u64.low 2454267026, %v5627_v38  ;;  %v5672_v62 = vmul.u32.u64.high 2454267026, %v5627_v38, %v5671_v61  ;;  %v5677_v2 = vsel %vm5590_vm13, 65537, %v9225_v40  ;;  %v5682_v3 = vsel %vm5601_vm2, 65537, %v9225_v40  ;;  %vm605_vm7 = vmand %vm592_vm9, %vm579_vm14 }
  0x89   :  { %9527 = vst [vmem:[#allocation15_spill] sm:$0xff] %v5682_v3  ;;  %v618_v4 = vadd.s32 7, %v486_v21  ;;  %v526_v5 = vshrl.u32 %v525_v42, 2  ;;  %v5687_v19 = vsel %vm5613_vm11, 65537, %v9225_v40  ;;  %vm580_vm4 = vcmp.ne.s32.totalorder %v500_v47, 0  ;;  %vm1913_vm13 = vmpackc.low %vm5633_vm8, %vm5633_vm8 }
  0x8a   :  { %vm593_vm3 = vcmp.lt.s32.totalorder %v500_v47, 0  ;;  %v289_v18 = vmul.u32 49, %v288_v48  ;;  %v5694_v28 = vsel %vm5645_vm12, %v617_v8, %v5555_v1  ;;  %v5702_v20 = vsel %vm5620_vm10, 65537, %v9225_v40 }
  0x8b   :  { %9528 = vst [vmem:[#allocation16_spill] sm:$0xff] %v5694_v28  ;;  %v5706_v29 = vsel %vm5653_vm1, %v371_v34, %v257_v22  ;;  %v5710_v30 = vsel %vm5666_vm5, %v372_v41, %v268_v15  ;;  %v619_v35 = vadd.s32 7, %v500_v47  ;;  %v279_v1 = vsub.s32 %v5483_v31, %v278_v56  ;;  %vm606_vm8 = vmand %vm593_vm3, %vm580_vm4 }
  0x8c   :  { %9529 = vst [vmem:[#allocation17_spill] sm:$0xff] %v5706_v29  ;;  %9530 = vst [vmem:[#allocation18_spill] sm:$0xff] %v5710_v30  ;;  %v513_v8 = vmul.u32 7, %v512_v60  ;;  %vm537_vm9 = vc.u32 %v5671_v61, 2454267026  ;;  %v5714_v36 = vsel %vm605_vm7, %v618_v4, %v486_v21  ;;  %v527_v45 = vmul.u32 7, %v526_v5 }
  0x8d   :  { %9531 = vst [vmem:[#allocation19_spill] sm:$0xff] %v5714_v36  ;;  %v5717_v39 = vmul.u32.u64.low 2454267026, %v5639_v44  ;;  %v5718_v42 = vmul.u32.u64.high 2454267026, %v5639_v44, %v5717_v39  ;;  %vm9217_vm12 = vcmp.lt.s32.totalorder %v5694_v28, 6  ;;  %v5722_v22 = vsel %vm1913_vm13, 65537, %v9225_v40 }
  0x8e   :  { %vm9223_vm14 = vcmp.ge.s32.totalorder %v5706_v29, 7  ;;  %v290_v15 = vsub.s32 %v5496_v37, %v289_v18  ;;  %v299_v34 = vshrl.u32 %v5659_v52, 5  ;;  %v310_v41 = vshrl.u32 %v5663_v55, 5  ;;  %vm5745_vm4 = vmand %vm9216_vm6, %vm9217_vm12 }
  0x8f   :  { %v538_v21 = vsel %vm537_vm9, 1, %v9225_v40  ;;  %v5730_v46 = vadd.s32 96, %v5211_v26  ;;  %v5732_v48 = vsel %vm606_vm8, %v619_v35, %v500_v47  ;;  %vm9222_vm1 = vcmp.ge.s32.totalorder %v5710_v30, 7  ;;  %v4951_v47 = vld [vmem:[%s9197_s3 + $0x78] sm:$0xff]  }
  0x90   :  { %9532 = vst [vmem:[#allocation20_spill] sm:$0xff] %v5732_v48  ;;  %vm9218_vm2 = vcmp.lt.s32.totalorder %v5714_v36, 6  ;;  %v514_v49 = vsub.s32 %v5483_v31, %v513_v8  ;;  %vm334_vm11 = vcmp.ne.s32.totalorder %v279_v1, 0  ;;  %vm347_vm15 = vcmp.lt.s32.totalorder %v279_v1, 0  ;;  %v4937_v8 = vld [vmem:[%s9197_s3 + $0x40] sm:$0xff]  }
  0x91   :  { %v5738_v51 = vsub.s32 %v5496_v37, %v527_v45  ;;  %vm551_vm10 = vc.u32 %v5717_v39, 2454267026  ;;  %vm335_vm0 = vcmp.ne.s32.totalorder %v290_v15, 0  ;;  %vm348_vm5 = vcmp.lt.s32.totalorder %v290_v15, 0  ;;  %vm5754_vm7 = vmand %vm9223_vm14, %vm9218_vm2  ;;  %v4938_v39 = vld [vmem:[%s9197_s3] sm:$0xff]   ;;  %4438 = vmatprep.subr.bf16.mxu0 %v4937_v8 }
  0x92   :  { %v373_v52 = vadd.s32 49, %v279_v1  ;;  %v539_v54 = vadd.s32 %v5672_v62, %v538_v21  ;;  %vm9224_vm3 = vcmp.lt.s32.totalorder %v5732_v48, 6  ;;  %v374_v31 = vadd.s32 49, %v290_v15  ;;  %vm5759_vm13 = vmand %vm347_vm15, %vm334_vm11  ;;  %4439 = vmatpush3.bf16.msra.mxu0 %v4938_v39 }
  0x93   :  { %v300_v55 = vmul.u32 49, %v299_v34  ;;  %v311_v37 = vmul.u32 49, %v310_v41  ;;  %vm581_vm9 = vcmp.ne.s32.totalorder %v514_v49, 0  ;;  %vm594_vm8 = vcmp.lt.s32.totalorder %v514_v49, 0  ;;  %vm361_vm6 = vmand %vm348_vm5, %vm335_vm0 }
  0x94   :  { %v620_v60 = vadd.s32 7, %v514_v49  ;;  %v552_v61 = vsel %vm551_vm10, 1, %v9225_v40  ;;  %vm582_vm12 = vcmp.ne.s32.totalorder %v5738_v51, 0  ;;  %vm595_vm2 = vcmp.lt.s32.totalorder %v5738_v51, 0  ;;  %vm5781_vm11 = vmand %vm9222_vm1, %vm9224_vm3 }
  0x95   :  { %v5770_v62 = vmul.u32.u64.low 2804876602, %v5730_v46  ;;  %v5771_v4 = vmul.u32.u64.high 2804876602, %v5730_v46, %v5770_v62  ;;  %v5774_v5 = vmul.u32.u64.low 2454267026, %v5730_v46  ;;  %v5775_v18 = vmul.u32.u64.high 2454267026, %v5730_v46, %v5774_v5  ;;  %vm5804_vm15 = vmand %vm594_vm8, %vm581_vm9 }
  0x96   :  { %v9539_v35 = vmov 0  ;;  %v540_v45 = vshrl.u32 %v539_v54, 2  ;;  %v621_v34 = vadd.s32 7, %v5738_v51  ;;  %v553_v41 = vadd.s32 %v5718_v42, %v552_v61  ;;  %v4939_v54 = vld [vmem:[%s9197_s3 + $0x48] sm:$0xff]   ;;  %vm5846_vm5 = vmpackc.low %vm9223_vm14, %vm9223_vm14 }
  0x97   :  { %v9540_v35 = vsel %vm5781_vm11, 4294967295, %v9539_v35  ;;  %v5795_v21 = vsel %vm5759_vm13, %v373_v52, %v279_v1  ;;  %v5797_v62 = vsel %vm361_vm6, %v374_v31, %v290_v15  ;;  %vm565_vm10 = vc.u32 %v5774_v5, 2454267026  ;;  %v4940_v1 = vld [vmem:[%s9197_s3 + $0x8] sm:$0xff]   ;;  %4440 = vmatprep.subr.bf16.mxu0 %v4939_v54  ;;  %vm5890_vm14 = vmpackc.low %vm9224_vm3, %vm9224_vm3  ;;  %v4943_v54 = vld [vmem:[%s9197_s3 + $0x58] sm:$0xff]  }
  0x98   :  { %9541 = vst [vmem:[#allocation21_spill] sm:$0xff] %v5795_v21  ;;  %9542 = vst [vmem:[#allocation22_spill] sm:$0xff] %v5797_v62  ;;  %v541_v0 = vmul.u32 7, %v540_v45  ;;  %v554_v42 = vshrl.u32 %v553_v41, 2  ;;  %v5814_v15 = vsub.s32 %v5627_v38, %v300_v55  ;;  %v5817_v52 = vsub.s32 %v5639_v44, %v311_v37  ;;  %4441 = vmatpush3.bf16.msra.mxu0 %v4940_v1  ;;  %v4941_v37 = vld [vmem:[%s9197_s3 + $0x50] sm:$0xff]   ;;  %v4944_v1 = vld [vmem:[%s9197_s3 + $0x18] sm:$0xff]  }
  0x99   :  { %vm9545_vm13 = vcmp.lt.s32.totalorder %v5561_v58, 6  ;;  %vm9548_vm8 = vcmp.lt.s32.totalorder %v5694_v28, 6  ;;  %v566_v56 = vsel %vm565_vm10, 1, %v9225_v40  ;;  %v5859_v8 = vsel %vm5804_vm15, %v620_v60, %v514_v49  ;;  %v4942_v45 = vld [vmem:[%s9197_s3 + $0x10] sm:$0xff]   ;;  %vm5868_vm10 = vmand %vm595_vm2, %vm582_vm12  ;;  %4442 = vmatprep.subr.bf16.mxu0 %v4941_v37 }
  0x9a   :  { %vm5825_vm9 = vmpackc.low %vm9545_vm13, %vm9545_vm13  ;;  %9555 = vst [vmem:[#allocation23_spill] sm:$0xff] %v5859_v8  ;;  %v555_v39 = vmul.u32 7, %v554_v42  ;;  %vm9558_vm13 = vcmp.lt.s32.totalorder %v5714_v36, 6  ;;  %vm349_vm12 = vcmp.lt.s32.totalorder %v5814_v15, 0  ;;  %v542_v49 = vsub.s32 %v5627_v38, %v541_v0  ;;  %v4948_v36 = vld [vmem:[%s9197_s3 + $0x28] sm:$0xff]  }
  0x9b   :  { %vm5832_vm6 = vmpackc.low %vm9548_vm8, %vm9548_vm8  ;;  %v9561_v60 = vmov 0  ;;  %v321_v42 = vshrl.u32 %v5771_v4, 5  ;;  %v567_v0 = vadd.s32 %v5775_v18, %v566_v56  ;;  %v5906_v38 = vsel %vm5868_vm10, %v621_v34, %v5738_v51  ;;  %v4945_v56 = vld [vmem:[%s9197_s3 + $0x60] sm:$0xff]  }
  0x9c   :  { %vm5853_vm8 = vmpackc.low %vm9222_vm1, %vm9222_vm1  ;;  %vm336_vm1 = vcmp.ne.s32.totalorder %v5814_v15, 0  ;;  %4443 = vmatpush3.bf16.msra.mxu0 %v4942_v45  ;;  %v9562_v60 = vsel %vm5890_vm14, 4294967295, %v9561_v60  ;;  %9563 = vst [vmem:[#allocation24_spill] sm:$0xff] %v5906_v38  ;;  %v556_v37 = vsub.s32 %v5639_v44, %v555_v39  ;;  %v9565_v45 = vmov 0  ;;  %v4946_v39 = vld [vmem:[%s9197_s3 + $0x20] sm:$0xff]  }
  0x9d   :  { %vm5880_vm0 = vmpackc.low %vm9558_vm13, %vm9558_vm13  ;;  %vm9564_vm13 = vcmp.ge.s32.totalorder %v5795_v21, 7  ;;  %4444 = vmatprep.subr.bf16.mxu0 %v4943_v54  ;;  %v375_v40 = vadd.s32 49, %v5814_v15  ;;  %v376_v4 = vadd.s32 49, %v5817_v52  ;;  %vm9567_vm2 = vcmp.ge.s32.totalorder %v5797_v62, 7 }
  0x9e   :  { %v9560_v25 = vsel %vm5880_vm0, 4294967295, %v9559_v25  ;;  %vm5912_vm3 = vmpackc.low %vm9564_vm13, %vm9564_vm13  ;;  %v9568_v51 = vmov 0  ;;  %v9570_v44 = vmov 0  ;;  %vm583_vm13 = vcmp.ne.s32.totalorder %v542_v49, 0 }
  0x9f   :  { %v9566_v45 = vsel %vm5912_vm3, 4294967295, %v9565_v45  ;;  %vm5921_vm15 = vmpackc.low %vm9567_vm2, %vm9567_vm2  ;;  %vm596_vm3 = vcmp.lt.s32.totalorder %v542_v49, 0  ;;  %vm9572_vm0 = vcmp.lt.s32.totalorder %v5859_v8, 6  ;;  %vm9573_vm2 = vcmp.ge.s32.totalorder %v5795_v21, 7 }
  0xa0   :  { %v9569_v51 = vsel %vm5921_vm15, 4294967295, %v9568_v51  ;;  %4445 = vmatpush3.bf16.msra.mxu0 %v4944_v1  ;;  %vm5929_vm10 = vmand %vm349_vm12, %vm336_vm1  ;;  %v622_v34 = vadd.s32 7, %v542_v49  ;;  %v322_v41 = vmul.u32 49, %v321_v42  ;;  %v568_v54 = vshrl.u32 %v567_v0, 2 }
  0xa1   :  { %v9571_v44 = vsel %vm5929_vm10, 4294967295, %v9570_v44  ;;  %vm5938_vm11 = vmand %vm9573_vm2, %vm9572_vm0  ;;  %vm9576_vm1 = vcmp.ne.s32.totalorder %v5817_v52, 0  ;;  %vm9577_vm12 = vcmp.lt.s32.totalorder %v5817_v52, 0  ;;  %vm584_vm0 = vcmp.ne.s32.totalorder %v556_v37, 0  ;;  %4446 = vmatprep.subr.bf16.mxu0 %v4945_v56 }
  0xa2   :  { %vm5952_vm14 = vmand %vm9577_vm12, %vm9576_vm1  ;;  %vm597_vm2 = vcmp.lt.s32.totalorder %v556_v37, 0  ;;  %v9580_v26 = vmov 0   ;;  %vm9586_vm1 = vcmp.lt.s32.totalorder %v5906_v38, 6  ;;  %v623_v31 = vadd.s32 7, %v556_v37 }
  0xa3   :  { %vm9581_vm15 = vmpackc.low %vm5745_vm4, %vm5745_vm4  ;;  %v5967_v42 = vsel %vm5825_vm9, 65537, %v9580_v26  ;;  %v5976_v48 = vsel %vm5832_vm6, 65537, %v9580_v26  ;;  %vm9587_vm4 = vcmp.ge.s32.totalorder %v5797_v62, 7  ;;  %v5997_v55 = vsel %vm5846_vm5, 65537, %v9580_v26 }
  0xa4   :  { %v5962_v21 = vsel %vm9581_vm15, 65537, %v9580_v26  ;;  %9582 = vst [vmem:[#allocation25_spill] sm:$0xff] %v5967_v42  ;;  %vm5969_vm10 = vmand %vm596_vm3, %vm583_vm13  ;;  %4447 = vmatpush3.bf16.msra.mxu0 %v4946_v39  ;;  %v6002_v62 = vsel %vm5853_vm8, 65537, %v9580_v26  ;;  %v569_v61 = vmul.u32 7, %v568_v54  ;;  %vm9593_vm5 = vnez %v9571_v44 }
  0xa5   :  { %9585 = vst [vmem:[#allocation26_spill] sm:$0xff] %v5976_v48  ;;  %vm5982_vm15 = vmand %vm9587_vm4, %vm9586_vm1  ;;  %v6020_v5 = vsel %vm9593_vm5, %v375_v40, %v5814_v15  ;;  %v6025_v28 = vsel %vm5952_vm14, %v376_v4, %v5817_v52  ;;  %v6029_v30 = vsel %vm5969_vm10, %v622_v34, %v542_v49  ;;  %v6032_v54 = vsub.s32 %v5730_v46, %v322_v41  ;;  %v4950_v4 = vld [vmem:[%s9197_s3 + $0x30] sm:$0xff]  }
  0xa6   :  { %vm9590_vm3 = vmpackc.low %vm5754_vm7, %vm5754_vm7  ;;  %9594 = vst [vmem:[#allocation27_spill] sm:$0xff] %v6020_v5  ;;  %vm9597_vm9 = vnez %v9540_v35  ;;  %vm9599_vm13 = vnez %v9560_v25  ;;  %4448 = vmatprep.subr.bf16.mxu0 %v4947_v50  ;;  %vm9601_vm10 = vnez %v9562_v60  ;;  %vm9603_vm12 = vnez %v9566_v45  ;;  %v6074_v60 = vld [vmem:[%s9198_s2] ss:$0 sm:$0xff] }
  0xa7   :  { %v5992_v56 = vsel %vm9590_vm3, 65537, %v9580_v26  ;;  %vm6004_vm6 = vmand %vm597_vm2, %vm584_vm0  ;;  %9595 = vst [vmem:[#allocation28_spill] sm:$0xff] %v6025_v28  ;;  %v6045_v15 = vsel %vm9599_vm13, 65537, %v9580_v26  ;;  %v6053_v52 = vsel %vm9601_vm10, 65537, %v9580_v26  ;;  %v6058_v35 = vsel %vm9603_vm12, 65537, %v9580_v26 }
  0xa8   :  { %vm1917_vm7 = vmpackc.low %vm5938_vm11, %vm5938_vm11  ;;  %9596 = vst [vmem:[#allocation29_spill] sm:$0xff] %v6029_v30  ;;  %vm9604_vm0 = vcmp.lt.s32.totalorder %v5859_v8, 6  ;;  %v6069_v49 = vsel %vm6004_vm6, %v623_v31, %v556_v37  ;;  %4449 = vmatpush3.bf16.msra.mxu0 %v4948_v36  ;;  %vm9243_vm3 = vcmp.ge.s32.totalorder %v6020_v5, 7  ;;  %vm9250_vm5 = vcmp.ge.s32.totalorder %v6025_v28, 7  ;;  %v4949_v37 = vld [vmem:[%s9197_s3 + $0x70] sm:$0xff]  }
  0xa9   :  { %vm9598_vm8 = vmpackc.low %vm9597_vm9, %vm9597_vm9  ;;  %9600 = vst [vmem:[#allocation30_spill] sm:$0xff] %v6045_v15  ;;  %vm9264_vm6 = vcmp.lt.s32.totalorder %v6029_v30, 6  ;;  %v570_v36 = vsub.s32 %v5730_v46, %v569_v61  ;;  %vm351_vm13 = vcmp.lt.s32.totalorder %v6032_v54, 0  ;;  %v4293_v46 = vcombine.low %v5408_v9, %v5417_v11  ;;  %4450 = vmatprep.subr.bf16.mxu0 %v4949_v37 }
  0xaa   :  { %v6040_v40 = vsel %vm9598_vm8, 65537, %v9580_v26  ;;  %vm1918_vm14 = vmpackc.low %vm5982_vm15, %vm5982_vm15  ;;  %9602 = vst [vmem:[#allocation31_spill] sm:$0xff] %v6053_v52  ;;  %vm338_vm8 = vcmp.ne.s32.totalorder %v6032_v54, 0  ;;  %vm9612_vm10 = vnez %v9569_v51  ;;  %vm9256_vm12 = vcmp.lt.s32.totalorder %v6069_v49, 6 }
  0xab   :  { %vm6063_vm2 = vmpackc.low %vm9604_vm0, %vm9604_vm0  ;;  %9607 = vst [vmem:[#allocation32_spill] sm:$0xff] %v6069_v49  ;;  %v6107_v34 = vsel %vm9612_vm10, 65537, %v9580_v26  ;;  %v4286_v1 = vcombine.low %v5436_v16, %v5462_v27  ;;  %v6125_v9 = vsel %vm1917_vm7, 65537, %v9580_v26  ;;  %v6133_v11 = vsel %vm1918_vm14, 65537, %v9580_v26 }
  0xac   :  { %vm6079_vm4 = vmpackc.low %vm9586_vm1, %vm9586_vm1  ;;  %4451 = vmatpush3.bf16.msra.mxu0 %v4950_v4  ;;  %vm9266_vm7 = vsmask.f32 3328  ;;  %vm585_vm14 = vcmp.ne.s32.totalorder %v570_v36, 0  ;;  %vm598_vm10 = vcmp.lt.s32.totalorder %v570_v36, 0  ;;  %v4294_v50 = vcombine.low %v5580_v10, %v5583_v12 }
  0xad   :  { %vm6096_vm9 = vmpackc.low %vm9243_vm3, %vm9243_vm3  ;;  %v6164_v61 = vsel %vm6063_vm2, 65537, %v9580_v26  ;;  %v377_v4 = vadd.s32 49, %v6032_v54  ;;  %v624_v18 = vadd.s32 7, %v570_v36  ;;  %4452 = vmatprep.subr.bf16.mxu0 %v4951_v47  ;;  %v6197_v25 = vsel %vm6079_vm4, 65537, %v9580_v26 }
  0xae   :  { %vm6113_vm0 = vmpackc.low %vm9250_vm5, %vm9250_vm5  ;;  %9619 = vst [vmem:[#allocation33_spill] sm:$0xff] %v6164_v61 }
  0xaf   :  { %vm6139_vm1 = vmand %vm9243_vm3, %vm9264_vm6  ;;  %9624 = vst [vmem:[#allocation34_spill] sm:$0xff] %v6197_v25  ;;  %v6218_v28 = vsel %vm6113_vm0, 65537, %v9580_v26 }
  0xb0   :  { %vm6151_vm15 = vmand %vm351_vm13, %vm338_vm8  ;;  %vm6178_vm13 = vcmp.ne.s16.totalorder %v4293_v46, 0  ;;  %9626 = vst [vmem:[#allocation36_spill] sm:$0xff] %v6218_v28 }
  0xb1   :  { %vm6170_vm8 = vmand %vm9250_vm5, %vm9256_vm12  ;;  %v390_v47 = vsel %vm6151_vm15, %v377_v4, %v6032_v54 }
  0xb2   :  { %vm1919_vm2 = vmpackc.low %vm6139_vm1, %vm6139_vm1  ;;  %vm9271_vm1 = vcmp.lt.s32.totalorder %v5318_v32, 42 }
  0xb3   :  { %vm611_vm5 = vmand %vm598_vm10, %vm585_vm14  ;;  %vm6220_vm14 = vcmp.ne.s16.totalorder %v4286_v1, 0  ;;  %v6239_v1 = vsel %vm1919_vm2, 65537, %v9580_v26 }
  0xb4   :  { %vm1920_vm11 = vmpackc.low %vm6170_vm8, %vm6170_vm8  ;;  %9630 = vst [vmem:[#allocation38_spill] sm:$0xff] %v6239_v1  ;;  %vm9642_vm8 = vcmask 1043456  }
  0xb5   :  { %v6242_v37 = vsel %vm1920_vm11, 65537, %v9580_v26  ;;  %vm6268_vm11 = vcmp.ne.s16.totalorder %v4294_v50, 0  ;;  %vm6277_vm15 = vmpackc.low %vm9256_vm12, %vm9256_vm12  ;;  %v4955_v50 = vld [vmem:[%s9197_s3 + $0xc8] sm:$0xff]  }
  0xb6   :  { %9631 = vst [vmem:[#allocation39_spill] sm:$0xff] %v6242_v37  ;;  %vm6284_vm2 = vmand %vm9642_vm8, %vm9266_vm7  ;;  %v6305_v52 = vsel %vm6277_vm15, 65537, %v9580_v26  ;;  %vm9650_vm15 = vcmp.lt.s32.totalorder %v5311_v24, 6 }
  0xb7   :  { %9647 = vst [vmem:[#allocation43_spill] sm:$0xff] %v6305_v52 }
  0xd9   :  { %v954_v27 = vpop.f32.mrb[0].mxu1 }
  0xda   :  { %v955_v31 = vadd.f32 %v6074_v60, %v954_v27  ;;  %v4718_v39 = vpop.f32.mrb[1].mxu1  ;;  %v4952_v27 = vld [vmem:[%s9197_s3 + $0x38] sm:$0xff]  }
  0xdb   :  { %v957_v10 = vpop.f32.mrb[2].mxu1  ;;  %4453 = vmatpush3.bf16.msra.mxu0 %v4952_v27  ;;  %v6231_v27 = vsel %vm611_vm5, %v624_v18, %v570_v36  ;;  %vm9294_vm5 = vcmp.lt.s32.totalorder %v5309_v23, 42  ;;  %v9635_v18 = vmov 0 }
  0xdc   :  { %v1021_v38 = vmul.f32 0.2, %v955_v31  ;;  %v958_v46 = vadd.f32 %v6074_v60, %v957_v10  ;;  %v4719_v8 = vpop.f32.mrb[3].mxu1  ;;  %vm1008_vm3 = vcmp.gt.f32.partialorder %v955_v31, 0.0  ;;  %9629 = vst [vmem:[#allocation37_spill] sm:$0xff] %v6231_v27  ;;  %vm1869_vm0 = vcmp.lt.s32.totalorder %v6231_v27, 6 }
  0xdd   :  { %v6211_v8 = vsel %vm6096_vm9, 65537, %v9580_v26  ;;  %vm6259_vm9 = vcmp.ge.s32.totalorder %v390_v47, 7 }
  0xde   :  { %9625 = vst [vmem:[#allocation35_spill] sm:$0xff] %v6211_v8  ;;  %vm1009_vm4 = vcmp.gt.f32.partialorder %v958_v46, 0.0  ;;  %v1022_v45 = vmul.f32 0.2, %v958_v46  ;;  %v1034_v51 = vsel %vm1008_vm3, %v955_v31, %v1021_v38  ;;  %vm6253_vm3 = vmpackc.low %vm9264_vm6, %vm9264_vm6  ;;  %v9636_v18 = vsel %vm6259_vm9, 4294967295, %v9635_v18  ;;  %v752_v38 = vpop.f32.mrb[0].mxu0 }
  0xdf   :  { %9637 = vst [vmem:[#allocation41_spill] sm:$0xff] %v9636_v18  ;;  %vm1713_vm8 = vmpackc.low %vm6259_vm9, %vm6259_vm9  ;;  %vm9654_vm6 = vcmp.lt.s32.totalorder %v5320_v33, 6 }
  0xe0   :  { %v1035_v41 = vsel %vm1009_vm4, %v958_v46, %v1022_v45  ;;  %vm9646_vm4 = vcmask 1042432  }
  0xe1   :  { %v6244_v44 = vpack.c.bf16 %v1035_v41, %v1034_v51  ;;  %v962_v39 = vpop.f32.mrb[4].mxu1 }
  0xe2   :  { %v963_v16 = vadd.f32 %v6074_v60, %v962_v39  ;;  %v4722_v51 = vpop.f32.mrb[5].mxu1  ;;  %v6291_v39 = vsel %vm6253_vm3, 65537, %v9580_v26  ;;  %vm6311_vm3 = vmand %vm6259_vm9, %vm1869_vm0 }
  0xe3   :  { %9632 = vst [vmem:[#allocation40_spill] sm:$0xff] %v6244_v44  ;;  %v965_v0 = vpop.f32.mrb[6].mxu1  ;;  %v9261_v31 = vrot.slane %v6244_v44, 5  ;;  %v1614_v4 = vshrl.u32 %v6244_v44, 16  ;;  %v1617_v46 = vshll.u32 %v6244_v44, 16  ;;  %9645 = vst [vmem:[#allocation42_spill] sm:$0xff] %v6291_v39 }
  0xe4   :  { %vm1010_vm10 = vcmp.gt.f32.partialorder %v963_v16, 0.0  ;;  %v1023_v41 = vmul.f32 0.2, %v963_v16  ;;  %v966_v51 = vadd.f32 %v6074_v60, %v965_v0  ;;  %v4723_v54 = vpop.f32.mrb[7].mxu1  ;;  %v4688_v0 = vpop.f32.mrb[1].mxu0 }
  0xe5   :  { %v1855_v49 = vsel %vm9646_vm4, 0, %v9261_v31  ;;  %v1616_v30 = vrot.slane %v1614_v4, 4  ;;  %v1619_v25 = vrot.slane %v1617_v46, 5  ;;  %v753_v54 = vadd.f32 %v6074_v60, %v752_v38  ;;  %v755_v5 = vpop.f32.mrb[2].mxu0  ;;  %vm6323_vm4 = vmand %vm9294_vm5, %vm9650_vm15 }
  0xe6   :  { %vm1011_vm12 = vcmp.gt.f32.partialorder %v966_v51, 0.0  ;;  %v1024_v61 = vmul.f32 0.2, %v966_v51  ;;  %v1962_v36 = vsel %vm6178_vm13, %v1855_v49, 0  ;;  %v756_v12 = vadd.f32 %v6074_v60, %v755_v5  ;;  %v4689_v47 = vpop.f32.mrb[3].mxu0  ;;  %vm6340_vm15 = vmand %vm9271_vm1, %vm9654_vm6 }
  0xe7   :  { %2778 = vrot.lane.b32.xlu0 %v1962_v36, %s5011_s11  ;;  %v6316_v0 = vor.u32 %v1619_v25, %v1616_v30  ;;  %vm806_vm13 = vcmp.gt.f32.partialorder %v753_v54, 0.0  ;;  %v819_v49 = vmul.f32 0.2, %v753_v54  ;;  %v1036_v15 = vsel %vm1010_vm10, %v963_v16, %v1023_v41  ;;  %vm1921_vm10 = vmpackc.low %vm6311_vm3, %vm6311_vm3 }
  0xe8   :  { %v1037_v28 = vsel %vm1011_vm12, %v966_v51, %v1024_v61  ;;  %v6334_v30 = vsel %vm1713_vm8, 65537, %v9580_v26  ;;  %v2302_v5 = vrot.slane %v1617_v46, 1  ;;  %vm807_vm12 = vcmp.gt.f32.partialorder %v756_v12, 0.0  ;;  %vm2696_vm6 = vmpackc.low %vm6323_vm4, %vm6323_vm4 }
  0xe9   :  { %9653 = vst [vmem:[#allocation44_spill] sm:$0xff] %v6334_v30  ;;  %v6344_v36 = vpack.c.bf16 %v1037_v28, %v1036_v15  ;;  %v970_v61 = vpop.f32.mrb[8].mxu1  ;;  %v1674_v16 = vsel %vm6284_vm2, 0, %v6316_v0  ;;  %v832_v41 = vsel %vm806_vm13, %v753_v54, %v819_v49  ;;  %v820_v18 = vmul.f32 0.2, %v756_v12  ;;  %vm6369_vm8 = vmpackc.low %vm1869_vm0, %vm1869_vm0  ;;  %v760_v54 = vpop.f32.mrb[4].mxu0 }
  0xea   :  { %v971_v46 = vadd.f32 %v6074_v60, %v970_v61  ;;  %v4726_v51 = vpop.f32.mrb[9].mxu1  ;;  %v1754_v47 = vsel %vm6220_vm14, %v1674_v16, 0  ;;  %v6355_v28 = vor.u32 %v2302_v5, %v1614_v4  ;;  %v6382_v49 = vsel %vm1921_vm10, 65537, %v9580_v26  ;;  %vm2697_vm0 = vmpackc.low %vm6340_vm15, %vm6340_vm15 }
  0xeb   :  { %9657 = vst [vmem:[#allocation45_spill] sm:$0xff] %v6344_v36  ;;  %2757 = vrot.lane.b32.xlu0 %v1754_v47, %s5011_s11  ;;  %v973_v15 = vpop.f32.mrb[10].mxu1  ;;  %v833_v47 = vsel %vm807_vm12, %v756_v12, %v820_v18  ;;  %9660 = vst [vmem:[#allocation46_spill] sm:$0xff] %v6382_v49  ;;  %v9661_v61 = vrot.slane %v6344_v36, 5  ;;  %vm9663_vm13 = vcmask 1042432   ;;  %vm9295_vm12 = vcmp.lt.s32.totalorder %v5428_v13, 42 }
  0xec   :  { %v1025_v5 = vmul.f32 0.2, %v971_v46  ;;  %v974_v16 = vadd.f32 %v6074_v60, %v973_v15  ;;  %v4727_v51 = vpop.f32.mrb[11].mxu1  ;;  %vm1012_vm7 = vcmp.gt.f32.partialorder %v971_v46, 0.0  ;;  %v9662_v15 = vrot.slane %v6244_v44, 5  ;;  %vm6397_vm3 = vmpackc.low %vm9294_vm5, %vm9294_vm5 }
  0xed   :  { %v6392_v12 = vpack.c.bf16 %v833_v47, %v832_v41  ;;  %v4692_v51 = vpop.f32.mrb[5].mxu0  ;;  %v6407_v41 = vsel %vm6369_vm8, 65537, %v9580_v26  ;;  %v761_v47 = vadd.f32 %v6074_v60, %v760_v54  ;;  %v6427_v4 = vsel %vm2696_vm6, 65537, %v9580_v26 }
  0xee   :  { %v1838_v18 = vsel %vm9663_vm13, %v9662_v15, %v9661_v61  ;;  %vm1013_vm10 = vcmp.gt.f32.partialorder %v974_v16, 0.0  ;;  %v1026_v27 = vmul.f32 0.2, %v974_v16  ;;  %v763_v44 = vpop.f32.mrb[6].mxu0  ;;  %9667 = vst [vmem:[#allocation48_spill] sm:$0xff] %v6407_v41  ;;  %vm6412_vm13 = vmpackc.low %vm9271_vm1, %vm9271_vm1  ;;  %vm9672_vm8 = vcmp.lt.s32.totalorder %v5376_v57, 42 }
  0xef   :  { %9664 = vst [vmem:[#allocation47_spill] sm:$0xff] %v6392_v12  ;;  %v1963_v52 = vsel %vm6268_vm11, %v1838_v18, 0  ;;  %v764_v45 = vadd.f32 %v6074_v60, %v763_v44  ;;  %v4693_v18 = vpop.f32.mrb[7].mxu0  ;;  %9670 = vst [vmem:[#allocation49_spill] sm:$0xff] %v6427_v4  ;;  %vm9671_vm11 = vcmp.lt.s32.totalorder %v5430_v14, 6  ;;  %v1038_v44 = vsel %vm1012_vm7, %v971_v46, %v1025_v5  ;;  %v9732_v4 = vld [vmem:[#allocation20_spill] sm:$0xff] }
  0xf0   :  { %2780 = vrot.lane.b32.xlu0 %v1963_v52, %s5011_s11  ;;  %vm6433_vm1 = vmand %vm9672_vm8, %vm9671_vm11  ;;  %v1039_v54 = vsel %vm1013_vm10, %v974_v16, %v1026_v27  ;;  %v6444_v31 = vsel %vm2697_vm0, 65537, %v9580_v26  ;;  %v6449_v51 = vsel %vm6397_vm3, 65537, %v9580_v26  ;;  %vm9677_vm4 = vcmp.lt.s32.totalorder %v5438_v17, 6  ;;  %v768_v30 = vpop.f32.mrb[8].mxu0 }
  0xf1   :  { %9675 = vst [vmem:[#allocation50_spill] sm:$0xff] %v6444_v31  ;;  %9676 = vst [vmem:[#allocation51_spill] sm:$0xff] %v6449_v51  ;;  %vm9296_vm7 = vcmp.lt.s32.totalorder %v5543_v59, 42  ;;  %v6460_v27 = vpack.c.bf16 %v1039_v54, %v1038_v44  ;;  %v978_v25 = vpop.f32.mrb[12].mxu1  ;;  %vm808_vm15 = vcmp.gt.f32.partialorder %v761_v47, 0.0  ;;  %vm809_vm0 = vcmp.gt.f32.partialorder %v764_v45, 0.0 }
  0xf2   :  { %vm6455_vm6 = vmand %vm9295_vm12, %vm9677_vm4  ;;  %v821_v5 = vmul.f32 0.2, %v761_v47  ;;  %v979_v38 = vadd.f32 %v6074_v60, %v978_v25  ;;  %v4730_v18 = vpop.f32.mrb[13].mxu1  ;;  %v822_v15 = vmul.f32 0.2, %v764_v45  ;;  %v6468_v39 = vsel %vm6412_vm13, 65537, %v9580_v26 }
  0xf3   :  { %9680 = vst [vmem:[#allocation52_spill] sm:$0xff] %v6460_v27  ;;  %9681 = vst [vmem:[#allocation53_spill] sm:$0xff] %v6468_v39  ;;  %v981_v44 = vpop.f32.mrb[14].mxu1  ;;  %v1839_v54 = vrot.slane %v6460_v27, 5  ;;  %vm9312_vm11 = vcmp.ge.s32.totalorder %v5311_v24, 1  ;;  %vm9311_vm13 = vcmp.ge.s32.totalorder %v5320_v33, 1 }
  0xf4   :  { %vm2698_vm3 = vmpackc.low %vm6433_vm1, %vm6433_vm1  ;;  %v834_v16 = vsel %vm808_vm15, %v761_v47, %v821_v5  ;;  %v1027_v61 = vmul.f32 0.2, %v979_v38  ;;  %v982_v18 = vadd.f32 %v6074_v60, %v981_v44  ;;  %v4731_v41 = vpop.f32.mrb[15].mxu1  ;;  %v835_v8 = vsel %vm809_vm0, %v764_v45, %v822_v15  ;;  %v4696_v17 = vpop.f32.mrb[9].mxu0 }
  0xf5   :  { %vm2699_vm10 = vmpackc.low %vm6455_vm6, %vm6455_vm6  ;;  %vm1014_vm8 = vcmp.gt.f32.partialorder %v979_v38, 0.0  ;;  %v9682_v47 = vrot.slane %v6344_v36, 5  ;;  %vm9683_vm4 = vcmask 1042432   ;;  %v6488_v25 = vpack.c.bf16 %v835_v8, %v834_v16  ;;  %v771_v15 = vpop.f32.mrb[10].mxu0 }
  0xf6   :  { %v6496_v41 = vsel %vm2698_vm3, 65537, %v9580_v26  ;;  %vm1015_vm15 = vcmp.gt.f32.partialorder %v982_v18, 0.0  ;;  %v1028_v45 = vmul.f32 0.2, %v982_v18  ;;  %v6505_v17 = vsel %vm2699_vm10, 65537, %v9580_v26  ;;  %v4697_v14 = vpop.f32.mrb[11].mxu0 }
  0xf7   :  { %v6486_v5 = vsel %vm9683_vm4, %v9682_v47, %v1839_v54  ;;  %9684 = vst [vmem:[#allocation54_spill] sm:$0xff] %v6488_v25  ;;  %9685 = vst [vmem:[#allocation55_spill] sm:$0xff] %v6496_v41  ;;  %vm9348_vm0 = vcmp.lt.s32.totalorder %v5552_v63, 42  ;;  %v9687_v8 = vshrl.u32 %v6460_v27, 16  ;;  %v769_v16 = vadd.f32 %v6074_v60, %v768_v30 }
  0xf8   :  { %9686 = vst [vmem:[#allocation56_spill] sm:$0xff] %v6505_v17  ;;  %v772_v47 = vadd.f32 %v6074_v60, %v771_v15  ;;  %v1040_v48 = vsel %vm1014_vm8, %v979_v38, %v1027_v61  ;;  %v1041_v42 = vsel %vm1015_vm15, %v982_v18, %v1028_v45  ;;  %v9688_v46 = vshll.u32 %v6460_v27, 16  ;;  %v4956_v17 = vld [vmem:[%s9197_s3 + $0x88] sm:$0xff]  }
  0xf9   :  { %v1633_v52 = vrot.slane %v9687_v8, 4  ;;  %v9689_v37 = vshrl.u32 %v6392_v12, 16  ;;  %v6519_v3 = vpack.c.bf16 %v1041_v42, %v1040_v48  ;;  %v986_v8 = vpop.f32.mrb[16].mxu1  ;;  %vm810_vm1 = vcmp.gt.f32.partialorder %v769_v16, 0.0 }
  0xfa   :  { %v1636_v49 = vrot.slane %v9688_v46, 5  ;;  %v823_v30 = vmul.f32 0.2, %v769_v16  ;;  %v987_v15 = vadd.f32 %v6074_v60, %v986_v8  ;;  %v4734_v44 = vpop.f32.mrb[17].mxu1  ;;  %vm811_vm6 = vcmp.gt.f32.partialorder %v772_v47, 0.0  ;;  %v776_v46 = vpop.f32.mrb[12].mxu0 }
  0xfb   :  { %v1764_v1 = vrot.slane %v9689_v37, 4  ;;  %9690 = vst [vmem:[#allocation57_spill] sm:$0xff] %v6519_v3  ;;  %v824_v38 = vmul.f32 0.2, %v772_v47  ;;  %v9691_v61 = vshll.u32 %v6392_v12, 16  ;;  %v989_v45 = vpop.f32.mrb[18].mxu1 }
  0xfc   :  { %v9293_v48 = vshrl.u32 %v6519_v3, 16  ;;  %v836_v37 = vsel %vm810_vm1, %v769_v16, %v823_v30  ;;  %vm9692_vm3 = vcmp.lt.s32.totalorder %v5561_v58, 6  ;;  %vm1016_vm8 = vcmp.gt.f32.partialorder %v987_v15, 0.0  ;;  %v4735_v14 = vpop.f32.mrb[19].mxu1 }
  0xfd   :  { %v1767_v18 = vrot.slane %v9691_v61, 5  ;;  %vm6533_vm10 = vmand %vm9296_vm7, %vm9692_vm3  ;;  %v1029_v44 = vmul.f32 0.2, %v987_v15  ;;  %v990_v61 = vadd.f32 %v6074_v60, %v989_v45  ;;  %v837_v39 = vsel %vm811_vm6, %v772_v47, %v824_v38  ;;  %v4700_v38 = vpop.f32.mrb[13].mxu0 }
  0xfe   :  { %vm9695_vm4 = vcmp.lt.s32.totalorder %v5376_v57, 42  ;;  %v9698_v30 = vrot.slane %v6519_v3, 5  ;;  %vm9699_vm1 = vcmask 1042432   ;;  %v1642_v51 = vrot.slane %v9293_v48, 4  ;;  %vm6559_vm6 = vmpackc.low %vm9295_vm12, %vm9295_vm12  ;;  %v779_v48 = vpop.f32.mrb[14].mxu0 }
  0xff   :  { %vm6541_vm15 = vmpackc.low %vm9695_vm4, %vm9695_vm4  ;;  %v9700_v45 = vshll.u32 %v6519_v3, 16  ;;  %v6554_v47 = vpack.c.bf16 %v837_v39, %v836_v37  ;;  %vm1017_vm3 = vcmp.gt.f32.partialorder %v990_v61, 0.0  ;;  %v9704_v39 = vld [vmem:[#allocation18_spill] sm:$0xff]  ;;  %v6571_v37 = vor.u32 %v1636_v49, %v1633_v52  ;;  %v4701_v13 = vpop.f32.mrb[15].mxu0 }
 0x100   :  { %v6548_v42 = vsel %vm9699_vm1, %v1839_v54, %v9698_v30  ;;  %v4953_v54 = vld [vmem:[%s9197_s3 + $0xc0] sm:$0xff]   ;;  %v1030_v30 = vmul.f32 0.2, %v990_v61  ;;  %vm2700_vm4 = vmpackc.low %vm6533_vm10, %vm6533_vm10  ;;  %v6575_v38 = vor.u32 %v1767_v18, %v1764_v1  ;;  %vm9705_vm12 = vcmp.ge.s32.totalorder %v5309_v23, 7  ;;  %v784_v24 = vpop.f32.mrb[16].mxu0 }
 0x101   :  { %v1645_v14 = vrot.slane %v9700_v45, 5  ;;  %9701 = vst [vmem:[#allocation58_spill] sm:$0xff] %v6554_v47  ;;  %vm6581_vm7 = vmand %vm9705_vm12, %vm9312_vm11  ;;  %4496 = vmatprep.subr.bf16.mxu1 %v4953_v54  ;;  %v1042_v49 = vsel %vm1016_vm8, %v987_v15, %v1029_v44  ;;  %vm9708_vm5 = vcmp.ge.s32.totalorder %v5318_v32, 7  ;;  %v6600_v13 = vsel %vm6541_vm15, 65537, %v9580_v26  ;;  %v4954_v54 = vld [vmem:[%s9197_s3 + $0x80] sm:$0xff]  }
 0x102   :  { %v1043_v52 = vsel %vm1017_vm3, %v990_v61, %v1030_v30  ;;  %vm6592_vm1 = vmand %vm9708_vm5, %vm9311_vm13  ;;  %9711 = vst [vmem:[#allocation59_spill] sm:$0xff] %v6600_v13  ;;  %vm9713_vm12 = vsmask.f32 3328  ;;  %v1821_v44 = vsel %vm6284_vm2, 0, %v6575_v38  ;;  %v9715_v61 = vld [vmem:[#allocation16_spill] sm:$0xff]  ;;  %v6646_v58 = vsel %vm2700_vm4, 65537, %v9580_v26  ;;  %4497 = vmatpush3.bf16.msra.mxu1 %v4954_v54 }
 0x103   :  { %v6573_v45 = vor.u32 %v1645_v14, %v1642_v51  ;;  %v777_v51 = vadd.f32 %v6074_v60, %v776_v46  ;;  %v6602_v18 = vpack.c.bf16 %v1043_v52, %v1042_v49  ;;  %v994_v14 = vpop.f32.mrb[20].mxu1  ;;  %v6615_v46 = vsel %vm6559_vm6, 65537, %v9580_v26  ;;  %vm1552_vm2 = vmpackc.low %vm6581_vm7, %vm6581_vm7  ;;  %4498 = vmatprep.subr.bf16.mxu1 %v4955_v50 }
 0x104   :  { %9714 = vst [vmem:[#allocation61_spill] sm:$0xff] %v6615_v46  ;;  %vm9716_vm5 = vcmp.lt.s32.totalorder %v9715_v61, 6  ;;  %v995_v57 = vadd.f32 %v6074_v60, %v994_v14  ;;  %v4738_v30 = vpop.f32.mrb[21].mxu1  ;;  %v6634_v49 = vsel %vm6220_vm14, %v1821_v44, 0  ;;  %v780_v52 = vadd.f32 %v6074_v60, %v779_v48  ;;  %vm1553_vm14 = vmpackc.low %vm6592_vm1, %vm6592_vm1 }
 0x105   :  { %9712 = vst [vmem:[#allocation60_spill] sm:$0xff] %v6602_v18  ;;  %v6607_v15 = vsel %vm9713_vm12, %v6571_v37, %v6573_v45  ;;  %vm6621_vm8 = vmand %vm9348_vm0, %vm9716_vm5  ;;  %v997_v14 = vpop.f32.mrb[22].mxu1  ;;  %v9310_v30 = vrot.slane %v6602_v18, 5  ;;  %v9309_v10 = vshrl.u32 %v6602_v18, 16  ;;  %v825_v48 = vmul.f32 0.2, %v777_v51 }
 0x106   :  { %9719 = vst [vmem:[#allocation62_spill] sm:$0xff] %v6634_v49  ;;  %v1031_v32 = vmul.f32 0.2, %v995_v57  ;;  %v998_v23 = vadd.f32 %v6074_v60, %v997_v14  ;;  %v4739_v8 = vpop.f32.mrb[23].mxu1  ;;  %vm812_vm10 = vcmp.gt.f32.partialorder %v777_v51, 0.0  ;;  %vm2701_vm15 = vmpackc.low %vm6621_vm8, %vm6621_vm8  ;;  %vm1018_vm6 = vcmp.gt.f32.partialorder %v995_v57, 0.0  ;;  %4499 = vmatpush3.bf16.msra.mxu1 %v4956_v17 }
 0x107   :  { %v9720_v44 = vrot.slane %v6519_v3, 5  ;;  %vm9721_vm3 = vcmask 1042432   ;;  %v1651_v14 = vrot.slane %v9309_v10, 4  ;;  %v9723_v8 = vshll.u32 %v6602_v18, 16  ;;  %v4704_v49 = vpop.f32.mrb[17].mxu0  ;;  %vm6731_vm7 = vmpackc.low %vm9348_vm0, %vm9348_vm0 }
 0x108   :  { %vm9724_vm4 = vcmp.lt.s32.totalorder %v5543_v59, 42  ;;  %vm1019_vm5 = vcmp.gt.f32.partialorder %v998_v23, 0.0  ;;  %v1032_v10 = vmul.f32 0.2, %v998_v23  ;;  %v787_v49 = vpop.f32.mrb[18].mxu0  ;;  %v6700_v61 = vsel %vm1552_vm2, 65537, %v9580_v26 }
 0x109   :  { %v6664_v54 = vsel %vm9721_vm3, %v9720_v44, %v9310_v30  ;;  %v1654_v33 = vrot.slane %v9723_v8, 5  ;;  %vm6673_vm12 = vmpackc.low %vm9724_vm4, %vm9724_vm4  ;;  %v4957_v44 = vld [vmem:[%s9197_s3 + $0xd0] sm:$0xff]   ;;  %v9727_v30 = vld [vmem:[#allocation19_spill] sm:$0xff]  ;;  %vm9729_vm4 = vcmp.lt.s32.totalorder %v5706_v29, 42  ;;  %v838_v8 = vsel %vm812_vm10, %v777_v51, %v825_v48  ;;  %v1002_v17 = vpop.f32.mrb[24].mxu1 }
 0x10a   :  { %9722 = vst [vmem:[#allocation63_spill] sm:$0xff] %v6664_v54  ;;  %vm9728_vm13 = vcmp.lt.s32.totalorder %v9727_v30, 6  ;;  %v826_v31 = vmul.f32 0.2, %v780_v52  ;;  %v4705_v30 = vpop.f32.mrb[19].mxu0  ;;  %vm9733_vm3 = vcmp.lt.s32.totalorder %v9732_v4, 6  ;;  %4500 = vmatprep.subr.bf16.mxu1 %v4957_v44 }
 0x10b   :  { %vm6688_vm11 = vmand %vm9729_vm4, %vm9728_vm13  ;;  %v6692_v41 = vor.u32 %v1654_v33, %v1651_v14  ;;  %vm9734_vm13 = vcmp.lt.s32.totalorder %v9704_v39, 42  ;;  %v1044_v33 = vsel %vm1018_vm6, %v995_v57, %v1031_v32  ;;  %v1045_v14 = vsel %vm1019_vm5, %v998_v23, %v1032_v10  ;;  %v4958_v10 = vld [vmem:[%s9197_s3 + $0x90] sm:$0xff]   ;;  %v4959_v48 = vld [vmem:[%s9197_s3 + $0xd8] sm:$0xff]   ;;  %v4742_v44 = vpop.f32.mrb[25].mxu1 }
 0x10c   :  { %vm6707_vm4 = vmand %vm9734_vm13, %vm9733_vm3  ;;  %v6718_v47 = vsel %vm1553_vm14, 65537, %v9580_v26  ;;  %v6726_v51 = vsel %vm2701_vm15, 65537, %v9580_v26  ;;  %v6735_v32 = vpack.c.bf16 %v1045_v14, %v1044_v33  ;;  %vm9354_vm1 = vsmask.f32 7424  ;;  %4501 = vmatpush3.bf16.msra.mxu1 %v4958_v10 }
 0x10d   :  { %9737 = vst [vmem:[#allocation64_spill] sm:$0xff] %v6726_v51  ;;  %v9741_v1 = vshrl.u32 %v6344_v36, 16  ;;  %vm9742_vm8 = vsmask.f32 3328  ;;  %vm9743_vm2 = vcmp.gt.f32.partialorder %v780_v52, 0.0  ;;  %vm2702_vm14 = vmpackc.low %vm6688_vm11, %vm6688_vm11  ;;  %v9744_v33 = vshll.u32 %v6344_v36, 16  ;;  %4502 = vmatprep.subr.bf16.mxu1 %v4959_v48 }
 0x10e   :  { %9740 = vst [vmem:[#allocation65_spill] sm:$0xff] %v6735_v32  ;;  %v6742_v16 = vsel %vm9742_vm8, %v6573_v45, %v6692_v41  ;;  %v839_v30 = vsel %vm9743_vm2, %v780_v52, %v826_v31  ;;  %v785_v31 = vadd.f32 %v6074_v60, %v784_v24  ;;  %vm2703_vm10 = vmpackc.low %vm6707_vm4, %vm6707_vm4  ;;  %v9321_v63 = vrot.slane %v6735_v32, 5  ;;  %v4960_v48 = vld [vmem:[%s9197_s3 + $0x98] sm:$0xff]  }
 0x10f   :  { %v1624_v57 = vrot.slane %v9741_v1, 4  ;;  %v1627_v14 = vrot.slane %v9744_v33, 5  ;;  %v6756_v45 = vpack.c.bf16 %v839_v30, %v838_v8  ;;  %v1005_v1 = vpop.f32.mrb[26].mxu1  ;;  %v9322_v4 = vshrl.u32 %v6735_v32, 16 }
 0x110   :  { %v9323_v44 = vshll.u32 %v6735_v32, 16  ;;  %v4279_v8 = vcombine.low %v6700_v61, %v6718_v47  ;;  %vm9746_vm15 = vcmp.lt.s32.totalorder %v5706_v29, 42  ;;  %v4743_v30 = vpop.f32.mrb[27].mxu1  ;;  %v9749_v33 = vshll.u32 %v6460_v27, 16  ;;  %4503 = vmatpush3.bf16.msra.mxu1 %v4960_v48 }
 0x111   :  { %9745 = vst [vmem:[#allocation66_spill] sm:$0xff] %v6756_v45  ;;  %vm6772_vm6 = vmpackc.low %vm9746_vm15, %vm9746_vm15  ;;  %v6783_v52 = vsel %vm6673_vm12, 65537, %v9580_v26  ;;  %v6788_v61 = vsel %vm6731_vm7, 65537, %v9580_v26  ;;  %v6796_v47 = vsel %vm2702_vm14, 65537, %v9580_v26  ;;  %v9753_v50 = vrot.slane %v6602_v18, 5  ;;  %v1358_v48 = vpop.f32.mrb[28].mxu1 }
 0x112   :  { %v6778_v1 = vrot.slane %v9749_v33, 1  ;;  %9750 = vst [vmem:[#allocation67_spill] sm:$0xff] %v6783_v52  ;;  %9751 = vst [vmem:[#allocation68_spill] sm:$0xff] %v6788_v61  ;;  %vm9754_vm12 = vcmask 1042432   ;;  %v1660_v23 = vrot.slane %v9322_v4, 4  ;;  %v1663_v30 = vrot.slane %v9323_v44, 5 }
 0x113   :  { %9752 = vst [vmem:[#allocation69_spill] sm:$0xff] %v6796_v47  ;;  %v6803_v10 = vsel %vm9754_vm12, %v9753_v50, %v9321_v63  ;;  %v792_v33 = vpop.f32.mrb[20].mxu0  ;;  %v6815_v59 = vsel %vm2703_vm10, 65537, %v9580_v26  ;;  %v4961_v50 = vld [vmem:[%s9197_s3 + $0xe0] sm:$0xff]   ;;  %v6824_v63 = vadd.f32 %v6074_v60, %v1002_v17  ;;  %v9757_v4 = vcombine.low %v5566_v6, %v5571_v7  ;;  %vm9775_vm7 = vmmov %vm9742_vm8 }
 0x114   :  { %9755 = vst [vmem:[#allocation70_spill] sm:$0xff] %v6803_v10  ;;  %9756 = vst [vmem:[#allocation71_spill] sm:$0xff] %v6815_v59  ;;  %v9758_v44 = vmov 0  ;;  %vm814_vm5 = vcmp.gt.f32.partialorder %v785_v31, 0.0  ;;  %v827_v54 = vmul.f32 0.2, %v785_v31  ;;  %v6838_v46 = vor.u32 %v1627_v14, %v1624_v57  ;;  %4504 = vmatprep.subr.bf16.mxu1 %v4961_v50 }
 0x115   :  { %vm6829_vm11 = vcmp.ne.s16.totalorder %v9757_v4, 0  ;;  %v4708_v45 = vpop.f32.mrb[21].mxu0  ;;  %v6836_v29 = vsel %vm6772_vm6, 65537, %v9580_v26  ;;  %v9762_v17 = vcombine.low %v5722_v22, %v5962_v21  ;;  %v6847_v6 = vor.u32 %v1663_v30, %v1660_v23  ;;  %v4962_v50 = vld [vmem:[%s9197_s3 + $0xa0] sm:$0xff]  }
 0x116   :  { %v9759_v44 = vsel %vm6829_vm11, 4294967295, %v9758_v44  ;;  %9761 = vst [vmem:[#allocation73_spill] sm:$0xff] %v6836_v29  ;;  %v788_v4 = vadd.f32 %v6074_v60, %v787_v49  ;;  %v795_v45 = vpop.f32.mrb[22].mxu0  ;;  %v9766_v24 = vcombine.low %v5687_v19, %v5702_v20  ;;  %v9767_v57 = vmov 0  ;;  %4505 = vmatpush3.bf16.msra.mxu1 %v4962_v50 }
 0x117   :  { %9760 = vst [vmem:[#allocation72_spill] sm:$0xff] %v9759_v44  ;;  %vm6843_vm3 = vcmp.ne.s16.totalorder %v9762_v17, 0  ;;  %9765 = vst [vmem:[#allocation74_spill] sm:$0xff] %v6847_v6  ;;  %v9770_v22 = vshrl.u32 %v6460_v27, 16  ;;  %v9771_v14 = vshll.u32 %v6519_v3, 16  ;;  %v793_v30 = vadd.f32 %v6074_v60, %v792_v33  ;;  %v4709_v17 = vpop.f32.mrb[23].mxu0 }
 0x118   :  { %vm6854_vm13 = vcmp.ne.s16.totalorder %v9766_v24, 0  ;;  %v796_v49 = vadd.f32 %v6074_v60, %v795_v45  ;;  %v9772_v19 = vcombine.low %v5992_v56, %v6040_v40  ;;  %v6875_v24 = vsel %vm9775_vm7, %v6692_v41, %v6847_v6  ;;  %v4778_v40 = vpop.f32.mrb[29].mxu1  ;;  %v9945_v44 = vld [vmem:[#allocation53_spill] sm:$0xff] }
 0x119   :  { %v9768_v57 = vsel %vm6854_vm13, 4294967295, %v9767_v57  ;;  %v2309_v21 = vor.u32 %v6778_v1, %v9770_v22  ;;  %v2310_v23 = vrot.slane %v9771_v14, 1  ;;  %9776 = vst [vmem:[#allocation76_spill] sm:$0xff] %v6875_v24  ;;  %v840_v22 = vsel %vm814_vm5, %v785_v31, %v827_v54  ;;  %v4963_v31 = vld [vmem:[%s9197_s3 + $0xe8] sm:$0xff]   ;;  %v1361_v54 = vpop.f32.mrb[30].mxu1  ;;  %v6903_v24 = vpop.f32.mrb[24].mxu0 }
 0x11a   :  { %9769 = vst [vmem:[#allocation75_spill] sm:$0xff] %v9768_v57  ;;  %vm6868_vm4 = vcmp.ne.s16.totalorder %v9772_v19, 0  ;;  %vm815_vm8 = vcmp.gt.f32.partialorder %v788_v4, 0.0  ;;  %v828_v33 = vmul.f32 0.2, %v788_v4  ;;  %v1359_v56 = vadd.f32 %v6074_v60, %v1358_v48  ;;  %v4779_v27 = vpop.f32.mrb[31].mxu1  ;;  %4506 = vmatprep.subr.bf16.mxu1 %v4963_v31 }
 0x11b   :  { %v1033_v45 = vmul.f32 0.2, %v6824_v63  ;;  %vm6883_vm2 = vcmp.ne.s16.totalorder %v4279_v8, 0  ;;  %v9777_v14 = vmov 0  ;;  %v6888_v41 = vsel %vm9354_vm1, %v2309_v21, %v2310_v23  ;;  %v4964_v8 = vld [vmem:[%s9197_s3 + $0xa8] sm:$0xff]  }
 0x11c   :  { %v9778_v14 = vsel %vm6883_vm2, 4294967295, %v9777_v14  ;;  %9780 = vst [vmem:[#allocation78_spill] sm:$0xff] %v6888_v41  ;;  %vm816_vm14 = vcmp.gt.f32.partialorder %v793_v30, 0.0  ;;  %v9781_v17 = vshll.u32 %v6344_v36, 16  ;;  %v841_v7 = vsel %vm815_vm8, %v788_v4, %v828_v33  ;;  %v4965_v4 = vld [vmem:[%s9197_s3 + $0xf0] sm:$0xff]   ;;  %4507 = vmatpush3.bf16.msra.mxu1 %v4964_v8 }
 0x11d   :  { %9779 = vst [vmem:[#allocation77_spill] sm:$0xff] %v9778_v14  ;;  %v829_v48 = vmul.f32 0.2, %v793_v30  ;;  %vm817_vm10 = vcmp.gt.f32.partialorder %v796_v49, 0.0  ;;  %vm1412_vm15 = vcmp.gt.f32.partialorder %v1359_v56, 0.0  ;;  %v1362_v40 = vadd.f32 %v6074_v60, %v1361_v54  ;;  %4508 = vmatprep.subr.bf16.mxu1 %v4965_v4 }
 0x11e   :  { %v6895_v19 = vrot.slane %v9781_v17, 1  ;;  %v1425_v21 = vmul.f32 0.2, %v1359_v56  ;;  %v6901_v41 = vpack.c.bf16 %v841_v7, %v840_v22  ;;  %v9783_v33 = vcombine.low %v5519_v43, %v5531_v53  ;;  %v4967_v53 = vld [vmem:[%s9197_s3 + $0xf8] sm:$0xff]  }
 0x11f   :  { %v9784_v50 = vmov 0  ;;  %v842_v17 = vsel %vm816_vm14, %v793_v30, %v829_v48  ;;  %v830_v54 = vmul.f32 0.2, %v796_v49  ;;  %v9787_v27 = vshrl.u32 %v6519_v3, 16  ;;  %v4966_v30 = vld [vmem:[%s9197_s3 + $0xb0] sm:$0xff]   ;;  %v9885_v20 = vld [vmem:[#allocation74_spill] sm:$0xff] }
 0x120   :  { %9782 = vst [vmem:[#allocation79_spill] sm:$0xff] %v6901_v41  ;;  %vm6911_vm6 = vcmp.ne.s16.totalorder %v9783_v33, 0  ;;  %v9788_v22 = vshll.u32 %v6602_v18, 16  ;;  %v4712_v41 = vpop.f32.mrb[25].mxu0  ;;  %vm1020_vm12 = vcmp.gt.f32.partialorder %v6824_v63, 0.0  ;;  %vm1413_vm5 = vcmp.gt.f32.partialorder %v1362_v40, 0.0  ;;  %4509 = vmatpush3.bf16.msra.mxu1 %v4966_v30 }
 0x121   :  { %v9785_v50 = vsel %vm6911_vm6, 4294967295, %v9784_v50  ;;  %v2312_v7 = vor.u32 %v2310_v23, %v9787_v27  ;;  %v1426_v6 = vmul.f32 0.2, %v1362_v40  ;;  %v6924_v43 = vsel %vm9775_vm7, %v6316_v0, %v6838_v46  ;;  %v803_v23 = vpop.f32.mrb[26].mxu0  ;;  %4510 = vmatprep.subr.bf16.mxu1 %v4967_v53 }
 0x122   :  { %9786 = vst [vmem:[#allocation80_spill] sm:$0xff] %v9785_v50  ;;  %v2313_v31 = vrot.slane %v9788_v22, 1  ;;  %vm9789_vm8 = vcmp.lt.s32.totalorder %v9704_v39, 42  ;;  %v843_v41 = vsel %vm817_vm10, %v796_v49, %v830_v54  ;;  %v9793_v0 = vshrl.u32 %v6602_v18, 16  ;;  %v4713_v3 = vpop.f32.mrb[27].mxu0  ;;  %v9958_v50 = vld [vmem:[#allocation61_spill] sm:$0xff] }
 0x123   :  { %vm6929_vm14 = vmpackc.low %vm9789_vm8, %vm9789_vm8  ;;  %v9794_v27 = vshll.u32 %v6735_v32, 16  ;;  %v1438_v23 = vsel %vm1412_vm15, %v1359_v56, %v1425_v21  ;;  %v1439_v39 = vsel %vm1413_vm5, %v1362_v40, %v1426_v6  ;;  %v6950_v10 = vsel %vm9775_vm7, %v6838_v46, %v6571_v37 }
 0x124   :  { %v6938_v48 = vsel %vm9354_vm1, %v2312_v7, %v2313_v31  ;;  %v2315_v33 = vor.u32 %v2313_v31, %v9793_v0  ;;  %v6952_v49 = vpack.c.bf16 %v843_v41, %v842_v17  ;;  %v6954_v54 = vpack.c.bf16 %v1439_v39, %v1438_v23  ;;  %v1366_v7 = vpop.f32.mrb[32].mxu1  ;;  %v7021_v31 = vld [vmem:[%s9198_s2] ss:$0 sm:$0xff] }
 0x125   :  { %9792 = vst [vmem:[#allocation81_spill] sm:$0xff] %v6938_v48  ;;  %v6944_v22 = vrot.slane %v9794_v27, 1  ;;  %v6962_v3 = vsel %vm6929_vm14, 65537, %v9580_v26  ;;  %v1046_v37 = vsel %vm1020_vm12, %v6824_v63, %v1033_v45  ;;  %v1367_v39 = vadd.f32 %v6074_v60, %v1366_v7  ;;  %v4782_v46 = vpop.f32.mrb[33].mxu1  ;;  %v1156_v7 = vpop.f32.mrb[28].mxu0 }
 0x126   :  { %9795 = vst [vmem:[#allocation82_spill] sm:$0xff] %v6952_v49  ;;  %9796 = vst [vmem:[#allocation83_spill] sm:$0xff] %v6962_v3  ;;  %v9798_v8 = vrot.slane %v6392_v12, 4  ;;  %vm9799_vm10 = vcmask 1043456   ;;  %v1369_v40 = vpop.f32.mrb[34].mxu1  ;;  %v2119_v4 = vshrl.u32 %v6954_v54, 16  ;;  %v6988_v45 = vsel %vm9354_vm1, %v6355_v28, %v6895_v19 }
 0x127   :  { %v6966_v6 = vsel %vm9354_vm1, %v2315_v33, %v6944_v22  ;;  %v2121_v17 = vshll.u32 %v6954_v54, 16  ;;  %9801 = vst [vmem:[#allocation86_spill] sm:$0xff] %v6988_v45  ;;  %v1427_v41 = vmul.f32 0.2, %v1367_v39  ;;  %v1370_v0 = vadd.f32 %v6074_v60, %v1369_v40  ;;  %v4783_v33 = vpop.f32.mrb[35].mxu1  ;;  %v4968_v60 = vld [vmem:[%s9197_s3 + $0xb8] sm:$0xff]  }
 0x128   :  { %9797 = vst [vmem:[#allocation84_spill] sm:$0xff] %v6966_v6  ;;  %v6978_v21 = vsel %vm9799_vm10, 0, %v9798_v8  ;;  %v9342_v23 = vshrl.u32 %v6488_v25, 16  ;;  %v6998_v46 = vpack.c.bf16 %v1046_v37, %v1046_v37  ;;  %vm1414_vm15 = vcmp.gt.f32.partialorder %v1367_v39, 0.0  ;;  %v4748_v8 = vpop.f32.mrb[29].mxu0  ;;  %4511 = vmatpush3.bf16.msra.mxu1 %v4968_v60  ;;  %v1374_v12 = vpop.f32.mrb[36].mxu1 }
 0x129   :  { %9800 = vst [vmem:[#allocation85_spill] sm:$0xff] %v6978_v21  ;;  %vm1415_vm12 = vcmp.gt.f32.partialorder %v1370_v0, 0.0  ;;  %v1428_v40 = vmul.f32 0.2, %v1370_v0  ;;  %v2123_v33 = vrot.slane %v2121_v17, 1  ;;  %v9803_v37 = vcombine.low %v5997_v55, %v6002_v62  ;;  %v1159_v63 = vpop.f32.mrb[30].mxu0 }
 0x12a   :  { %9802 = vst [vmem:[#allocation87_spill] sm:$0xff] %v6998_v46  ;;  %v9804_v27 = vmov 0  ;;  %v2474_v28 = vrot.slane %v2119_v4, 3  ;;  %v2475_v56 = vrot.slane %v2121_v17, 4  ;;  %v1157_v62 = vadd.f32 %v7021_v31, %v1156_v7  ;;  %v4749_v55 = vpop.f32.mrb[31].mxu0 }
 0x12b   :  { %vm7010_vm5 = vcmp.ne.s16.totalorder %v9803_v37, 0  ;;  %v1440_v37 = vsel %vm1414_vm15, %v1367_v39, %v1427_v41  ;;  %v1441_v30 = vsel %vm1415_vm12, %v1370_v0, %v1428_v40  ;;  %v1772_v53 = vrot.slane %v9342_v23, 4  ;;  %v4786_v39 = vpop.f32.mrb[37].mxu1 }
 0x12c   :  { %v9805_v27 = vsel %vm7010_vm5, 4294967295, %v9804_v27  ;;  %v7030_v8 = vpack.c.bf16 %v1441_v30, %v1440_v37  ;;  %v2638_v18 = vrot.slane %v6954_v54, 4  ;;  %v9807_v49 = vshll.u32 %v6488_v25, 16  ;;  %v1377_v55 = vpop.f32.mrb[38].mxu1  ;;  %v1164_v39 = vpop.f32.mrb[32].mxu0 }
 0x12d   :  { %9806 = vst [vmem:[#allocation88_spill] sm:$0xff] %v9805_v27  ;;  %vm1210_vm14 = vcmp.gt.f32.partialorder %v1157_v62, 0.0  ;;  %v1375_v60 = vadd.f32 %v7021_v31, %v1374_v12  ;;  %v2124_v41 = vor.u32 %v2123_v33, %v2119_v4  ;;  %v1223_v0 = vmul.f32 0.2, %v1157_v62  ;;  %v4787_v52 = vpop.f32.mrb[39].mxu1 }
 0x12e   :  { %v1775_v7 = vrot.slane %v9807_v49, 5  ;;  %v2320_v40 = vshll.u32 %v6998_v46, 16  ;;  %v2126_v17 = vshll.u32 %v7030_v8, 16  ;;  %v2130_v30 = vshrl.u32 %v7030_v8, 16 }
 0x12f   :  { %v2639_v37 = vrot.slane %v7030_v8, 4  ;;  %v2476_v23 = vor.u32 %v2475_v56, %v2474_v28  ;;  %vm1416_vm7 = vcmp.gt.f32.partialorder %v1375_v60, 0.0  ;;  %v1429_v61 = vmul.f32 0.2, %v1375_v60 }
 0x130   :  { %v1378_v49 = vadd.f32 %v7021_v31, %v1377_v55  ;;  %v9808_v12 = vcombine.low %v6125_v9, %v6133_v11  ;;  %v1160_v33 = vadd.f32 %v7021_v31, %v1159_v63  ;;  %v2128_v46 = vrot.slane %v2126_v17, 1  ;;  %v4752_v11 = vpop.f32.mrb[33].mxu0 }
 0x131   :  { %v9811_v21 = vcombine.low %v6058_v35, %v6107_v34  ;;  %v9812_v56 = vmov 0  ;;  %vm9815_vm12 = vcmask 1043456   ;;  %v2477_v28 = vrot.slane %v2130_v30, 3  ;;  %v7062_v45 = vpop.f32.mrb[34].mxu0  ;;  %v9817_v34 = vld [vmem:[#allocation15_spill] sm:$0xff] }
 0x132   :  { %vm7044_vm10 = vcmp.ne.s16.totalorder %v9808_v12, 0  ;;  %v7057_v52 = vsel %vm9815_vm12, %v2638_v18, %v2639_v37  ;;  %v2478_v9 = vrot.slane %v2126_v17, 4  ;;  %v1442_v55 = vsel %vm1416_vm7, %v1375_v60, %v1429_v61  ;;  %v4753_v11 = vpop.f32.mrb[35].mxu0 }
 0x133   :  { %vm7052_vm15 = vcmp.ne.s16.totalorder %v9811_v21, 0  ;;  %vm1417_vm0 = vcmp.gt.f32.partialorder %v1378_v49, 0.0  ;;  %v1430_v12 = vmul.f32 0.2, %v1378_v49  ;;  %v9816_v63 = vshrl.u32 %v6735_v32, 16 }
 0x134   :  { %v9813_v56 = vsel %vm7052_vm15, 4294967295, %v9812_v56  ;;  %v2129_v35 = vsel %vm9354_vm1, %v2124_v41, %v2128_v46  ;;  %v9818_v21 = vcombine.low %v5677_v2, %v9817_v34  ;;  %v9819_v18 = vmov 0  ;;  %v1382_v2 = vpop.f32.mrb[40].mxu1 }
 0x135   :  { %9814 = vst [vmem:[#allocation89_spill] sm:$0xff] %v9813_v56  ;;  %v2318_v14 = vor.u32 %v6944_v22, %v9816_v63  ;;  %v2479_v17 = vor.u32 %v2478_v9, %v2477_v28  ;;  %v1236_v61 = vsel %vm1210_vm14, %v1157_v62, %v1223_v0  ;;  %v2322_v60 = vrot.slane %v2320_v40, 1  ;;  %v4790_v40 = vpop.f32.mrb[41].mxu1  ;;  %v9953_v56 = vld [vmem:[#allocation56_spill] sm:$0xff] }
 0x136   :  { %vm7068_vm8 = vcmp.ne.s16.totalorder %v9818_v21, 0  ;;  %v1443_v25 = vsel %vm1417_vm0, %v1378_v49, %v1430_v12  ;;  %v2259_v22 = vsel %vm6911_vm6, %v2129_v35, 0  ;;  %vm1211_vm7 = vcmp.gt.f32.partialorder %v1160_v33, 0.0  ;;  %v9827_v40 = vld [vmem:[#allocation39_spill] sm:$0xff] }
 0x137   :  { %v9820_v18 = vsel %vm7068_vm8, 4294967295, %v9819_v18  ;;  %v1224_v63 = vmul.f32 0.2, %v1160_v33  ;;  %v7075_v51 = vpack.c.bf16 %v1443_v25, %v1442_v55  ;;  %2813 = vrot.lane.b32.xlu1 %v2259_v22, %s5011_s11  ;;  %vm9822_vm12 = vsmask.f32 4352  ;;  %v1385_v55 = vpop.f32.mrb[42].mxu1 }
 0x138   :  { %9821 = vst [vmem:[#allocation15_spill] sm:$0xff] %v9820_v18  ;;  %v7082_v28 = vsel %vm9822_vm12, %v2476_v23, %v2479_v17  ;;  %v7085_v62 = vsel %vm9354_vm1, %v2318_v14, %v2322_v60  ;;  %v1383_v0 = vadd.f32 %v7021_v31, %v1382_v2  ;;  %v2132_v49 = vor.u32 %v2130_v30, %v2128_v46  ;;  %v4791_v60 = vpop.f32.mrb[43].mxu1  ;;  %v7099_v46 = vpop.f32.mrb[36].mxu0  ;;  %v9826_v2 = vld [vmem:[#allocation38_spill] sm:$0xff] }
 0x139   :  { %9823 = vst [vmem:[#allocation90_spill] sm:$0xff] %v7085_v62  ;;  %v7088_v9 = vor.u32 %v1775_v7, %v1772_v53  ;;  %v1237_v25 = vsel %vm1211_vm7, %v1160_v33, %v1224_v63  ;;  %v2134_v12 = vshll.u32 %v7075_v51, 16  ;;  %v2138_v35 = vshrl.u32 %v7075_v51, 16 }
 0x13a   :  { %v2641_v34 = vrot.slane %v7075_v51, 4  ;;  %v7093_v21 = vpack.c.bf16 %v1237_v25, %v1236_v61  ;;  %vm1418_vm0 = vcmp.gt.f32.partialorder %v1383_v0, 0.0  ;;  %v1431_v23 = vmul.f32 0.2, %v1383_v0  ;;  %v4756_v61 = vpop.f32.mrb[37].mxu0 }
 0x13b   :  { %9824 = vst [vmem:[#allocation91_spill] sm:$0xff] %v7088_v9  ;;  %v1386_v14 = vadd.f32 %v7021_v31, %v1385_v55  ;;  %v7097_v11 = vadd.f32 %v7021_v31, %v1164_v39  ;;  %2792 = vrot.lane.b32.xlu1 %v6954_v54, %s5011_s11  ;;  %v2136_v53 = vrot.slane %v2134_v12, 1  ;;  %vm9825_vm14 = vcmask 1043456   ;;  %v9831_v55 = vld [vmem:[#allocation46_spill] sm:$0xff]  ;;  %v9984_v39 = vld [vmem:[#allocation9_spill] sm:$0xff] }
 0x13c   :  { %v7104_v7 = vsel %vm9825_vm14, %v2639_v37, %v2641_v34  ;;  %v2481_v30 = vrot.slane %v2138_v35, 3  ;;  %v2482_v33 = vrot.slane %v2134_v12, 4  ;;  %v1444_v22 = vsel %vm1418_vm0, %v1383_v0, %v1431_v23  ;;  %v7125_v0 = vpop.f32.mrb[38].mxu0  ;;  %v9838_v23 = vld [vmem:[#allocation25_spill] sm:$0xff]  ;;  %v9839_v61 = vld [vmem:[#allocation26_spill] sm:$0xff] }
 0x13d   :  { %vm1419_vm7 = vcmp.gt.f32.partialorder %v1386_v14, 0.0  ;;  %v1432_v63 = vmul.f32 0.2, %v1386_v14  ;;  %v9828_v25 = vcombine.low %v9826_v2, %v9827_v40  ;;  %v9832_v54 = vcombine.low %v9831_v55, %v9831_v55  ;;  %v9856_v55 = vld [vmem:[#allocation36_spill] sm:$0xff] }
 0x13e   :  { %vm9835_vm14 = vsmask.f32 3328  ;;  %vm9837_vm0 = vsmask.f32 7424  ;;  %v9840_v2 = vcombine.low %v9838_v23, %v9839_v61  ;;  %v9841_v40 = vmov 0  ;;  %v9855_v23 = vld [vmem:[#allocation35_spill] sm:$0xff] }
 0x13f   :  { %vm7109_vm12 = vcmp.ne.s16.totalorder %v9828_v25, 0  ;;  %vm7116_vm1 = vcmp.ne.s16.totalorder %v9832_v54, 0  ;;  %v7123_v37 = vsel %vm9835_vm14, %v6575_v38, %v7088_v9  ;;  %v2137_v12 = vsel %vm9837_vm0, %v2132_v49, %v2136_v53  ;;  %v9844_v25 = vld [vmem:[#allocation63_spill] sm:$0xff]  ;;  %v4757_v9 = vpop.f32.mrb[39].mxu0  ;;  %vm9848_vm14 = vmmov %vm9837_vm0 }
 0x140   :  { %9836 = vst [vmem:[#allocation38_spill] sm:$0xff] %v7123_v37  ;;  %vm7131_vm9 = vcmp.ne.s16.totalorder %v9840_v2, 0  ;;  %v9845_v54 = vshrl.u32 %v6344_v36, 16  ;;  %v7141_v41 = vor.u32 %v2482_v33, %v2481_v30  ;;  %v1445_v62 = vsel %vm1419_vm7, %v1386_v14, %v1432_v63  ;;  %v1390_v9 = vpop.f32.mrb[44].mxu1  ;;  %v9944_v37 = vld [vmem:[#allocation51_spill] sm:$0xff] }
 0x141   :  { %v9842_v40 = vsel %vm7131_vm9, 4294967295, %v9841_v40  ;;  %v2260_v49 = vsel %vm7068_vm8, %v2137_v12, 0  ;;  %v1225_v61 = vmul.f32 0.2, %v7097_v11  ;;  %v7149_v2 = vpack.c.bf16 %v1445_v62, %v1444_v22  ;;  %v4794_v22 = vpop.f32.mrb[45].mxu1 }
 0x142   :  { %9843 = vst [vmem:[#allocation39_spill] sm:$0xff] %v9842_v40  ;;  %v2306_v38 = vor.u32 %v6895_v19, %v9845_v54  ;;  %v9846_v19 = vsel %vm6829_vm11, %v6924_v43, 0  ;;  %2815 = vrot.lane.b32.xlu0 %v2260_v49, %s5011_s11  ;;  %vm9847_vm7 = vsmask.f32 4352  ;;  %v1391_v33 = vadd.f32 %v7021_v31, %v1390_v9  ;;  %v1393_v12 = vpop.f32.mrb[46].mxu1  ;;  %v9850_v49 = vld [vmem:[#allocation44_spill] sm:$0xff] }
 0x143   :  { %2759 = vrot.lane.b32.xlu1 %v9846_v19, %s5011_s11  ;;  %v7162_v30 = vsel %vm9847_vm7, %v2479_v17, %v7141_v41  ;;  %v2142_v54 = vshll.u32 %v7149_v2, 16  ;;  %v2146_v17 = vshrl.u32 %v7149_v2, 16  ;;  %v9851_v19 = vcombine.low %v9850_v49, %v9850_v49  ;;  %v4795_v62 = vpop.f32.mrb[47].mxu1 }
 0x144   :  { %v7169_v43 = vsel %vm9848_vm14, %v2306_v38, %v6778_v1  ;;  %v9852_v9 = vmov 0  ;;  %v9364_v1 = vrot.slane %v7149_v2, 4  ;;  %v1168_v38 = vadd.f32 %v7021_v31, %v7062_v45 }
 0x145   :  { %9849 = vst [vmem:[#allocation46_spill] sm:$0xff] %v7169_v43  ;;  %vm7179_vm7 = vcmp.ne.s16.totalorder %v9851_v19, 0  ;;  %v1433_v22 = vmul.f32 0.2, %v1391_v33  ;;  %v1394_v63 = vadd.f32 %v7021_v31, %v1393_v12  ;;  %v2140_v14 = vor.u32 %v2138_v35, %v2136_v53  ;;  %v7194_v19 = vpop.f32.mrb[40].mxu0  ;;  %v9866_v12 = vld [vmem:[#allocation30_spill] sm:$0xff] }
 0x146   :  { %v9853_v9 = vsel %vm7179_vm7, 4294967295, %v9852_v9  ;;  %v9857_v3 = vcombine.low %v9855_v23, %v9856_v55  ;;  %v9858_v49 = vmov 0  ;;  %v9861_v45 = vsel %vm6843_vm3, %v6486_v5, 0  ;;  %v9864_v55 = vld [vmem:[#allocation21_spill] sm:$0xff]  ;;  %v4760_v23 = vpop.f32.mrb[41].mxu0 }
 0x147   :  { %9854 = vst [vmem:[#allocation25_spill] sm:$0xff] %v9853_v9  ;;  %2794 = vrot.lane.b32.xlu1 %v7030_v8, %s5011_s11  ;;  %2782 = vrot.lane.b32.xlu0 %v9861_v45, %s5011_s11  ;;  %v2144_v62 = vrot.slane %v2142_v54, 1  ;;  %vm9862_vm14 = vcmask 1043456   ;;  %v2486_v53 = vrot.slane %v2142_v54, 4  ;;  %v4969_v8 = vld [vmem:[%s9197_s3 + $0x140] sm:$0xff]   ;;  %vm9865_vm2 = vcmp.gt.f32.partialorder %v1391_v33, 0.0 }
 0x148   :  { %vm7190_vm0 = vcmp.ne.s16.totalorder %v9857_v3, 0  ;;  %v7206_v35 = vsel %vm9862_vm14, %v2641_v34, %v9364_v1  ;;  %v2485_v3 = vrot.slane %v2146_v17, 3  ;;  %v1446_v13 = vsel %vm9865_vm2, %v1391_v33, %v1433_v22  ;;  %v9867_v45 = vld [vmem:[#allocation31_spill] sm:$0xff]  ;;  %v9872_v54 = vld [vmem:[#allocation22_spill] sm:$0xff]  ;;  %v7223_v23 = vpop.f32.mrb[42].mxu0  ;;  %4554 = vmatprep.subr.bf16.mxu0 %v4969_v8 }
 0x149   :  { %v9859_v49 = vsel %vm7190_vm0, 4294967295, %v9858_v49  ;;  %9863 = vst [vmem:[#allocation63_spill] sm:$0xff] %v7206_v35  ;;  %vm1421_vm6 = vcmp.gt.f32.partialorder %v1394_v63, 0.0  ;;  %v1434_v5 = vmul.f32 0.2, %v1394_v63  ;;  %v9868_v29 = vcombine.low %v9866_v12, %v9867_v45  ;;  %v9942_v35 = vld [vmem:[#allocation16_spill] sm:$0xff] }
 0x14a   :  { %9860 = vst [vmem:[#allocation26_spill] sm:$0xff] %v9859_v49  ;;  %v9869_v59 = vmov 0  ;;  %v801_v34 = vadd.f32 %v7021_v31, %v6903_v24  ;;  %vm9873_vm11 = vsmask.f32 7424  ;;  %v7229_v22 = vor.u32 %v2486_v53, %v2485_v3  ;;  %v1398_v3 = vpop.f32.mrb[48].mxu1  ;;  %v10046_v49 = vld [vmem:[#allocation17_spill] sm:$0xff] }
 0x14b   :  { %vm7216_vm3 = vcmp.ne.s16.totalorder %v9868_v29, 0  ;;  %v2145_v1 = vsel %vm9873_vm11, %v2140_v14, %v2144_v62  ;;  %vm1213_vm2 = vcmp.gt.f32.partialorder %v1168_v38, 0.0  ;;  %v4761_v29 = vpop.f32.mrb[43].mxu0  ;;  %v1447_v12 = vsel %vm1421_vm6, %v1394_v63, %v1434_v5  ;;  %v9876_v63 = vld [vmem:[#allocation70_spill] sm:$0xff] }
 0x14c   :  { %v9870_v59 = vsel %vm7216_vm3, 4294967295, %v9869_v59  ;;  %v2261_v45 = vsel %vm7131_vm9, %v2145_v1, 0  ;;  %vm9874_vm14 = vcmp.gt.f32.partialorder %v7097_v11, 0.0  ;;  %v1226_v47 = vmul.f32 0.2, %v1168_v38  ;;  %v7269_v1 = vpop.f32.mrb[44].mxu0 }
 0x14d   :  { %9871 = vst [vmem:[#allocation44_spill] sm:$0xff] %v9870_v59  ;;  %v1238_v24 = vsel %vm9874_vm14, %v7097_v11, %v1225_v61  ;;  %v7236_v36 = vpack.c.bf16 %v1447_v12, %v1446_v13  ;;  %v9875_v14 = vsel %vm6854_vm13, %v6950_v10, 0  ;;  %2817 = vrot.lane.b32.xlu0 %v2261_v45, %s5011_s11  ;;  %v9877_v53 = vrot.slane %v6735_v32, 5  ;;  %v4972_v10 = vld [vmem:[%s9197_s3 + $0x1c0] sm:$0xff]   ;;  %v4798_v13 = vpop.f32.mrb[49].mxu1  ;;  %v9887_v32 = vld [vmem:[#allocation33_spill] sm:$0xff] }
 0x14e   :  { %2761 = vrot.lane.b32.xlu1 %v9875_v14, %s5011_s11  ;;  %vm9878_vm11 = vsmask.f32 4352  ;;  %v1399_v8 = vadd.f32 %v7021_v31, %v1398_v3  ;;  %vm818_vm6 = vcmp.gt.f32.partialorder %v801_v34, 0.0  ;;  %v831_v5 = vmul.f32 0.2, %v801_v34  ;;  %v1401_v12 = vpop.f32.mrb[50].mxu1  ;;  %4612 = vmatprep.subr.bf16.mxu1 %v4972_v10 }
 0x14f   :  { %v7251_v11 = vsel %vm7116_vm1, %v9877_v53, 0  ;;  %v7256_v61 = vsel %vm9878_vm11, %v7141_v41, %v7229_v22  ;;  %v1239_v29 = vsel %vm1213_vm2, %v1168_v38, %v1226_v47  ;;  %v2150_v60 = vshll.u32 %v7236_v36, 16  ;;  %v4799_v3 = vpop.f32.mrb[51].mxu1 }
 0x150   :  { %9879 = vst [vmem:[#allocation35_spill] sm:$0xff] %v7256_v61  ;;  %v2154_v45 = vshrl.u32 %v7236_v36, 16  ;;  %v9369_v14 = vrot.slane %v7236_v36, 4  ;;  %v7266_v41 = vpack.c.bf16 %v1239_v29, %v1238_v24  ;;  %vm1422_vm1 = vcmp.gt.f32.partialorder %v1399_v8, 0.0  ;;  %v9884_v29 = vld [vmem:[#allocation27_spill] sm:$0xff]  ;;  %v9888_v61 = vld [vmem:[#allocation34_spill] sm:$0xff] }
 0x151   :  { %v1435_v53 = vmul.f32 0.2, %v1399_v8  ;;  %v1402_v33 = vadd.f32 %v7021_v31, %v1401_v12  ;;  %v2148_v13 = vor.u32 %v2146_v17, %v2144_v62  ;;  %v9880_v47 = vsel %vm6868_vm4, %v6548_v42, 0  ;;  %v4764_v12 = vpop.f32.mrb[45].mxu0 }
 0x152   :  { %2796 = vrot.lane.b32.xlu1 %v7075_v51, %s5011_s11  ;;  %2784 = vrot.lane.b32.xlu0 %v9880_v47, %s5011_s11  ;;  %v2152_v38 = vrot.slane %v2150_v60, 1  ;;  %v9881_v24 = vrot.slane %v7149_v2, 4  ;;  %vm9882_vm14 = vcmask 1043456   ;;  %v2489_v17 = vrot.slane %v2154_v45, 3  ;;  %v7289_v47 = vpop.f32.mrb[46].mxu0 }
 0x153   :  { %v2490_v62 = vrot.slane %v2150_v60, 4  ;;  %v1448_v51 = vsel %vm1422_vm1, %v1399_v8, %v1435_v53  ;;  %vm1423_vm11 = vcmp.gt.f32.partialorder %v1402_v33, 0.0  ;;  %v1436_v3 = vmul.f32 0.2, %v1402_v33  ;;  %v9893_v60 = vld [vmem:[#allocation76_spill] sm:$0xff] }
 0x154   :  { %v7283_v10 = vsel %vm9882_vm14, %v9881_v24, %v9369_v14  ;;  %vm9886_vm4 = vsmask.f32 7424  ;;  %v9889_v24 = vcombine.low %v9887_v32, %v9888_v61  ;;  %v9890_v14 = vmov 0 }
 0x155   :  { %9883 = vst [vmem:[#allocation36_spill] sm:$0xff] %v7283_v10  ;;  %v2153_v57 = vsel %vm9886_vm4, %v2148_v13, %v2152_v38  ;;  %v7305_v42 = vor.u32 %v2490_v62, %v2489_v17  ;;  %v9895_v10 = vld [vmem:[#allocation28_spill] sm:$0xff]  ;;  %v4765_v13 = vpop.f32.mrb[47].mxu0  ;;  %v1449_v43 = vsel %vm1423_vm11, %v1402_v33, %v1436_v3  ;;  %v844_v61 = vsel %vm818_vm6, %v801_v34, %v831_v5  ;;  %v9901_v62 = vld [vmem:[#allocation10_spill] sm:$0xff]  ;;  %v1406_v34 = vpop.f32.mrb[52].mxu1  ;;  %v9936_v5 = vld [vmem:[#allocation29_spill] sm:$0xff] }
 0x156   :  { %vm7295_vm14 = vcmp.ne.s16.totalorder %v9889_v24, 0  ;;  %v2262_v32 = vsel %vm7216_vm3, %v2153_v57, 0  ;;  %v9896_v24 = vld [vmem:[#allocation23_spill] sm:$0xff]  ;;  %vm9898_vm2 = vcmp.lt.s32.totalorder %v9864_v55, 42  ;;  %v1173_v17 = vadd.f32 %v7021_v31, %v7099_v46  ;;  %v7378_v18 = vpop.f32.mrb[48].mxu0 }
 0x157   :  { %v9891_v14 = vsel %vm7295_vm14, 4294967295, %v9890_v14  ;;  %vm9897_vm4 = vcmp.lt.s32.totalorder %v9896_v24, 6  ;;  %v7322_v13 = vpack.c.bf16 %v1449_v43, %v1448_v51  ;;  %v9902_v57 = vsel %vm7010_vm5, %v6607_v15, 0  ;;  %2819 = vrot.lane.b32.xlu0 %v2262_v32, %s5011_s11  ;;  %v9905_v43 = vld [vmem:[#allocation24_spill] sm:$0xff]  ;;  %v9910_v51 = vld [vmem:[#allocation11_spill] sm:$0xff]  ;;  %v4802_v32 = vpop.f32.mrb[53].mxu1 }
 0x158   :  { %9892 = vst [vmem:[#allocation30_spill] sm:$0xff] %v9891_v14  ;;  %vm7315_vm13 = vmand %vm9898_vm2, %vm9897_vm4  ;;  %2763 = vrot.lane.b32.xlu1 %v9902_v57, %s5011_s11  ;;  %vm9903_vm6 = vsmask.f32 4352  ;;  %vm9906_vm2 = vcmp.lt.s32.totalorder %v9905_v43, 6  ;;  %vm9907_vm11 = vcmp.lt.s32.totalorder %v9872_v54, 42  ;;  %v1176_v15 = vadd.f32 %v7021_v31, %v7125_v0  ;;  %v1409_v33 = vpop.f32.mrb[54].mxu1 }
 0x159   :  { %v7336_v46 = vsel %vm9903_vm6, %v7229_v22, %v7305_v42  ;;  %vm7342_vm4 = vmand %vm9907_vm11, %vm9906_vm2  ;;  %v1407_v3 = vadd.f32 %v7021_v31, %v1406_v34  ;;  %v2156_v57 = vor.u32 %v2154_v45, %v2152_v38  ;;  %vm1214_vm5 = vcmp.gt.f32.partialorder %v1173_v17, 0.0  ;;  %v4803_v48 = vpop.f32.mrb[55].mxu1  ;;  %v9911_v34 = vld [vmem:[#allocation49_spill] sm:$0xff]  ;;  %v9912_v32 = vld [vmem:[#allocation50_spill] sm:$0xff] }
 0x15a   :  { %9904 = vst [vmem:[#allocation31_spill] sm:$0xff] %v7336_v46  ;;  %v1227_v22 = vmul.f32 0.2, %v1173_v17  ;;  %v2158_v12 = vshll.u32 %v7322_v13, 16  ;;  %v2162_v27 = vshrl.u32 %v7322_v13, 16  ;;  %v2647_v46 = vrot.slane %v7322_v13, 4  ;;  %vm2704_vm6 = vmpackc.low %vm7315_vm13, %vm7315_vm13 }
 0x15b   :  { %vm1424_vm11 = vcmp.gt.f32.partialorder %v1407_v3, 0.0  ;;  %v1437_v0 = vmul.f32 0.2, %v1407_v3  ;;  %v9913_v45 = vcombine.low %v9911_v34, %v9912_v32  ;;  %v1228_v59 = vmul.f32 0.2, %v1176_v15  ;;  %v10057_v14 = vld [vmem:[#allocation18_spill] sm:$0xff] }
 0x15c   :  { %v1240_v33 = vsel %vm1214_vm5, %v1173_v17, %v1227_v22  ;;  %2798 = vrot.lane.b32.xlu1 %v7149_v2, %s5011_s11  ;;  %v9916_v48 = vsel %vm7044_vm10, %v9844_v25, 0  ;;  %v2160_v34 = vrot.slane %v2158_v12, 1  ;;  %v9917_v32 = vrot.slane %v7236_v36, 4  ;;  %v10083_v38 = vld [vmem:[#allocation21_spill] sm:$0xff] }
 0x15d   :  { %vm7359_vm1 = vcmp.ne.s16.totalorder %v9913_v45, 0  ;;  %2786 = vrot.lane.b32.xlu0 %v9916_v48, %s5011_s11  ;;  %vm9918_vm2 = vcmask 1043456   ;;  %v2493_v53 = vrot.slane %v2162_v27, 3  ;;  %v2494_v40 = vrot.slane %v2158_v12, 4  ;;  %v9926_v48 = vld [vmem:[#allocation43_spill] sm:$0xff] }
 0x15e   :  { %v7376_v45 = vsel %vm9918_vm2, %v9917_v32, %v2647_v46  ;;  %v1450_v17 = vsel %vm1424_vm11, %v1407_v3, %v1437_v0  ;;  %v7386_v4 = vsel %vm2704_vm6, 65537, %v9580_v26  ;;  %vm9920_vm10 = vcmp.lt.s32.totalorder %v9864_v55, 42  ;;  %v4768_v3 = vpop.f32.mrb[49].mxu0  ;;  %v9925_v0 = vld [vmem:[#allocation42_spill] sm:$0xff] }
 0x15f   :  { %9919 = vst [vmem:[#allocation70_spill] sm:$0xff] %v7376_v45  ;;  %vm7391_vm2 = vmpackc.low %vm9920_vm10, %vm9920_vm10  ;;  %vm9923_vm9 = vcmp.gt.f32.partialorder %v1176_v15, 0.0  ;;  %v1181_v12 = vadd.f32 %v7021_v31, %v7194_v19  ;;  %v7398_v22 = vpack.c.bf16 %v1450_v17, %v1450_v17  ;;  %vm9924_vm11 = vsmask.f32 7424  ;;  %v9934_v17 = vld [vmem:[#allocation14_spill] sm:$0xff] }
 0x160   :  { %v1241_v2 = vsel %vm9923_vm9, %v1176_v15, %v1228_v59  ;;  %v2161_v8 = vsel %vm9924_vm11, %v2156_v57, %v2160_v34  ;;  %v9927_v32 = vcombine.low %v9925_v0, %v9926_v48  ;;  %v9928_v45 = vmov 0  ;;  %vm9930_vm9 = vmpackc.low %vm7342_vm4, %vm7342_vm4  ;;  %v7423_v57 = vpop.f32.mrb[50].mxu0 }
 0x161   :  { %v7414_v59 = vsel %vm9930_vm9, 65537, %v9580_v26  ;;  %v2495_v19 = vor.u32 %v2494_v40, %v2493_v53  ;;  %vm9931_vm6 = vcmp.lt.s32.totalorder %v9872_v54, 42  ;;  %v2263_v3 = vsel %vm7295_vm14, %v2161_v8, 0 }
 0x162   :  { %vm7404_vm13 = vcmp.ne.s16.totalorder %v9927_v32, 0  ;;  %vm7419_vm10 = vmpackc.low %vm9931_vm6, %vm9931_vm6  ;;  %v7428_v0 = vpack.c.bf16 %v844_v61, %v844_v61  ;;  %vm9937_vm4 = vcmp.lt.s32.totalorder %v9936_v5, 6  ;;  %vm9938_vm9 = vcmp.lt.s32.totalorder %v9884_v29, 42  ;;  %v4769_v32 = vpop.f32.mrb[51].mxu0  ;;  %2821 = vrot.lane.b32.xlu0 %v2263_v3, %s5011_s11 }
 0x163   :  { %v9929_v45 = vsel %vm7404_vm13, 4294967295, %v9928_v45  ;;  %vm7434_vm3 = vmand %vm9938_vm9, %vm9937_vm4  ;;  %v7438_v53 = vpack.c.bf16 %v1241_v2, %v1240_v33  ;;  %v1229_v48 = vmul.f32 0.2, %v1181_v12  ;;  %v9943_v61 = vsel %vm7052_vm15, %v6742_v16, 0 }
 0x164   :  { %9935 = vst [vmem:[#allocation27_spill] sm:$0xff] %v7428_v0  ;;  %2765 = vrot.lane.b32.xlu1 %v9943_v61, %s5011_s11  ;;  %v2166_v8 = vshll.u32 %v7398_v22, 16  ;;  %v2170_v54 = vshrl.u32 %v7398_v22, 16  ;;  %v9946_v33 = vcombine.low %v9944_v37, %v9945_v44  ;;  %v9947_v2 = vmov 0  ;;  %v9952_v61 = vld [vmem:[#allocation55_spill] sm:$0xff] }
 0x165   :  { %9941 = vst [vmem:[#allocation74_spill] sm:$0xff] %v7438_v53  ;;  %vm9950_vm9 = vsmask.f32 4352  ;;  %v2649_v16 = vrot.slane %v7398_v22, 4  ;;  %v9954_v3 = vcombine.low %v9952_v61, %v9953_v56  ;;  %v9957_v53 = vld [vmem:[#allocation59_spill] sm:$0xff]  ;;  %v9960_v37 = vmov 0 }
 0x166   :  { %vm7452_vm4 = vcmp.ne.s16.totalorder %v9946_v33, 0  ;;  %v7458_v32 = vsel %vm9950_vm9, %v7305_v42, %v2495_v19  ;;  %v9959_v44 = vcombine.low %v9957_v53, %v9958_v50  ;;  %v7478_v42 = vsel %vm7391_vm2, 65537, %v9580_v26  ;;  %v9963_v33 = vld [vmem:[#allocation32_spill] sm:$0xff] }
 0x167   :  { %v9948_v2 = vsel %vm7452_vm4, 4294967295, %v9947_v2  ;;  %9951 = vst [vmem:[#allocation34_spill] sm:$0xff] %v7458_v32  ;;  %vm7464_vm6 = vcmp.ne.s16.totalorder %v9954_v3, 0  ;;  %v7483_v56 = vsel %vm7419_vm10, 65537, %v9580_v26  ;;  %vm9964_vm9 = vcmp.lt.s32.totalorder %v9963_v33, 6 }
 0x168   :  { %9949 = vst [vmem:[#allocation33_spill] sm:$0xff] %v9948_v2  ;;  %vm7471_vm11 = vcmp.ne.s16.totalorder %v9959_v44, 0  ;;  %vm9965_vm5 = vcmp.lt.s32.totalorder %v9895_v10, 42  ;;  %v1184_v53 = vadd.f32 %v7021_v31, %v7223_v23  ;;  %v2164_v25 = vor.u32 %v2162_v27, %v2160_v34  ;;  %v9971_v27 = vld [vmem:[#allocation8_spill] sm:$0xff]  ;;  %2800 = vrot.lane.b32.xlu1 %v7236_v36, %s5011_s11 }
 0x169   :  { %v9961_v37 = vsel %vm7471_vm11, 4294967295, %v9960_v37  ;;  %vm7489_vm15 = vmand %vm9965_vm5, %vm9964_vm9  ;;  %v2168_v61 = vrot.slane %v2166_v8, 1  ;;  %v2497_v3 = vrot.slane %v2170_v54, 3  ;;  %vm9968_vm2 = vcmask 1043456   ;;  %v4973_v23 = vld [vmem:[%s9197_s3 + $0x108] sm:$0xff]  }
 0x16a   :  { %9962 = vst [vmem:[#allocation76_spill] sm:$0xff] %v9961_v37  ;;  %v7496_v44 = vsel %vm9968_vm2, %v2647_v46, %v2649_v16  ;;  %v2498_v10 = vrot.slane %v2166_v8, 4  ;;  %vm9970_vm9 = vcmp.ge.s32.totalorder %v9901_v62, 1  ;;  %vm9972_vm8 = vcmp.ge.s32.totalorder %v9971_v27, 7  ;;  %v7514_v46 = vpop.f32.mrb[52].mxu0  ;;  %v9977_v16 = vld [vmem:[#allocation48_spill] sm:$0xff] }
 0x16b   :  { %9969 = vst [vmem:[#allocation23_spill] sm:$0xff] %v7496_v44  ;;  %vm7510_vm7 = vmand %vm9972_vm8, %vm9970_vm9  ;;  %v9975_v34 = vsel %vm7109_vm12, %v9876_v63, 0  ;;  %vm9976_vm2 = vsmask.f32 7424  ;;  %v9978_v15 = vcombine.low %v9977_v16, %v9977_v16  ;;  %v9979_v32 = vmov 0 }
 0x16c   :  { %2788 = vrot.lane.b32.xlu0 %v9975_v34, %s5011_s11  ;;  %v2169_v8 = vsel %vm9976_vm2, %v2164_v25, %v2168_v61  ;;  %vm9982_vm9 = vcmp.gt.f32.partialorder %v1181_v12, 0.0  ;;  %v1230_v36 = vmul.f32 0.2, %v1184_v53  ;;  %vm9983_vm10 = vcmp.ge.s32.totalorder %v9910_v51, 1  ;;  %v4772_v25 = vpop.f32.mrb[53].mxu0 }
 0x16d   :  { %vm7527_vm8 = vcmp.ne.s16.totalorder %v9978_v15, 0  ;;  %v1242_v6 = vsel %vm9982_vm9, %v1181_v12, %v1229_v48  ;;  %vm9985_vm5 = vcmp.ge.s32.totalorder %v9984_v39, 7  ;;  %v2499_v15 = vor.u32 %v2498_v10, %v2497_v3  ;;  %v1207_v34 = vpop.f32.mrb[54].mxu0  ;;  %v9989_v3 = vld [vmem:[#allocation19_spill] sm:$0xff] }
 0x16e   :  { %v9980_v32 = vsel %vm7527_vm8, 4294967295, %v9979_v32  ;;  %vm7537_vm12 = vmand %vm9985_vm5, %vm9983_vm10  ;;  %v9396_v12 = vshrl.u32 %v7093_v21, 16  ;;  %v9397_v48 = vshll.u32 %v7093_v21, 16  ;;  %vm9988_vm10 = vcmp.gt.f32.partialorder %v1184_v53, 0.0  ;;  %v4773_v10 = vpop.f32.mrb[55].mxu0 }
 0x16f   :  { %9981 = vst [vmem:[#allocation10_spill] sm:$0xff] %v9980_v32  ;;  %v1243_v25 = vsel %vm9988_vm10, %v1184_v53, %v1230_v36  ;;  %v1189_v44 = vadd.f32 %v7021_v31, %v7269_v1  ;;  %v1192_v61 = vadd.f32 %v7021_v31, %v7289_v47  ;;  %v2264_v34 = vsel %vm7404_vm13, %v2169_v8, 0  ;;  %v9992_v47 = vld [vmem:[#allocation20_spill] sm:$0xff]  ;;  %vm9998_vm5 = vmpackc.low %vm7434_vm3, %vm7434_vm3  ;;  %v2779_v32 = vpop.permute.xlu0 %2778 }
 0x170   :  { %vm9990_vm9 = vsmask.f32 4352  ;;  %v7565_v53 = vpack.c.bf16 %v1243_v25, %v1242_v6  ;;  %v7569_v1 = vrot.slane %v9396_v12, 7  ;;  %v9993_v8 = vsel %vm7190_vm0, %v9893_v60, 0  ;;  %2823 = vrot.lane.b32.xlu0 %v2264_v34, %s5011_s11 }
 0x171   :  { %v7563_v16 = vsel %vm9990_vm9, %v2495_v19, %v2499_v15  ;;  %2767 = vrot.lane.b32.xlu1 %v9993_v8, %s5011_s11  ;;  %vm9994_vm9 = vsmask.f32 256  ;;  %vm9995_vm2 = vcmask 1040384   ;;  %v9996_v6 = vmov 0 }
 0x172   :  { %9991 = vst [vmem:[#allocation24_spill] sm:$0xff] %v7563_v16  ;;  %vm7583_vm14 = vmand %vm9995_vm2, %vm9994_vm9  ;;  %v7593_v19 = vsel %vm9998_vm5, 65537, %v9580_v26  ;;  %vm1218_vm10 = vcmp.gt.f32.partialorder %v1189_v44, 0.0  ;;  %v1231_v36 = vmul.f32 0.2, %v1189_v44  ;;  %vm1219_vm0 = vcmp.gt.f32.partialorder %v1192_v61, 0.0 }
 0x173   :  { %v9997_v6 = vsel %vm7583_vm14, 4294967295, %v9996_v6  ;;  %v2179_v60 = vsel %vm7583_vm14, %v2170_v54, 0  ;;  %vm9999_vm2 = vmpackc.low %vm7489_vm15, %vm7489_vm15  ;;  %v7608_v40 = vor.u32 %v9397_v48, %v7569_v1  ;;  %v1232_v25 = vmul.f32 0.2, %v1192_v61  ;;  %v10014_v48 = vld [vmem:[#allocation13_spill] sm:$0xff] }
 0x174   :  { %v7603_v15 = vsel %vm9999_vm2, 65537, %v9580_v26  ;;  %vm10001_vm3 = vcmp.ge.s32.totalorder %v9901_v62, 1  ;;  %v1244_v54 = vsel %vm1218_vm10, %v1189_v44, %v1231_v36  ;;  %vm10004_vm15 = vmpackc.low %vm7510_vm7, %vm7510_vm7  ;;  %v1197_v8 = vadd.f32 %v7021_v31, %v7378_v18  ;;  %v10009_v44 = vld [vmem:[#allocation12_spill] sm:$0xff]  ;;  %2790 = vrot.lane.b32.xlu0 %v7251_v11, %s5011_s11 }
 0x175   :  { %10000 = vst [vmem:[#allocation11_spill] sm:$0xff] %v7608_v40  ;;  %vm7613_vm5 = vmpackc.low %vm10001_vm3, %vm10001_vm3  ;;  %v7623_v50 = vsel %vm10004_vm15, 65537, %v9580_v26  ;;  %vm10008_vm10 = vcmp.ge.s32.totalorder %v9934_v17, 1  ;;  %vm10010_vm2 = vcmp.ge.s32.totalorder %v10009_v44, 7  ;;  %v1245_v12 = vsel %vm1219_vm0, %v1192_v61, %v1232_v25  ;;  %2802 = vrot.lane.b32.xlu1 %v7322_v13, %s5011_s11  ;;  %v10021_v61 = vld [vmem:[#allocation58_spill] sm:$0xff]  ;;  %v10022_v18 = vld [vmem:[#allocation64_spill] sm:$0xff] }
 0x176   :  { %10005 = vst [vmem:[#allocation49_spill] sm:$0xff] %v7623_v50  ;;  %vm10006_vm9 = vmpackc.low %vm7537_vm12, %vm7537_vm12  ;;  %vm10013_vm7 = vcmp.ge.s32.totalorder %v9942_v35, 1  ;;  %vm10015_vm12 = vcmp.ge.s32.totalorder %v10014_v48, 7  ;;  %v7671_v63 = vpack.c.bf16 %v1245_v12, %v1244_v54  ;;  %vm10018_vm0 = vcmp.ge.s32.totalorder %v9910_v51, 1 }
 0x177   :  { %v7631_v34 = vsel %vm10006_vm9, 65537, %v9580_v26  ;;  %vm7639_vm3 = vmand %vm10010_vm2, %vm10008_vm10  ;;  %v2265_v11 = vsel %vm7527_vm8, %v2179_v60, 0  ;;  %v1233_v12 = vmul.f32 0.2, %v1197_v8  ;;  %v2072_v60 = vsel %vm7613_vm5, 65537, %v9580_v26 }
 0x178   :  { %10007 = vst [vmem:[#allocation50_spill] sm:$0xff] %v7631_v34  ;;  %vm7655_vm15 = vmand %vm10015_vm12, %vm10013_vm7  ;;  %v10023_v25 = vcombine.low %v6646_v58, %v10022_v18  ;;  %v10026_v34 = vshrl.u32 %v10021_v61, 16  ;;  %v10027_v54 = vshll.u32 %v10021_v61, 16  ;;  %v10028_v10 = vshrl.u32 %v7266_v41, 16  ;;  %2825 = vrot.lane.b32.xlu0 %v2265_v11, %s5011_s11  ;;  %v10034_v11 = vld [vmem:[#allocation62_spill] sm:$0xff] }
 0x179   :  { %vm7676_vm9 = vmpackc.low %vm10018_vm0, %vm10018_vm0  ;;  %vm10029_vm5 = vnez %v9853_v9  ;;  %vm10031_vm7 = vcmp.lt.s32.totalorder %v9884_v29, 42  ;;  %v1468_v13 = vrot.slane %v10021_v61, 4  ;;  %vm10045_vm8 = vcmp.ge.s32.totalorder %v9989_v3, 1 }
 0x17a   :  { %vm1556_vm2 = vmpackc.low %vm7639_vm3, %vm7639_vm3  ;;  %vm7700_vm10 = vcmp.ne.s16.totalorder %v10023_v25, 0  ;;  %v1781_v50 = vrot.slane %v10026_v34, 4  ;;  %v1784_v40 = vrot.slane %v10027_v54, 5  ;;  %v7710_v0 = vrot.slane %v10028_v10, 7  ;;  %v10036_v10 = vld [vmem:[#allocation54_spill] sm:$0xff] }
 0x17b   :  { %vm1557_vm0 = vmpackc.low %vm7655_vm15, %vm7655_vm15  ;;  %v2073_v16 = vsel %vm7676_vm9, 65537, %v9580_v26  ;;  %v10030_v58 = vsel %vm10029_vm5, %v9885_v20, 0  ;;  %v1200_v25 = vadd.f32 %v7021_v31, %v7423_v57  ;;  %v1569_v20 = vsel %vm1556_vm2, 65537, %v9580_v26 }
 0x17c   :  { %2769 = vrot.lane.b32.xlu1 %v10030_v58, %s5011_s11  ;;  %vm7724_vm12 = vmpackc.low %vm10031_vm7, %vm10031_vm7  ;;  %v4301_v18 = vcombine.low %v2072_v60, %v2073_v16  ;;  %vm10035_vm9 = vcmask 523264   ;;  %v10037_v16 = vshll.u32 %v7266_v41, 16  ;;  %v1570_v57 = vsel %vm1557_vm0, 65537, %v9580_v26 }
 0x17d   :  { %v2933_v54 = vsel %vm10035_vm9, %v10034_v11, %v2779_v32  ;;  %vm10038_vm7 = vcmp.ge.s32.totalorder %v9934_v17, 1  ;;  %vm10041_vm2 = vcmp.gt.f32.partialorder %v1197_v8, 0.0  ;;  %v10042_v11 = vmov 0 }
 0x17e   :  { %v1983_v60 = vor.u32 %v10037_v16, %v7710_v0  ;;  %vm7752_vm3 = vmpackc.low %vm10038_vm7, %vm10038_vm7  ;;  %3530 = vmatprep.mubr.bf16.mxu0 %v2933_v54  ;;  %v1246_v32 = vsel %vm10041_vm2, %v1197_v8, %v1233_v12  ;;  %vm7757_vm9 = vcmp.ne.s16.totalorder %v4301_v18, 0  ;;  %vm1221_vm5 = vcmp.gt.f32.partialorder %v1200_v25, 0.0  ;;  %v10055_v54 = vld [vmem:[#allocation66_spill] sm:$0xff] }
 0x17f   :  { %v10043_v11 = vsel %vm7757_vm9, 4294967295, %v10042_v11  ;;  %v1234_v16 = vmul.f32 0.2, %v1200_v25  ;;  %vm10047_vm15 = vcmp.ge.s32.totalorder %v10046_v49, 7  ;;  %vm10050_vm7 = vsmask.f32 256 }
 0x180   :  { %10044 = vst [vmem:[#allocation42_spill] sm:$0xff] %v10043_v11  ;;  %vm7765_vm0 = vmand %vm10047_vm15, %vm10045_vm8  ;;  %v7771_v9 = vsel %vm10050_vm7, %v7569_v1, %v1983_v60  ;;  %v10052_v8 = vrot.slane %v10036_v10, 4  ;;  %vm10053_vm2 = vcmask 1043456   ;;  %v4281_v18 = vcombine.low %v1569_v20, %v1570_v57  ;;  %v4970_v1 = vld [vmem:[%s9197_s3 + $0x100] sm:$0xff]   ;;  %v2758_v60 = vpop.permute.xlu0 %2757  ;;  %2804 = vrot.lane.b32.xlu1 %v7398_v22, %s5011_s11  ;;  %v10061_v20 = vld [vmem:[#allocation80_spill] sm:$0xff] }
 0x181   :  { %10051 = vst [vmem:[#allocation43_spill] sm:$0xff] %v7771_v9  ;;  %vm10056_vm14 = vcmp.ge.s32.totalorder %v9992_v47, 1  ;;  %vm10058_vm13 = vcmp.ge.s32.totalorder %v10057_v14, 7  ;;  %vm10062_vm7 = vnez %v10061_v20  ;;  %v10063_v57 = vld [vmem:[#allocation86_spill] sm:$0xff]  ;;  %v7798_v61 = vor.u32 %v1784_v40, %v1781_v50  ;;  %v10067_v22 = vld [vmem:[#allocation77_spill] sm:$0xff]  ;;  %v10111_v49 = vld [vmem:[#allocation79_spill] sm:$0xff] }
 0x182   :  { %v7776_v12 = vsel %vm10053_vm2, %v10052_v8, %v1468_v13  ;;  %vm7783_vm8 = vmand %vm10058_vm13, %vm10056_vm14  ;;  %v10064_v8 = vsel %vm10062_vm7, %v10063_v57, 0  ;;  %v1247_v14 = vsel %vm1221_vm5, %v1200_v25, %v1234_v16  ;;  %v9418_v48 = vshll.u32 %v10055_v54, 16  ;;  %v10069_v20 = vld [vmem:[#allocation85_spill] sm:$0xff]  ;;  %v10118_v11 = vld [vmem:[#allocation68_spill] sm:$0xff] }
 0x183   :  { %10054 = vst [vmem:[#allocation14_spill] sm:$0xff] %v7776_v12  ;;  %2849 = vrot.lane.b32.xlu0 %v10064_v8, %s5011_s11  ;;  %10065 = vst [vmem:[#allocation29_spill] sm:$0xff] %v7798_v61  ;;  %vm10066_vm14 = vcmp.ge.s32.totalorder %v9942_v35, 1  ;;  %vm10068_vm15 = vnez %v10067_v22  ;;  %vm10071_vm7 = vcmask 523264   ;;  %v7813_v50 = vpack.c.bf16 %v1247_v14, %v1246_v32  ;;  %v4971_v22 = vld [vmem:[%s9197_s3 + $0x148] sm:$0xff]   ;;  %v4979_v9 = vld [vmem:[%s9197_s3 + $0x158] sm:$0xff]  }
 0x184   :  { %vm2062_vm13 = vmpackc.low %vm10066_vm14, %vm10066_vm14  ;;  %v10070_v57 = vsel %vm10068_vm15, %v10069_v20, 0  ;;  %vm7815_vm11 = vcmp.ne.s16.totalorder %v4281_v18, 0  ;;  %v10072_v8 = vmov 0  ;;  %v10075_v25 = vshrl.u32 %v10055_v54, 16  ;;  %v10076_v18 = vld [vmem:[#allocation74_spill] sm:$0xff]  ;;  %v10080_v20 = vld [vmem:[#allocation40_spill] sm:$0xff] }
 0x185   :  { %v2905_v40 = vsel %vm10071_vm7, %v10070_v57, %v2758_v60  ;;  %v10073_v8 = vsel %vm7815_vm11, 4294967295, %v10072_v8  ;;  %vm1558_vm5 = vmpackc.low %vm7765_vm0, %vm7765_vm0  ;;  %v1793_v32 = vrot.slane %v9418_v48, 5  ;;  %v9420_v60 = vshrl.u32 %v10076_v18, 16  ;;  %v2781_v48 = vpop.permute.xlu0 %2780  ;;  %2828 = vrot.lane.b32.xlu1 %v10080_v20, %s5011_s11 }
 0x186   :  { %10074 = vst [vmem:[#allocation16_spill] sm:$0xff] %v10073_v8  ;;  %v1790_v16 = vrot.slane %v10075_v25, 4  ;;  %3531 = vmatmul.mubr.bf16.vlgmr.msra.gmra.mrb[56].mxu0 %v2905_v40  ;;  %v2074_v57 = vsel %vm7752_vm3, 65537, %v9580_v26  ;;  %v2075_v40 = vsel %vm2062_vm13, 65537, %v9580_v26  ;;  %v1205_v25 = vadd.f32 %v7021_v31, %v7514_v46  ;;  %v10097_v8 = vld [vmem:[#allocation22_spill] sm:$0xff] }
 0x187   :  { %4555 = vmatpush3.bf16.msra.mxu0 %v4970_v1  ;;  %vm10077_vm14 = vcmp.ge.s32.totalorder %v9989_v3, 1  ;;  %v10081_v31 = vsel %vm7359_vm1, %v7057_v52, 0  ;;  %v7865_v1 = vrot.slane %v9420_v60, 7  ;;  %v4302_v14 = vcombine.low %v2074_v57, %v2075_v40  ;;  %v10090_v57 = vld [vmem:[#allocation38_spill] sm:$0xff] }
 0x188   :  { %vm7847_vm7 = vmpackc.low %vm10077_vm14, %vm10077_vm14  ;;  %2890 = vrot.lane.b32.xlu0 %v10081_v31, %s5011_s11  ;;  %v7861_v46 = vor.u32 %v1793_v32, %v1790_v16  ;;  %v1571_v20 = vsel %vm1558_vm5, 65537, %v9580_v26  ;;  %vm10082_vm3 = vcmp.ge.s32.totalorder %v9896_v24, 1  ;;  %vm10084_vm13 = vcmp.ge.s32.totalorder %v10083_v38, 7  ;;  %v10087_v16 = vld [vmem:[#allocation37_spill] sm:$0xff]  ;;  %v10088_v32 = vld [vmem:[#allocation72_spill] sm:$0xff]  ;;  %4556 = vmatprep.subr.bf16.mxu0 %v4971_v22 }
 0x189   :  { %vm7877_vm1 = vmand %vm10084_vm13, %vm10082_vm3  ;;  %vm10089_vm2 = vnez %v10088_v32  ;;  %vm10092_vm15 = vcmask 523264   ;;  %vm1222_vm11 = vcmp.gt.f32.partialorder %v1205_v25, 0.0  ;;  %v1235_v58 = vmul.f32 0.2, %v1205_v25  ;;  %v10101_v32 = vld [vmem:[#allocation63_spill] sm:$0xff] }
 0x18a   :  { %v10091_v40 = vsel %vm10089_vm2, %v10090_v57, 0  ;;  %v10093_v60 = vrot.slane %v10055_v54, 4  ;;  %vm10094_vm0 = vcmask 1043456   ;;  %vm10096_vm5 = vcmp.ge.s32.totalorder %v9905_v43, 1 }
 0x18b   :  { %v2937_v31 = vsel %vm10092_vm15, %v10091_v40, %v2781_v48  ;;  %vm10098_vm3 = vcmp.ge.s32.totalorder %v10097_v8, 7  ;;  %v4975_v48 = vld [vmem:[%s9197_s3 + $0x150] sm:$0xff]   ;;  %vm10102_vm2 = vsmask.f32 3328  ;;  %v10104_v22 = vshll.u32 %v10076_v18, 16  ;;  %vm10105_vm15 = vmpackc.low %vm7783_vm8, %vm7783_vm8  ;;  %4557 = vmatpush3.bf16.msra.mxu0 %v4973_v23  ;;  %v10117_v23 = vld [vmem:[#allocation67_spill] sm:$0xff] }
 0x18c   :  { %v7890_v12 = vsel %vm10094_vm0, %v1468_v13, %v10093_v60  ;;  %vm7896_vm13 = vmand %vm10098_vm3, %vm10096_vm5  ;;  %3538 = vmatprep.mubr.bf16.mxu0 %v2937_v31  ;;  %v7909_v13 = vsel %vm10102_vm2, %v7798_v61, %v7861_v46  ;;  %v1572_v40 = vsel %vm10105_vm15, 65537, %v9580_v26  ;;  %vm10106_vm0 = vcmp.ge.s32.totalorder %v9992_v47, 1  ;;  %v4977_v61 = vld [vmem:[%s9197_s3 + $0x110] sm:$0xff]   ;;  %4558 = vmatprep.subr.bf16.mxu0 %v4975_v48 }
 0x18d   :  { %10095 = vst [vmem:[#allocation51_spill] sm:$0xff] %v7890_v12  ;;  %10103 = vst [vmem:[#allocation53_spill] sm:$0xff] %v7909_v13  ;;  %v1991_v60 = vor.u32 %v10104_v22, %v7865_v1  ;;  %v7930_v57 = vsel %vm7724_vm12, 65537, %v9580_v26  ;;  %vm7932_vm3 = vcmp.ne.s16.totalorder %v4302_v14, 0  ;;  %v4282_v13 = vcombine.low %v1571_v20, %v1572_v40  ;;  %v10113_v14 = vld [vmem:[#allocation15_spill] sm:$0xff]  ;;  %v10115_v20 = vld [vmem:[#allocation46_spill] sm:$0xff] }
 0x18e   :  { %vm7923_vm5 = vmpackc.low %vm10106_vm0, %vm10106_vm0  ;;  %v10112_v34 = vsel %vm7452_vm4, %v7082_v28, 0  ;;  %vm10114_vm12 = vnez %v10113_v14  ;;  %v10119_v8 = vcombine.low %v10117_v23, %v10118_v11  ;;  %v10120_v38 = vmov 0  ;;  %v4981_v11 = vld [vmem:[%s9197_s3 + $0x118] sm:$0xff]  }
 0x18f   :  { %vm1560_vm8 = vmpackc.low %vm7877_vm1, %vm7877_vm1  ;;  %2870 = vrot.lane.b32.xlu1 %v10112_v34, %s5011_s11  ;;  %v10116_v40 = vsel %vm10114_vm12, %v10115_v20, 0  ;;  %vm10123_vm15 = vsmask.f32 256  ;;  %v1248_v28 = vsel %vm1222_vm11, %v1205_v25, %v1235_v58  ;;  %v9428_v34 = vshll.u32 %v10111_v49, 16  ;;  %4559 = vmatpush3.bf16.msra.mxu0 %v4977_v61  ;;  %v10138_v12 = vld [vmem:[#allocation82_spill] sm:$0xff] }
 0x190   :  { %2851 = vrot.lane.b32.xlu0 %v10116_v40, %s5011_s11  ;;  %vm7956_vm2 = vcmp.ne.s16.totalorder %v10119_v8, 0  ;;  %v7962_v47 = vsel %vm10123_vm15, %v7710_v0, %v1991_v60  ;;  %v9429_v14 = vshrl.u32 %v7565_v53, 16  ;;  %vm1561_vm0 = vmpackc.low %vm7896_vm13, %vm7896_vm13  ;;  %vm7973_vm12 = vcmp.ne.s16.totalorder %v4282_v13, 0  ;;  %4560 = vmatprep.subr.bf16.mxu0 %v4979_v9  ;;  %v10155_v9 = vld [vmem:[#allocation69_spill] sm:$0xff] }
 0x191   :  { %v10121_v38 = vsel %vm7956_vm2, 4294967295, %v10120_v38  ;;  %10124 = vst [vmem:[#allocation56_spill] sm:$0xff] %v7962_v47  ;;  %v10125_v8 = vmov 0  ;;  %v10128_v0 = vshrl.u32 %v10111_v49, 16  ;;  %v9434_v25 = vshll.u32 %v7565_v53, 16  ;;  %v10140_v47 = vld [vmem:[#allocation28_spill] sm:$0xff] }
 0x192   :  { %10122 = vst [vmem:[#allocation55_spill] sm:$0xff] %v10121_v38  ;;  %v10126_v8 = vsel %vm7973_vm12, 4294967295, %v10125_v8  ;;  %v1802_v13 = vrot.slane %v9428_v34, 5  ;;  %v7990_v20 = vrot.slane %v9429_v14, 7  ;;  %v2076_v40 = vsel %vm7847_vm7, 65537, %v9580_v26  ;;  %v10136_v34 = vld [vmem:[#allocation45_spill] sm:$0xff] }
 0x193   :  { %10127 = vst [vmem:[#allocation59_spill] sm:$0xff] %v10126_v8  ;;  %v1799_v60 = vrot.slane %v10128_v0, 4  ;;  %vm10129_vm11 = vcmp.ge.s32.totalorder %v9896_v24, 1  ;;  %v2077_v23 = vsel %vm7923_vm5, 65537, %v9580_v26  ;;  %v1472_v0 = vrot.slane %v10111_v49, 4  ;;  %2830 = vrot.lane.b32.xlu1 %v10136_v34, %s5011_s11  ;;  %4561 = vmatpush3.bf16.msra.mxu0 %v4981_v11  ;;  %v10187_v38 = vld [vmem:[#allocation52_spill] sm:$0xff] }
 0x194   :  { %vm7998_vm13 = vmpackc.low %vm10129_vm11, %vm10129_vm11  ;;  %v1573_v10 = vsel %vm1560_vm8, 65537, %v9580_v26  ;;  %v1574_v58 = vsel %vm1561_vm0, 65537, %v9580_v26  ;;  %vm10132_vm7 = vcmp.ge.s32.totalorder %v9936_v5, 1  ;;  %vm10133_vm5 = vcmp.ge.s32.totalorder %v9884_v29, 7  ;;  %v4993_v11 = vld [vmem:[%s9197_s3 + $0x130] sm:$0xff]  }
 0x195   :  { %vm8020_vm15 = vmand %vm10133_vm5, %vm10132_vm7  ;;  %v10137_v61 = vsel %vm7464_vm6, %v7104_v7, 0  ;;  %v1803_v52 = vor.u32 %v1802_v13, %v1799_v60  ;;  %v1999_v14 = vor.u32 %v9434_v25, %v7990_v20  ;;  %v4303_v2 = vcombine.low %v2076_v40, %v2077_v23  ;;  %v10156_v40 = vld [vmem:[#allocation71_spill] sm:$0xff] }
 0x196   :  { %2892 = vrot.lane.b32.xlu0 %v10137_v61, %s5011_s11  ;;  %v9435_v8 = vshrl.u32 %v10138_v12, 16  ;;  %vm10139_vm1 = vcmp.ge.s32.totalorder %v9963_v33, 1  ;;  %vm10141_vm8 = vcmp.ge.s32.totalorder %v10140_v47, 7  ;;  %v10144_v55 = vrot.slane %v10055_v54, 4  ;;  %v4983_v61 = vld [vmem:[%s9197_s3 + $0x160] sm:$0xff]   ;;  %v4987_v23 = vld [vmem:[%s9197_s3 + $0x168] sm:$0xff]  }
 0x197   :  { %vm8039_vm0 = vmand %vm10141_vm8, %vm10139_vm1  ;;  %vm10145_vm6 = vcmask 1043456   ;;  %v4283_v60 = vcombine.low %v1573_v10, %v1574_v58  ;;  %vm10146_vm11 = vcmp.ge.s32.totalorder %v9905_v43, 1  ;;  %vm10149_vm5 = vsmask.f32 3328  ;;  %4562 = vmatprep.subr.bf16.mxu0 %v4983_v61  ;;  %v4989_v61 = vld [vmem:[%s9197_s3 + $0x128] sm:$0xff]  }
 0x198   :  { %v8046_v7 = vsel %vm10145_vm6, %v10144_v55, %v1472_v0  ;;  %vm8053_vm7 = vmpackc.low %vm10146_vm11, %vm10146_vm11  ;;  %v8062_v55 = vsel %vm10149_vm5, %v7861_v46, %v1803_v52  ;;  %vm10151_vm1 = vsmask.f32 256  ;;  %vm8068_vm8 = vcmp.ne.s16.totalorder %v4303_v2, 0 }
 0x199   :  { %10150 = vst [vmem:[#allocation61_spill] sm:$0xff] %v8062_v55  ;;  %v8066_v58 = vsel %vm10151_vm1, %v7865_v1, %v1999_v14  ;;  %v10153_v10 = vmov 0  ;;  %v1808_v25 = vrot.slane %v9435_v8, 4  ;;  %v10157_v13 = vcombine.low %v10155_v9, %v10156_v40  ;;  %v10167_v40 = vld [vmem:[#allocation78_spill] sm:$0xff] }
 0x19a   :  { %10152 = vst [vmem:[#allocation32_spill] sm:$0xff] %v8066_v58  ;;  %v10154_v10 = vsel %vm8068_vm8, 4294967295, %v10153_v10  ;;  %v8084_v1 = vpack.c.bf16 %v1248_v28, %v1248_v28  ;;  %vm8089_vm5 = vcmp.ne.s16.totalorder %v4283_v60, 0  ;;  %v10160_v14 = vmov 0  ;;  %v4985_v28 = vld [vmem:[%s9197_s3 + $0x120] sm:$0xff]  }
 0x19b   :  { %vm8080_vm11 = vcmp.ne.s16.totalorder %v10157_v13, 0  ;;  %v10161_v14 = vsel %vm8089_vm5, 4294967295, %v10160_v14  ;;  %v10162_v8 = vshll.u32 %v10138_v12, 16  ;;  %vm10163_vm6 = vnez %v9961_v37  ;;  %v10165_v13 = vld [vmem:[#allocation39_spill] sm:$0xff]  ;;  %4563 = vmatpush3.bf16.msra.mxu0 %v4985_v28 }
 0x19c   :  { %v10164_v60 = vsel %vm10163_vm6, %v7162_v30, 0  ;;  %vm10166_vm14 = vnez %v10165_v13  ;;  %v10169_v9 = vshrl.u32 %v7671_v63, 16  ;;  %v9440_v58 = vshll.u32 %v7671_v63, 16  ;;  %v10184_v37 = vld [vmem:[#allocation35_spill] sm:$0xff]  ;;  %4564 = vmatprep.subr.bf16.mxu0 %v4987_v23 }
 0x19d   :  { %v1811_v55 = vrot.slane %v10162_v8, 5  ;;  %2872 = vrot.lane.b32.xlu1 %v10164_v60, %s5011_s11  ;;  %v10168_v8 = vsel %vm10166_vm14, %v10167_v40, 0  ;;  %v2078_v30 = vsel %vm7998_vm13, 65537, %v9580_v26  ;;  %vm10170_vm1 = vcmp.ge.s32.totalorder %v10087_v16, 1  ;;  %v10171_v60 = vld [vmem:[#allocation41_spill] sm:$0xff]  ;;  %vm10176_vm13 = vmpackc.low %vm8020_vm15, %vm8020_vm15 }
 0x19e   :  { %2853 = vrot.lane.b32.xlu0 %v10168_v8, %s5011_s11  ;;  %v2004_v2 = vrot.slane %v10169_v9, 7  ;;  %vm10172_vm6 = vnez %v10171_v60  ;;  %v2079_v8 = vsel %vm8053_vm7, 65537, %v9580_v26  ;;  %v1474_v9 = vrot.slane %v10138_v12, 4  ;;  %vm10180_vm15 = vmpackc.low %vm8039_vm0, %vm8039_vm0 }
 0x19f   :  { %vm8124_vm4 = vmand %vm10172_vm6, %vm10170_vm1  ;;  %v8128_v40 = vor.u32 %v1811_v55, %v1808_v25  ;;  %v1575_v48 = vsel %vm10176_vm13, 65537, %v9580_v26  ;;  %vm10177_vm6 = vcmp.ge.s32.totalorder %v9936_v5, 1  ;;  %v4304_v60 = vcombine.low %v2078_v30, %v2079_v8  ;;  %4565 = vmatpush3.bf16.msra.mxu0 %v4989_v61  ;;  %v10216_v61 = vld [vmem:[#allocation44_spill] sm:$0xff] }
 0x1a0   :  { %vm8143_vm1 = vmpackc.low %vm10177_vm6, %vm10177_vm6  ;;  %v2007_v55 = vor.u32 %v9440_v58, %v2004_v2  ;;  %v1576_v31 = vsel %vm10180_vm15, 65537, %v9580_v26  ;;  %vm10181_vm7 = vcmp.ge.s32.totalorder %v9963_v33, 1  ;;  %v2585_v30 = vsel %vm7956_vm2, %v10184_v37, 0 }
 0x1a1   :  { %10175 = vst [vmem:[#allocation8_spill] sm:$0xff] %v8128_v40  ;;  %vm8162_vm13 = vmpackc.low %vm10181_vm7, %vm10181_vm7  ;;  %vm10185_vm6 = vsmask.f32 3328  ;;  %vm10186_vm14 = vcmask 1043456   ;;  %v4284_v58 = vcombine.low %v1575_v48, %v1576_v31  ;;  %2832 = vrot.lane.b32.xlu1 %v10187_v38, %s5011_s11  ;;  %v10188_v37 = vsel %vm7700_vm10, %v10101_v32, 0 }
 0x1a2   :  { %v8171_v8 = vsel %vm10185_vm6, %v1803_v52, %v8128_v40  ;;  %v8174_v34 = vsel %vm10186_vm14, %v1472_v0, %v1474_v9  ;;  %2894 = vrot.lane.b32.xlu0 %v10188_v37, %s5011_s11  ;;  %v10189_v0 = vld [vmem:[#allocation73_spill] sm:$0xff]  ;;  %v10190_v52 = vld [vmem:[#allocation83_spill] sm:$0xff]  ;;  %v10192_v48 = vmov 0  ;;  %v10195_v31 = vshll.u32 %v7093_v21, 16 }
 0x1a3   :  { %v10191_v28 = vcombine.low %v10189_v0, %v10190_v52  ;;  %vm10196_vm15 = vsmask.f32 256  ;;  %vm8204_vm7 = vcmp.ne.s16.totalorder %v4304_v60, 0  ;;  %v10197_v36 = vmov 0 }
 0x1a4   :  { %v8198_v40 = vrot.slane %v10195_v31, 4  ;;  %v8202_v38 = vsel %vm10196_vm15, %v7990_v20, %v2007_v55  ;;  %v10198_v36 = vsel %vm8204_vm7, 4294967295, %v10197_v36  ;;  %v10199_v32 = vshrl.u32 %v7813_v50, 16  ;;  %v4995_v55 = vld [vmem:[%s9197_s3 + $0x178] sm:$0xff]  }
 0x1a5   :  { %vm8192_vm14 = vcmp.ne.s16.totalorder %v10191_v28, 0  ;;  %vm10200_vm10 = vcmp.ge.s32.totalorder %v10087_v16, 1  ;;  %v10203_v52 = vcombine.low %v7386_v4, %v7414_v59  ;;  %vm10206_vm15 = vcmp.lt.s32.totalorder %v10140_v47, 42  ;;  %v4991_v28 = vld [vmem:[%s9197_s3 + $0x170] sm:$0xff]   ;;  %2874 = vrot.lane.b32.xlu1 %v2585_v30, %s5011_s11 }
 0x1a6   :  { %v10193_v48 = vsel %vm8192_vm14, 4294967295, %v10192_v48  ;;  %v2012_v37 = vrot.slane %v10199_v32, 7  ;;  %vm8213_vm6 = vmpackc.low %vm10200_vm10, %vm10200_vm10  ;;  %vm8234_vm10 = vcmp.ne.s16.totalorder %v4284_v58, 0  ;;  %v10209_v60 = vmov 0  ;;  %4566 = vmatprep.subr.bf16.mxu0 %v4991_v28 }
 0x1a7   :  { %10194 = vst [vmem:[#allocation48_spill] sm:$0xff] %v10193_v48  ;;  %vm8220_vm12 = vcmp.ne.s16.totalorder %v10203_v52, 0  ;;  %vm8227_vm0 = vmpackc.low %vm10206_vm15, %vm10206_vm15  ;;  %v10210_v60 = vsel %vm8234_vm10, 4294967295, %v10209_v60  ;;  %v9443_v4 = vshll.u32 %v7813_v50, 16  ;;  %v2080_v59 = vsel %vm8143_vm1, 65537, %v9580_v26  ;;  %4567 = vmatpush3.bf16.msra.mxu0 %v4993_v11 }
 0x1a8   :  { %v2081_v58 = vsel %vm8162_vm13, 65537, %v9580_v26  ;;  %vm10211_vm15 = vmpackc.low %vm8124_vm4, %vm8124_vm4  ;;  %v9457_v23 = vshll.u32 %v8084_v1, 16  ;;  %v2082_v31 = vsel %vm8213_vm6, 65537, %v9580_v26  ;;  %vm10212_vm1 = vcmp.ge.s32.totalorder %v9901_v62, 1  ;;  %v10220_v62 = vld [vmem:[#allocation87_spill] sm:$0xff]  ;;  %4568 = vmatprep.subr.bf16.mxu0 %v4995_v55 }
 0x1a9   :  { %v1577_v25 = vsel %vm10211_vm15, 65537, %v9580_v26  ;;  %v2015_v32 = vor.u32 %v9443_v4, %v2012_v37  ;;  %v4305_v52 = vcombine.low %v2080_v59, %v2081_v58  ;;  %vm10213_vm4 = vcmp.lt.s32.totalorder %v9971_v27, 42  ;;  %v10218_v59 = vld [vmem:[#allocation81_spill] sm:$0xff] }
 0x1aa   :  { %v4285_v16 = vcombine.low %v1577_v25, %v1577_v25  ;;  %vm8270_vm13 = vmand %vm10213_vm4, %vm10212_vm1  ;;  %vm10217_vm15 = vnez %v10216_v61  ;;  %v8283_v0 = vsel %vm8227_vm0, 65537, %v9580_v26  ;;  %v2324_v25 = vshrl.u32 %v10220_v62, 16 }
 0x1ab   :  { %v10219_v58 = vsel %vm10217_vm15, %v10218_v59, 0  ;;  %vm10221_vm6 = vsmask.f32 256  ;;  %v4306_v4 = vcombine.low %v2082_v31, %v2082_v31  ;;  %vm8294_vm4 = vcmp.ne.s16.totalorder %v4305_v52, 0  ;;  %vm10268_vm7 = vmpackc.low %vm8270_vm13, %vm8270_vm13 }
 0x1ac   :  { %2855 = vrot.lane.b32.xlu0 %v10219_v58, %s5011_s11  ;;  %v8289_v27 = vsel %vm10221_vm6, %v2012_v37, %v9457_v23  ;;  %vm10223_vm1 = vmmov %vm10221_vm6  ;;  %v10224_v61 = vmov 0  ;;  %vm1604_vm15 = vcmp.ne.s16.totalorder %v4285_v16, 0  ;;  %v10226_v59 = vshrl.u32 %v7093_v21, 16  ;;  %v10231_v37 = vld [vmem:[#allocation36_spill] sm:$0xff]  ;;  %v10279_v23 = vld [vmem:[#allocation23_spill] sm:$0xff] }
 0x1ad   :  { %10222 = vst [vmem:[#allocation9_spill] sm:$0xff] %v8289_v27  ;;  %v8292_v30 = vsel %vm10223_vm1, %v2004_v2, %v2015_v32  ;;  %v10225_v61 = vsel %vm8294_vm4, 4294967295, %v10224_v61  ;;  %vm10227_vm0 = vcmp.ge.s32.totalorder %v9910_v51, 1  ;;  %vm10228_vm6 = vcmp.lt.s32.totalorder %v9984_v39, 42  ;;  %v4997_v39 = vld [vmem:[%s9197_s3 + $0x138] sm:$0xff]  }
 0x1ae   :  { %v2589_v58 = vrot.slane %v10226_v59, 3  ;;  %vm8307_vm2 = vmand %vm10228_vm6, %vm10227_vm0  ;;  %v2747_v16 = vsel %vm8080_vm11, %v10231_v37, 0  ;;  %v8317_v31 = vsel %vm1604_vm15, %v1474_v9, 0  ;;  %vm8319_vm1 = vcmp.ne.s16.totalorder %v4306_v4, 0  ;;  %v10241_v37 = vld [vmem:[#allocation57_spill] sm:$0xff]  ;;  %4569 = vmatpush3.bf16.msra.mxu0 %v4997_v39  ;;  %v10274_v39 = vld [vmem:[#allocation30_spill] sm:$0xff] }
 0x1af   :  { %10232 = vst [vmem:[#allocation19_spill] sm:$0xff] %v8317_v31  ;;  %v10233_v32 = vmov 0  ;;  %v10235_v9 = vshrl.u32 %v7266_v41, 16  ;;  %v10236_v52 = vshll.u32 %v7266_v41, 16  ;;  %vm10237_vm11 = vcmp.ge.s32.totalorder %v9934_v17, 1  ;;  %2834 = vrot.lane.b32.xlu1 %v10241_v37, %s5011_s11  ;;  %v10257_v51 = vld [vmem:[#allocation13_spill] sm:$0xff] }
 0x1b0   :  { %v10234_v32 = vsel %vm8319_vm1, 4294967295, %v10233_v32  ;;  %v2591_v46 = vor.u32 %v8198_v40, %v2589_v58  ;;  %vm10238_vm15 = vcmp.lt.s32.totalorder %v10009_v44, 42  ;;  %2896 = vrot.lane.b32.xlu0 %v2747_v16, %s5011_s11  ;;  %v10242_v40 = vcombine.low %v7478_v42, %v7483_v56 }
 0x1b1   :  { %v2592_v4 = vrot.slane %v10235_v9, 3  ;;  %v2593_v59 = vrot.slane %v10236_v52, 4  ;;  %vm8341_vm6 = vmand %vm10238_vm15, %vm10237_vm11  ;;  %v10243_v58 = vmov 0  ;;  %v10246_v9 = vld [vmem:[#allocation90_spill] sm:$0xff]  ;;  %vm10248_vm15 = vsmask.f32 5376 }
 0x1b2   :  { %vm8351_vm0 = vcmp.ne.s16.totalorder %v10242_v40, 0  ;;  %vm10249_vm5 = vcmask 1045504   ;;  %v10250_v44 = vmov 0  ;;  %v2349_v16 = vrot.slane %v7093_v21, 3 }
 0x1b3   :  { %v10244_v58 = vsel %vm8351_vm0, 4294967295, %v10243_v58  ;;  %vm8360_vm9 = vmand %vm10249_vm5, %vm10248_vm15  ;;  %v10252_v42 = vcombine.low %v7593_v19, %v7603_v15  ;;  %vm10255_vm11 = vnez %v9997_v6  ;;  %v2594_v37 = vor.u32 %v2593_v59, %v2592_v4 }
 0x1b4   :  { %10245 = vst [vmem:[#allocation12_spill] sm:$0xff] %v10244_v58  ;;  %v10251_v44 = vsel %vm8360_vm9, 4294967295, %v10250_v44  ;;  %v8377_v52 = vsel %vm10255_vm11, %v2324_v25, 0  ;;  %v2350_v40 = vrot.slane %v7266_v41, 3  ;;  %vm10256_vm5 = vcmp.ge.s32.totalorder %v9942_v35, 1  ;;  %v10263_v35 = vld [vmem:[#allocation31_spill] sm:$0xff] }
 0x1b5   :  { %vm8371_vm4 = vcmp.ne.s16.totalorder %v10252_v42, 0  ;;  %vm10258_vm15 = vcmp.lt.s32.totalorder %v10257_v51, 42  ;;  %v4325_v19 = vcombine.low %v7930_v57, %v8283_v0  ;;  %v10261_v15 = vshrl.u32 %v10076_v18, 16 }
 0x1b6   :  { %vm8384_vm1 = vmand %vm10258_vm15, %vm10256_vm5  ;;  %v10262_v25 = vshll.u32 %v10076_v18, 16  ;;  %v2352_v4 = vrot.slane %v10076_v18, 3  ;;  %v2586_v51 = vsel %vm8192_vm14, %v10263_v35, 0  ;;  %vm10264_vm5 = vsmask.f32 4352  ;;  %v10278_v35 = vld [vmem:[#allocation70_spill] sm:$0xff] }
 0x1b7   :  { %v2596_v42 = vrot.slane %v10261_v15, 3  ;;  %v8402_v59 = vsel %vm10264_vm5, %v2591_v46, %v2594_v37  ;;  %vm10266_vm15 = vcmask 1044480   ;;  %v2433_v0 = vsel %vm10268_vm7, 65537, %v9580_v26  ;;  %v10270_v15 = vld [vmem:[#allocation17_spill] sm:$0xff]  ;;  %2876 = vrot.lane.b32.xlu1 %v2586_v51, %s5011_s11  ;;  %v10276_v46 = vld [vmem:[#allocation84_spill] sm:$0xff] }
 0x1b8   :  { %v2597_v55 = vrot.slane %v10262_v25, 4  ;;  %10265 = vst [vmem:[#allocation64_spill] sm:$0xff] %v8402_v59  ;;  %v8405_v57 = vsel %vm10266_vm15, %v2349_v16, %v2350_v40  ;;  %vm10269_vm11 = vcmp.ge.s32.totalorder %v9989_v3, 1  ;;  %vm10271_vm8 = vcmp.lt.s32.totalorder %v10270_v15, 42  ;;  %vm10280_vm7 = vmmov %vm10266_vm15  ;;  %v10281_v15 = vld [vmem:[#allocation10_spill] sm:$0xff]  ;;  %v10283_v51 = vld [vmem:[#allocation20_spill] sm:$0xff] }
 0x1b9   :  { %10267 = vst [vmem:[#allocation62_spill] sm:$0xff] %v8405_v57  ;;  %vm8417_vm10 = vmand %vm10271_vm8, %vm10269_vm11  ;;  %vm10275_vm5 = vnez %v10274_v39  ;;  %v2748_v13 = vsel %vm8220_vm12, %v10278_v35, 0  ;;  %v8432_v3 = vsel %vm10280_vm7, %v10279_v23, 0  ;;  %vm10282_vm8 = vnez %v10281_v15  ;;  %v10285_v57 = vld [vmem:[#allocation18_spill] sm:$0xff] }
 0x1ba   :  { %v10277_v16 = vsel %vm10275_vm5, %v10276_v46, 0  ;;  %v2598_v48 = vor.u32 %v2597_v55, %v2596_v42  ;;  %vm10284_vm13 = vcmp.ge.s32.totalorder %v10283_v51, 1  ;;  %vm10286_vm11 = vcmp.lt.s32.totalorder %v10285_v57, 42  ;;  %vm10289_vm5 = vmmov %vm10280_vm7  ;;  %v10291_v46 = vld [vmem:[#allocation58_spill] sm:$0xff] }
 0x1bb   :  { %2857 = vrot.lane.b32.xlu0 %v10277_v16, %s5011_s11  ;;  %vm8441_vm15 = vmand %vm10286_vm11, %vm10284_vm13  ;;  %v8446_v20 = vsel %vm10289_vm5, %v2350_v40, %v2352_v4  ;;  %v10292_v42 = vshrl.u32 %v10291_v46, 16  ;;  %v10293_v16 = vshrl.u32 %v7565_v53, 16  ;;  %v10294_v35 = vld [vmem:[#allocation34_spill] sm:$0xff]  ;;  %vm10295_vm13 = vsmask.f32 4352 }
 0x1bc   :  { %vm10290_vm12 = vmpackc.low %vm8307_vm2, %vm8307_vm2  ;;  %v2587_v40 = vsel %vm8351_vm0, %v10294_v35, 0  ;;  %v8465_v51 = vsel %vm10295_vm13, %v2594_v37, %v2598_v48  ;;  %v10296_v17 = vshll.u32 %v7565_v53, 16  ;;  %v10299_v35 = vshll.u32 %v10291_v46, 16 }
 0x1bd   :  { %v2434_v23 = vsel %vm10290_vm12, 65537, %v9580_v26  ;;  %v2271_v55 = vrot.slane %v10292_v42, 7  ;;  %v2600_v57 = vrot.slane %v10293_v16, 3  ;;  %vm2424_vm7 = vmpackc.low %vm8384_vm1, %vm8384_vm1  ;;  %v2749_v42 = vsel %vm8371_vm4, %v8432_v3, 0  ;;  %v10297_v16 = vld [vmem:[#allocation54_spill] sm:$0xff] }
 0x1be   :  { %v4315_v2 = vcombine.low %v2433_v0, %v2434_v23  ;;  %v2601_v59 = vrot.slane %v10296_v17, 4  ;;  %v10298_v27 = vshrl.u32 %v10297_v16, 16  ;;  %v2354_v0 = vrot.slane %v7565_v53, 3  ;;  %v10300_v17 = vld [vmem:[#allocation60_spill] sm:$0xff]  ;;  %vm10305_vm12 = vmpackc.low %vm8341_vm6, %vm8341_vm6 }
 0x1bf   :  { %v2272_v37 = vor.u32 %v2271_v55, %v10299_v35  ;;  %2836 = vrot.lane.b32.xlu1 %v10300_v17, %s5011_s11  ;;  %2898 = vrot.lane.b32.xlu0 %v2748_v13, %s5011_s11  ;;  %vm8488_vm5 = vcmp.ne.s16.totalorder %v4325_v19, 0  ;;  %v10301_v56 = vmov 0  ;;  %v2435_v23 = vsel %vm10305_vm12, 65537, %v9580_v26  ;;  %v10307_v13 = vld [vmem:[#allocation21_spill] sm:$0xff] }
 0x1c0   :  { %v8477_v31 = vrot.slane %v10298_v27, 7  ;;  %v10302_v56 = vsel %vm8488_vm5, 4294967295, %v10301_v56  ;;  %vm8492_vm4 = vcmp.ne.s16.totalorder %v4315_v2, 0  ;;  %v2602_v3 = vor.u32 %v2601_v59, %v2600_v57 }
 0x1c1   :  { %v2436_v19 = vsel %vm2424_vm7, 65537, %v9580_v26  ;;  %vm10306_vm13 = vcmp.ge.s32.totalorder %v9896_v24, 1  ;;  %vm10308_vm11 = vcmp.lt.s32.totalorder %v10307_v13, 42  ;;  %vm10311_vm6 = vsmask.f32 256  ;;  %v10314_v24 = vld [vmem:[#allocation22_spill] sm:$0xff] }
 0x1c2   :  { %vm8512_vm2 = vmand %vm10308_vm11, %vm10306_vm13  ;;  %v8521_v57 = vsel %vm10311_vm6, %v8477_v31, %v2272_v37  ;;  %vm10312_vm12 = vcmask 1044480   ;;  %v4316_v2 = vcombine.low %v2435_v23, %v2436_v19  ;;  %vm10313_vm1 = vcmp.ge.s32.totalorder %v9905_v43, 1  ;;  %v10321_v43 = vld [vmem:[#allocation24_spill] sm:$0xff] }
 0x1c3   :  { %v8524_v28 = vsel %vm10312_vm12, %v2352_v4, %v2354_v0  ;;  %vm10315_vm7 = vcmp.lt.s32.totalorder %v10314_v24, 42  ;;  %vm10318_vm13 = vsmask.f32 4352  ;;  %v10319_v37 = vshrl.u32 %v10055_v54, 16  ;;  %2878 = vrot.lane.b32.xlu1 %v2587_v40, %s5011_s11  ;;  %vm10351_vm0 = vmpackc.low %vm8512_vm2, %vm8512_vm2 }
 0x1c4   :  { %vm8530_vm11 = vmand %vm10315_vm7, %vm10313_vm1  ;;  %v8538_v13 = vsel %vm10318_vm13, %v2598_v48, %v2602_v3  ;;  %v10320_v23 = vshrl.u32 %v7671_v63, 16  ;;  %v2510_v24 = vsel %vm8360_vm9, %v10321_v43, 0  ;;  %vm8547_vm6 = vcmp.ne.s16.totalorder %v4316_v2, 0 }
 0x1c5   :  { %v2274_v4 = vrot.slane %v10319_v37, 7  ;;  %v10324_v58 = vshll.u32 %v7671_v63, 16  ;;  %v2356_v48 = vrot.slane %v7671_v63, 3  ;;  %vm10325_vm1 = vnez %v9929_v45  ;;  %vm10328_vm7 = vmpackc.low %vm8417_vm10, %vm8417_vm10 }
 0x1c6   :  { %v2604_v19 = vrot.slane %v10320_v23, 3  ;;  %v10326_v37 = vsel %vm10325_vm1, %v10246_v9, 0  ;;  %v2437_v40 = vsel %vm10328_vm7, 65537, %v9580_v26  ;;  %vm10329_vm13 = vmpackc.low %vm8441_vm15, %vm8441_vm15  ;;  %v10330_v25 = vshrl.u32 %v10111_v49, 16 }
 0x1c7   :  { %v2605_v17 = vrot.slane %v10324_v58, 4  ;;  %2859 = vrot.lane.b32.xlu0 %v10326_v37, %s5011_s11  ;;  %v10327_v58 = vshll.u32 %v10055_v54, 16  ;;  %v2438_v45 = vsel %vm10329_vm13, 65537, %v9580_v26  ;;  %v8584_v43 = vsel %vm10312_vm12, %v2354_v0, %v2356_v48 }
 0x1c8   :  { %v4317_v37 = vcombine.low %v2437_v40, %v2438_v45  ;;  %vm10331_vm10 = vcmp.ge.s32.totalorder %v9936_v5, 1  ;;  %vm10332_vm7 = vcmp.lt.s32.totalorder %v9884_v29, 42  ;;  %vm10335_vm15 = vsmask.f32 256 }
 0x1c9   :  { %v2275_v23 = vor.u32 %v2274_v4, %v10327_v58  ;;  %v2606_v9 = vor.u32 %v2605_v17, %v2604_v19  ;;  %v2277_v58 = vrot.slane %v10330_v25, 7  ;;  %vm8592_vm9 = vmand %vm10332_vm7, %vm10331_vm10  ;;  %v10336_v17 = vshrl.u32 %v7813_v50, 16 }
 0x1ca   :  { %v10337_v0 = vshll.u32 %v7813_v50, 16  ;;  %v2358_v45 = vrot.slane %v7813_v50, 3  ;;  %vm10338_vm12 = vcmp.ge.s32.totalorder %v9963_v33, 1  ;;  %vm10339_vm13 = vcmp.lt.s32.totalorder %v10140_v47, 42  ;;  %v10347_v47 = vld [vmem:[#allocation65_spill] sm:$0xff] }
 0x1cb   :  { %v8597_v2 = vsel %vm10335_vm15, %v2271_v55, %v2275_v23  ;;  %v2608_v19 = vrot.slane %v10336_v17, 3  ;;  %vm8608_vm1 = vmand %vm10339_vm13, %vm10338_vm12  ;;  %vm10342_vm10 = vnez %v10154_v10  ;;  %vm10343_vm7 = vsmask.f32 4352  ;;  %2838 = vrot.lane.b32.xlu1 %v10347_v47, %s5011_s11  ;;  %2900 = vrot.lane.b32.xlu0 %v2749_v42, %s5011_s11 }
 0x1cc   :  { %v2609_v40 = vrot.slane %v10337_v0, 4  ;;  %v8616_v55 = vsel %vm10343_vm7, %v2602_v3, %v2606_v9  ;;  %vm8618_vm15 = vcmp.ne.s16.totalorder %v4317_v37, 0  ;;  %v10344_v23 = vmov 0  ;;  %vm2429_vm13 = vmpackc.low %vm8592_vm9, %vm8592_vm9 }
 0x1cd   :  { %v10345_v23 = vsel %vm8618_vm15, 4294967295, %v10344_v23  ;;  %v10346_v25 = vshll.u32 %v10111_v49, 16  ;;  %v10348_v17 = vshll.u32 %v8084_v1, 16  ;;  %vm10349_vm12 = vcmask 1044480   ;;  %vm2430_vm9 = vmpackc.low %vm8608_vm1, %vm8608_vm1 }
 0x1ce   :  { %v2610_v5 = vor.u32 %v2609_v40, %v2608_v19  ;;  %v8633_v37 = vsel %vm10349_vm12, %v2356_v48, %v2358_v45  ;;  %vm10350_vm7 = vsmask.f32 256  ;;  %v2439_v42 = vsel %vm10351_vm0, 65537, %v9580_v26  ;;  %vm10352_vm12 = vmpackc.low %vm8530_vm11, %vm8530_vm11 }
 0x1cf   :  { %v2278_v33 = vor.u32 %v2277_v58, %v10346_v25  ;;  %v2615_v0 = vrot.slane %v10348_v17, 4  ;;  %v2440_v48 = vsel %vm10352_vm12, 65537, %v9580_v26  ;;  %v10353_v39 = vshrl.u32 %v10138_v12, 16 }
 0x1d0   :  { %vm10355_vm2 = vsmask.f32 4352  ;;  %v4318_v40 = vcombine.low %v2439_v42, %v2440_v48  ;;  %v2588_v35 = vsel %vm8488_vm5, %v2510_v24, 0  ;;  %v10356_v47 = vshll.u32 %v10138_v12, 16 }
 0x1d1   :  { %v8639_v25 = vsel %vm10350_vm7, %v2274_v4, %v2278_v33  ;;  %v2280_v19 = vrot.slane %v10353_v39, 7  ;;  %vm10354_vm7 = vnez %v10198_v36  ;;  %v8662_v4 = vsel %vm10355_vm2, %v2606_v9, %v2610_v5  ;;  %2880 = vrot.lane.b32.xlu1 %v2588_v35, %s5011_s11  ;;  %v10390_v35 = vld [vmem:[#allocation50_spill] sm:$0xff] }
 0x1d2   :  { %v2612_v33 = vshrl.u32 %v8084_v1, 16  ;;  %v2360_v29 = vrot.slane %v8084_v1, 3  ;;  %v2441_v39 = vsel %vm2429_vm13, 65537, %v9580_v26  ;;  %v10357_v9 = vsel %vm10282_vm8, %v8377_v52, 0 }
 0x1d3   :  { %v2281_v17 = vor.u32 %v2280_v19, %v10356_v47  ;;  %2861 = vrot.lane.b32.xlu0 %v10357_v9, %s5011_s11  ;;  %vm8677_vm0 = vcmp.ne.s16.totalorder %v4318_v40, 0  ;;  %v10358_v42 = vmov 0  ;;  %v2442_v48 = vsel %vm2430_vm9, 65537, %v9580_v26  ;;  %v10360_v47 = vld [vmem:[#allocation27_spill] sm:$0xff] }
 0x1d4   :  { %v10359_v42 = vsel %vm8677_vm0, 4294967295, %v10358_v42  ;;  %v2614_v24 = vrot.slane %v2612_v33, 3  ;;  %v10361_v59 = vshll.u32 %v10360_v47, 16  ;;  %vm10362_vm11 = vsmask.f32 256  ;;  %v10389_v33 = vld [vmem:[#allocation49_spill] sm:$0xff] }
 0x1d5   :  { %vm10364_vm1 = vmmov %vm10362_vm11  ;;  %vm10365_vm8 = vcmask 1044480   ;;  %v4319_v40 = vcombine.low %v2441_v39, %v2442_v48  ;;  %vm10366_vm13 = vnez %v10225_v61  ;;  %vm10367_vm12 = vcmask 1045504   ;;  %2840 = vrot.lane.b32.xlu1 %v10220_v62, %s5011_s11 }
 0x1d6   :  { %v8685_v3 = vsel %vm10362_vm11, %v2280_v19, %v10361_v59  ;;  %v8691_v15 = vsel %vm10364_vm1, %v2277_v58, %v2281_v17  ;;  %v2361_v52 = vsel %vm10365_vm8, %v2358_v45, %v2360_v29  ;;  %v2616_v9 = vor.u32 %v2615_v0, %v2614_v24  ;;  %v10374_v0 = vld [vmem:[#allocation5_spill] sm:$0xff]  ;;  %v10376_v17 = vld [vmem:[#allocation7_spill] sm:$0xff]  ;;  %v2814_v24 = vpop.permute.xlu1 %2813 }
 0x1d7   :  { %10363 = vst [vmem:[#allocation66_spill] sm:$0xff] %v8685_v3  ;;  %v8698_v47 = vsel %vm10367_vm12, %v2361_v52, 0  ;;  %vm10369_vm9 = vnez %v10234_v32  ;;  %vm8703_vm2 = vcmp.ne.s16.totalorder %v4319_v40, 0  ;;  %v10370_v59 = vmov 0  ;;  %2882 = vrot.lane.b32.xlu0 %v9580_v26, %s5011_s11  ;;  %v4974_v52 = vld [vmem:[%s9197_s3 + $0x180] sm:$0xff]  }
 0x1d8   :  { %10368 = vst [vmem:[#allocation80_spill] sm:$0xff] %v8698_v47  ;;  %v10371_v59 = vsel %vm8703_vm2, 4294967295, %v10370_v59  ;;  %vm10373_vm11 = vsmask.f32 4352  ;;  %vm10375_vm1 = vcmp.ge.s32.totalorder %v10374_v0, 1  ;;  %vm10377_vm12 = vcmp.ge.s32.totalorder %v10376_v17, 1  ;;  %v2816_v47 = vpop.permute.xlu0 %2815 }
 0x1d9   :  { %10372 = vst [vmem:[#allocation86_spill] sm:$0xff] %v10371_v59  ;;  %v8712_v58 = vsel %vm10373_vm11, %v2610_v5, %v2616_v9  ;;  %vm2057_vm8 = vmpackc.low %vm10375_vm1, %vm10375_vm1  ;;  %vm10378_vm11 = vcmask 523264   ;;  %vm10381_vm1 = vnez %v9997_v6  ;;  %v10382_v9 = vld [vmem:[#allocation11_spill] sm:$0xff]  ;;  %v10391_v3 = vcombine.low %v10389_v33, %v10390_v35  ;;  %v9016_v32 = vld [vmem:[%s9199_s4] ss:$0 sm:$0xff] }
 0x1da   :  { %vm2058_vm5 = vmpackc.low %vm10377_vm12, %vm10377_vm12  ;;  %v2070_v62 = vsel %vm2057_vm8, 65537, %v9580_v26  ;;  %v2988_v5 = vsel %vm10378_vm11, %v7093_v21, %v2814_v24  ;;  %v2793_v40 = vpop.permute.xlu1 %2792  ;;  %v10383_v19 = vsel %vm10381_vm1, 0, %v10382_v9  ;;  %v4976_v21 = vld [vmem:[%s9197_s3 + $0x1c8] sm:$0xff]   ;;  %vm10388_vm8 = vcmask 1043456  }
 0x1db   :  { %v2071_v29 = vsel %vm2058_vm5, 65537, %v9580_v26  ;;  %3618 = vmatprep.mubr.bf16.mxu1 %v2988_v5  ;;  %vm10384_vm5 = vmmov %vm10378_vm11  ;;  %v10386_v24 = vld [vmem:[#allocation47_spill] sm:$0xff]  ;;  %vm1599_vm12 = vcmp.ne.s16.totalorder %v10391_v3, 0  ;;  %v10393_v3 = vld [vmem:[#allocation29_spill] sm:$0xff]  ;;  %vm10452_vm14 = vcmask 523264   ;;  %v10469_v6 = vshll.u32 %v10297_v16, 16 }
 0x1dc   :  { %v4300_v39 = vcombine.low %v2070_v62, %v2071_v29  ;;  %v10387_v5 = vrot.slane %v10386_v24, 4  ;;  %vm10392_vm11 = vmmov %vm10384_vm5  ;;  %v2991_v35 = vsel %vm10384_vm5, %v7266_v41, %v2816_v47  ;;  %v10394_v33 = vld [vmem:[#allocation91_spill] sm:$0xff]  ;;  %v4984_v41 = vld [vmem:[%s9197_s3 + $0x1d8] sm:$0xff]  }
 0x1de   :  { %vm8727_vm0 = vcmp.ne.s16.totalorder %v4300_v39, 0  ;;  %v10385_v39 = vrot.slane %v10297_v16, 4  ;;  %v2760_v9 = vpop.permute.xlu1 %2759 }
 0x1df   :  { %v2110_v62 = vsel %vm8727_vm0, %v10383_v19, 0  ;;  %v4978_v19 = vld [vmem:[%s9197_s3 + $0x188] sm:$0xff]  }
 0x1e0   :  { %v2961_v29 = vsel %vm10384_vm5, %v2110_v62, %v2793_v40  ;;  %v1467_v45 = vsel %vm10388_vm8, %v10387_v5, %v10385_v39  ;;  %v4980_v40 = vld [vmem:[%s9197_s3 + $0x1d0] sm:$0xff]   ;;  %vm10395_vm8 = vsmask.f32 3328  ;;  %v10396_v39 = vld [vmem:[#allocation75_spill] sm:$0xff] }
 0x1e1   :  { %3619 = vmatmul.mubr.bf16.vlgmr.msra.gmra.mrb[56].mxu1 %v2961_v29  ;;  %v1606_v59 = vsel %vm1599_vm12, %v1467_v45, 0  ;;  %v4982_v45 = vld [vmem:[%s9197_s3 + $0x190] sm:$0xff]   ;;  %v2783_v29 = vpop.permute.xlu0 %2782  ;;  %vm10397_vm12 = vnez %v10396_v39 }
 0x1e2   :  { %4613 = vmatpush3.bf16.msra.mxu1 %v4974_v52  ;;  %v2909_v62 = vsel %vm10392_vm11, %v1606_v59, %v2760_v9  ;;  %v1786_v52 = vsel %vm10395_vm8, %v10394_v33, %v10393_v3  ;;  %3626 = vmatprep.mubr.bf16.mxu1 %v2991_v35  ;;  %vm10398_vm11 = vmmov %vm10384_vm5  ;;  %v10399_v59 = vld [vmem:[#allocation42_spill] sm:$0xff]  ;;  %v10401_v9 = vld [vmem:[#allocation43_spill] sm:$0xff] }
 0x1e3   :  { %4614 = vmatprep.subr.bf16.mxu1 %v4976_v21  ;;  %3539 = vmatmul.mubr.bf16.gmra.mrb[60].mxu0 %v2909_v62  ;;  %v2795_v21 = vpop.permute.xlu1 %2794  ;;  %v1824_v5 = vsel %vm10397_vm12, %v1786_v52, 0  ;;  %vm10400_vm5 = vnez %v10399_v59  ;;  %vm10403_vm8 = vmmov %vm10398_vm11  ;;  %v4986_v35 = vld [vmem:[%s9197_s3 + $0x198] sm:$0xff]   ;;  %v4988_v33 = vld [vmem:[%s9197_s3 + $0x1e0] sm:$0xff]   ;;  %v10479_v59 = vsel %vm8492_vm4, %v8446_v20, 0 }
 0x1e4   :  { %v2941_v47 = vsel %vm10398_vm11, %v1824_v5, %v2783_v29  ;;  %v10404_v52 = vld [vmem:[#allocation16_spill] sm:$0xff]  ;;  %v10406_v29 = vld [vmem:[#allocation14_spill] sm:$0xff]  ;;  %vm10408_vm11 = vmmov %vm10403_vm8 }
 0x1e5   :  { %3546 = vmatprep.mubr.bf16.mxu0 %v2941_v47  ;;  %v2818_v3 = vpop.permute.xlu0 %2817  ;;  %vm10405_vm12 = vnez %v10404_v52  ;;  %v4990_v5 = vld [vmem:[%s9197_s3 + $0x1a0] sm:$0xff]  }
 0x1e6   :  { %4615 = vmatpush3.bf16.msra.mxu1 %v4978_v19  ;;  %v10402_v19 = vsel %vm10400_vm5, %v10401_v9, 0  ;;  %v10407_v39 = vsel %vm10405_vm12, %v10406_v29, 0  ;;  %v10409_v9 = vld [vmem:[#allocation53_spill] sm:$0xff]  ;;  %vm10412_vm12 = vmmov %vm10403_vm8  ;;  %v4994_v29 = vld [vmem:[%s9197_s3 + $0x1a8] sm:$0xff]  }
 0x1e7   :  { %4616 = vmatprep.subr.bf16.mxu1 %v4980_v40  ;;  %v2965_v62 = vsel %vm10403_vm8, %v10402_v19, %v2795_v21  ;;  %v2762_v40 = vpop.permute.xlu1 %2761  ;;  %v10410_v19 = vld [vmem:[#allocation88_spill] sm:$0xff] }
 0x1e8   :  { %v2913_v21 = vsel %vm10408_vm11, %v10407_v39, %v2762_v40  ;;  %vm10411_vm2 = vnez %v10410_v19  ;;  %v4992_v40 = vld [vmem:[%s9197_s3 + $0x1e8] sm:$0xff]   ;;  %vm10415_vm11 = vmmov %vm10403_vm8  ;;  %v4998_v19 = vld [vmem:[%s9197_s3 + $0x1b0] sm:$0xff]  }
 0x1e9   :  { %3627 = vmatmul.mubr.bf16.gmra.mrb[60].mxu1 %v2965_v62  ;;  %v2785_v47 = vpop.permute.xlu0 %2784  ;;  %v1825_v62 = vsel %vm10411_vm2, %v10409_v9, 0 }
 0x1ea   :  { %4617 = vmatpush3.bf16.msra.mxu1 %v4982_v45  ;;  %v2994_v45 = vsel %vm10403_vm8, %v10076_v18, %v2818_v3  ;;  %v2945_v18 = vsel %vm10412_vm12, %v1825_v62, %v2785_v47  ;;  %v10418_v47 = vld [vmem:[#allocation51_spill] sm:$0xff]  ;;  %vm10420_vm12 = vmmov %vm10403_vm8 }
 0x1eb   :  { %4618 = vmatprep.subr.bf16.mxu1 %v4984_v41  ;;  %3547 = vmatmul.mubr.bf16.gmra.mrb[64].mxu0 %v2913_v21  ;;  %v2797_v41 = vpop.permute.xlu1 %2796  ;;  %v4996_v21 = vld [vmem:[%s9197_s3 + $0x1f0] sm:$0xff]  }
 0x1ec   :  { %3634 = vmatprep.mubr.bf16.mxu1 %v2994_v45  ;;  %3554 = vmatprep.mubr.bf16.mxu0 %v2945_v18  ;;  %v10416_v45 = vld [vmem:[#allocation59_spill] sm:$0xff]  ;;  %v10421_v18 = vld [vmem:[#allocation61_spill] sm:$0xff] }
 0x1ed   :  { %v2820_v39 = vpop.permute.xlu0 %2819  ;;  %vm10417_vm2 = vnez %v10416_v45  ;;  %v5000_v45 = vld [vmem:[%s9197_s3 + $0x1b8] sm:$0xff]  }
 0x1ee   :  { %4619 = vmatpush3.bf16.msra.mxu1 %v4986_v35  ;;  %v10413_v35 = vld [vmem:[#allocation56_spill] sm:$0xff]  ;;  %v10419_v9 = vsel %vm10417_vm2, %v10418_v47, 0  ;;  %vm10424_vm2 = vmmov %vm10403_vm8 }
 0x1ef   :  { %4620 = vmatprep.subr.bf16.mxu1 %v4988_v33  ;;  %v10414_v3 = vsel %vm7932_vm3, %v10413_v35, 0  ;;  %v2764_v33 = vpop.permute.xlu1 %2763  ;;  %v10422_v35 = vld [vmem:[#allocation89_spill] sm:$0xff]  ;;  %vm10433_vm15 = vmmov %vm10424_vm2 }
 0x1f0   :  { %v2969_v52 = vsel %vm10415_vm11, %v10414_v3, %v2797_v41  ;;  %v2917_v41 = vsel %vm10403_vm8, %v10419_v9, %v2764_v33  ;;  %vm10423_vm11 = vnez %v10422_v35  ;;  %vm10427_vm8 = vmmov %vm10424_vm2 }
 0x1f1   :  { %3635 = vmatmul.mubr.bf16.gmra.mrb[64].mxu1 %v2969_v52  ;;  %v1826_v3 = vsel %vm10423_vm11, %v10421_v18, 0  ;;  %v4999_v52 = vld [vmem:[%s9197_s3 + $0x1f8] sm:$0xff]   ;;  %vm10430_vm11 = vmmov %vm10424_vm2 }
 0x1f2   :  { %4621 = vmatpush3.bf16.msra.mxu1 %v4990_v5  ;;  %v2997_v5 = vsel %vm10420_vm12, %v7565_v53, %v2820_v39  ;;  %vm10428_vm12 = vnez %v10161_v14 }
 0x1f3   :  { %4622 = vmatprep.subr.bf16.mxu1 %v4992_v40  ;;  %3555 = vmatmul.mubr.bf16.gmra.mrb[68].mxu0 %v2917_v41  ;;  %v2799_v62 = vpop.permute.xlu1 %2798  ;;  %v2787_v40 = vpop.permute.xlu0 %2786  ;;  %v10429_v9 = vsel %vm10428_vm12, %v8046_v7, 0  ;;  %v10434_v7 = vsel %vm10354_vm7, %v8202_v38, 0  ;;  %vm10435_vm12 = vmmov %vm10424_vm2  ;;  %v10440_v38 = vld [vmem:[#allocation4_spill] sm:$0xff] }
 0x1f4   :  { %3642 = vmatprep.mubr.bf16.mxu1 %v2997_v5  ;;  %v2949_v53 = vsel %vm10424_vm2, %v1826_v3, %v2787_v40  ;;  %v10431_v40 = vld [vmem:[#allocation26_spill] sm:$0xff]  ;;  %vm10441_vm7 = vcmp.lt.s32.totalorder %v10440_v38, 42 }
 0x1f5   :  { %3562 = vmatprep.mubr.bf16.mxu0 %v2949_v53 }
 0x1f6   :  { %4623 = vmatpush3.bf16.msra.mxu1 %v4994_v29  ;;  %v10425_v29 = vld [vmem:[#allocation32_spill] sm:$0xff] }
 0x1f7   :  { %4624 = vmatprep.subr.bf16.mxu1 %v4996_v21  ;;  %v10426_v33 = vsel %vm10342_vm10, %v10425_v29, 0  ;;  %v2766_v21 = vpop.permute.xlu1 %2765  ;;  %v2822_v47 = vpop.permute.xlu0 %2821 }
 0x1f8   :  { %v2973_v39 = vsel %vm10427_vm8, %v10426_v33, %v2799_v62  ;;  %v2921_v41 = vsel %vm10430_vm11, %v10429_v9, %v2766_v21  ;;  %v3000_v5 = vsel %vm10424_vm2, %v7671_v63, %v2822_v47  ;;  %vm10432_vm8 = vnez %v10431_v40  ;;  %v10448_v21 = vld [vmem:[#allocation6_spill] sm:$0xff] }
 0x1f9   :  { %3643 = vmatmul.mubr.bf16.gmra.mrb[68].mxu1 %v2973_v39  ;;  %v1827_v18 = vsel %vm10432_vm8, %v8171_v8, 0  ;;  %vm10436_vm11 = vnez %v10210_v60  ;;  %vm10438_vm8 = vmmov %vm10424_vm2  ;;  %v10444_v60 = vld [vmem:[#allocation8_spill] sm:$0xff]  ;;  %v10453_v47 = vsel %vm10366_vm13, %v8292_v30, 0 }
 0x1fa   :  { %4625 = vmatpush3.bf16.msra.mxu1 %v4998_v19  ;;  %3650 = vmatprep.mubr.bf16.mxu1 %v3000_v5 }
 0x1fb   :  { %4626 = vmatprep.subr.bf16.mxu1 %v4999_v52  ;;  %3563 = vmatmul.mubr.bf16.gmra.mrb[72].mxu0 %v2921_v41  ;;  %v2801_v19 = vpop.permute.xlu1 %2800  ;;  %v2789_v62 = vpop.permute.xlu0 %2788  ;;  %v10437_v52 = vsel %vm10436_vm11, %v8174_v34, 0  ;;  %v10455_v41 = vshrl.u32 %v10386_v24, 16 }
 0x1fc   :  { %v2953_v35 = vsel %vm10433_vm15, %v1827_v18, %v2789_v62  ;;  %v2977_v14 = vsel %vm10435_vm12, %v10434_v7, %v2801_v19  ;;  %vm10439_vm15 = vcmp.ge.s32.totalorder %v10374_v0, 1  ;;  %v10456_v62 = vld [vmem:[#allocation19_spill] sm:$0xff]  ;;  %v10459_v18 = vshll.u32 %v10386_v24, 16 }
 0x1fd   :  { %3570 = vmatprep.mubr.bf16.mxu0 %v2953_v35  ;;  %vm8864_vm12 = vmand %vm10441_vm7, %vm10439_vm15  ;;  %v2266_v5 = vrot.slane %v10455_v41, 7 }
 0x1fe   :  { %4627 = vmatpush3.bf16.msra.mxu1 %v5000_v45  ;;  %v10445_v45 = vld [vmem:[#allocation25_spill] sm:$0xff]  ;;  %vm10454_vm7 = vmmov %vm10452_vm14 }
 0x1ff   :  { %v2768_v63 = vpop.permute.xlu1 %2767  ;;  %v2824_v3 = vpop.permute.xlu0 %2823  ;;  %vm10446_vm11 = vnez %v10445_v45  ;;  %vm2419_vm15 = vmpackc.low %vm8864_vm12, %vm8864_vm12  ;;  %v2267_v35 = vor.u32 %v2266_v5, %v10459_v18  ;;  %v10465_v45 = vld [vmem:[#allocation33_spill] sm:$0xff] }
 0x200   :  { %v2925_v53 = vsel %vm10424_vm2, %v10437_v52, %v2768_v63  ;;  %v3003_v8 = vsel %vm10438_vm8, %v7813_v50, %v2824_v3  ;;  %v1828_v34 = vsel %vm10446_vm11, %v10444_v60, 0  ;;  %vm10447_vm2 = vcmp.ge.s32.totalorder %v10376_v17, 1  ;;  %v10460_v52 = vld [vmem:[#allocation9_spill] sm:$0xff]  ;;  %v10464_v60 = vld [vmem:[#allocation64_spill] sm:$0xff] }
 0x201   :  { %3651 = vmatmul.mubr.bf16.gmra.mrb[72].mxu1 %v2977_v14  ;;  %vm10449_vm8 = vcmp.lt.s32.totalorder %v10448_v21, 42  ;;  %v2431_v7 = vsel %vm2419_vm15, 65537, %v9580_v26  ;;  %v2294_v38 = vsel %vm10381_vm1, 0, %v2267_v35 }
 0x202   :  { %3658 = vmatprep.mubr.bf16.mxu1 %v3003_v8  ;;  %vm8875_vm10 = vmand %vm10449_vm8, %vm10447_vm2  ;;  %vm10466_vm8 = vnez %v10465_v45 }
 0x203   :  { %3571 = vmatmul.mubr.bf16.gmra.mrb[76].mxu0 %v2925_v53  ;;  %v2803_v33 = vpop.permute.xlu1 %2802  ;;  %v2791_v39 = vpop.permute.xlu0 %2790  ;;  %vm2420_vm11 = vmpackc.low %vm8875_vm10, %vm8875_vm10  ;;  %v10461_v53 = vsel %vm10369_vm9, %v10460_v52, 0  ;;  %v10481_v52 = vld [vmem:[#allocation55_spill] sm:$0xff] }
 0x204   :  { %v2957_v0 = vsel %vm10452_vm14, %v1828_v34, %v2791_v39  ;;  %v2981_v9 = vsel %vm10454_vm7, %v10453_v47, %v2803_v33  ;;  %vm10457_vm14 = vmmov %vm10454_vm7  ;;  %v2432_v14 = vsel %vm2420_vm11, 65537, %v9580_v26  ;;  %v2295_v26 = vsel %vm8727_vm0, %v2294_v38, 0  ;;  %v10470_v47 = vld [vmem:[#allocation62_spill] sm:$0xff] }
 0x205   :  { %3578 = vmatprep.mubr.bf16.mxu0 %v2957_v0  ;;  %vm10458_vm2 = vmmov %vm10454_vm7  ;;  %v4314_v29 = vcombine.low %v2431_v7, %v2432_v14  ;;  %v2625_v34 = vsel %vm10466_vm8, %v10464_v60, 0 }
 0x206   :  { %vm10462_vm10 = vmmov %vm10458_vm2 }
 0x207   :  { %v2770_v17 = vpop.permute.xlu1 %2769  ;;  %v2826_v19 = vpop.permute.xlu0 %2825  ;;  %vm10463_vm12 = vmmov %vm10458_vm2  ;;  %vm2461_vm11 = vcmp.ne.s16.totalorder %v4314_v29, 0  ;;  %v10487_v29 = vsel %vm8547_vm6, %v8524_v28, 0 }
 0x208   :  { %v2929_v30 = vsel %vm10457_vm14, %v10456_v62, %v2770_v17  ;;  %v3006_v40 = vsel %vm10458_vm2, %v8084_v1, %v2826_v19  ;;  %vm10467_vm7 = vmmov %vm10458_vm2  ;;  %v2467_v48 = vsel %vm2461_vm11, %v10470_v47, 0  ;;  %vm10473_vm14 = vsmask.f32 256 }
 0x209   :  { %3659 = vmatmul.mubr.bf16.gmra.mrb[76].mxu1 %v2981_v9  ;;  %vm10468_vm15 = vmmov %vm10458_vm2 }
 0x20a   :  { %3666 = vmatprep.mubr.bf16.mxu1 %v3006_v40  ;;  %vm10471_vm0 = vmmov %vm10458_vm2  ;;  %v10474_v40 = vld [vmem:[#allocation76_spill] sm:$0xff] }
 0x20b   :  { %3579 = vmatmul.mubr.bf16.gmra.mrb[80].mxu0 %v2929_v30  ;;  %v2805_v63 = vpop.permute.xlu1 %2804  ;;  %v2850_v3 = vpop.permute.xlu0 %2849  ;;  %vm10472_vm1 = vmmov %vm10471_vm0  ;;  %vm10475_vm2 = vnez %v10474_v40 }
 0x20c   :  { %v2985_v8 = vsel %vm10462_vm10, %v10461_v53, %v2805_v63  ;;  %v3037_v1 = vsel %vm10463_vm12, %v10386_v24, %v2850_v3  ;;  %v2269_v24 = vor.u32 %v8477_v31, %v10469_v6  ;;  %v2626_v18 = vsel %vm10475_vm2, %v8465_v51, 0  ;;  %vm10476_vm10 = vmmov %vm10471_vm0 }
 0x20d   :  { %3706 = vmatprep.mubr.bf16.mxu0 %v3037_v1  ;;  %vm10477_vm12 = vmmov %vm10471_vm0 }
 0x20e   :  { %v2270_v19 = vsel %vm10473_vm14, %v2266_v5, %v2269_v24  ;;  %vm10478_vm8 = vmmov %vm10471_vm0 }
 0x20f   :  { %v2829_v33 = vpop.permute.xlu1 %2828  ;;  %v2891_v39 = vpop.permute.xlu0 %2890  ;;  %v2296_v31 = vsel %vm10400_vm5, %v2270_v19, 0  ;;  %vm10480_vm5 = vmmov %vm10471_vm0  ;;  %v10514_v19 = vld [vmem:[#allocation86_spill] sm:$0xff] }
 0x210   :  { %v3010_v21 = vsel %vm10467_vm7, %v2295_v26, %v2829_v33  ;;  %v3086_v50 = vsel %vm10468_vm15, %v2625_v34, %v2891_v39  ;;  %vm10482_vm7 = vnez %v10481_v52  ;;  %vm10484_vm15 = vmmov %vm10471_vm0  ;;  %v10488_v33 = vld [vmem:[#allocation48_spill] sm:$0xff] }
 0x211   :  { %3667 = vmatmul.mubr.bf16.gmra.mrb[80].mxu1 %v2985_v8  ;;  %v2627_v53 = vsel %vm10482_vm7, %v8538_v13, 0  ;;  %v10483_v8 = vsel %vm7932_vm3, %v8521_v57, 0  ;;  %vm10485_vm11 = vmmov %vm10471_vm0  ;;  %vm10489_vm3 = vnez %v10488_v33 }
 0x212   :  { %3794 = vmatprep.mubr.bf16.mxu1 %v3086_v50  ;;  %vm10486_vm4 = vmmov %vm10471_vm0  ;;  %v2628_v26 = vsel %vm10489_vm3, %v8616_v55, 0  ;;  %vm10507_vm3 = vnez %v10251_v44 }
 0x213   :  { %3707 = vmatmul.mubr.bf16.vlgmr.msra.gmra.mrb[84].mxu0 %v3010_v21  ;;  %v2871_v0 = vpop.permute.xlu1 %2870  ;;  %v2852_v9 = vpop.permute.xlu0 %2851  ;;  %vm10492_vm14 = vmmov %vm10471_vm0  ;;  %v10498_v21 = vld [vmem:[#allocation12_spill] sm:$0xff] }
 0x214   :  { %v3059_v41 = vsel %vm10471_vm0, %v2467_v48, %v2871_v0  ;;  %v3040_v17 = vsel %vm10472_vm1, %v10297_v16, %v2852_v9  ;;  %vm10490_vm1 = vnez %v10154_v10  ;;  %vm10493_vm2 = vmmov %vm10471_vm0 }
 0x215   :  { %3714 = vmatprep.mubr.bf16.mxu0 %v3040_v17  ;;  %v10491_v39 = vsel %vm10490_vm1, %v8597_v2, 0  ;;  %vm10494_vm6 = vmmov %vm10471_vm0  ;;  %vm10508_vm1 = vnez %v10302_v56 }
 0x216   :  { %vm10502_vm7 = vmmov %vm10471_vm0 }
 0x217   :  { %v2831_v62 = vpop.permute.xlu1 %2830  ;;  %v2893_v30 = vpop.permute.xlu0 %2892 }
 0x218   :  { %v3014_v35 = vsel %vm10476_vm10, %v2296_v31, %v2831_v62  ;;  %v3090_v7 = vsel %vm10477_vm12, %v2626_v18, %v2893_v30  ;;  %vm10495_vm10 = vnez %v10345_v23  ;;  %vm10497_vm12 = vmmov %vm10471_vm0  ;;  %v10516_v62 = vld [vmem:[#allocation80_spill] sm:$0xff]  ;;  %v10520_v31 = vld [vmem:[#allocation66_spill] sm:$0xff] }
 0x219   :  { %3795 = vmatmul.mubr.bf16.vlgmr.msra.gmra.mrb[84].mxu1 %v3059_v41  ;;  %v10496_v34 = vsel %vm10495_vm10, %v8584_v43, 0  ;;  %vm10515_vm10 = vnez %v10514_v19  ;;  %v10521_v40 = vsel %vm10369_vm9, %v10520_v31, 0  ;;  %vm3861_vm9 = vcmask 1041408  }
 0x21a   :  { %3802 = vmatprep.mubr.bf16.mxu1 %v3090_v7  ;;  %v10517_v56 = vsel %vm10515_vm10, %v10516_v62, 0 }
 0x21b   :  { %3715 = vmatmul.mubr.bf16.gmra.mrb[88].mxu0 %v3014_v35  ;;  %v2873_v16 = vpop.permute.xlu1 %2872  ;;  %v2854_v14 = vpop.permute.xlu0 %2853  ;;  %v10523_v35 = vmov 0.0  }
 0x21c   :  { %v3043_v5 = vsel %vm10478_vm8, %v10291_v46, %v2854_v14  ;;  %v3063_v63 = vsel %vm10480_vm5, %v10479_v59, %v2873_v16  ;;  %vm10499_vm8 = vnez %v10498_v21  ;;  %vm10500_vm5 = vnez %v10198_v36 }
 0x21d   :  { %3722 = vmatprep.mubr.bf16.mxu0 %v3043_v5  ;;  %v2629_v50 = vsel %vm10499_vm8, %v8662_v4, 0  ;;  %v10501_v6 = vsel %vm10500_vm5, %v8639_v25, 0  ;;  %v2624_v36 = vsel %vm10507_vm3, %v8712_v58, 0  ;;  %v10512_v58 = vld [vmem:[#allocation27_spill] sm:$0xff]  ;;  %vm10522_vm5 = vmmov %vm10471_vm0 }
 0x21e   :  { %v2630_v9 = vsel %vm10508_vm1, %v2624_v36, 0 }
 0x21f   :  { %v2833_v51 = vpop.permute.xlu1 %2832  ;;  %v2895_v3 = vpop.permute.xlu0 %2894 }
 0x220   :  { %v3018_v46 = vsel %vm10484_vm15, %v10483_v8, %v2833_v51  ;;  %v3094_v27 = vsel %vm10485_vm11, %v2627_v53, %v2895_v3  ;;  %vm10503_vm15 = vmmov %vm10471_vm0 }
 0x221   :  { %3803 = vmatmul.mubr.bf16.gmra.mrb[88].mxu1 %v3063_v63  ;;  %vm10504_vm11 = vmmov %vm10471_vm0 }
 0x222   :  { %3810 = vmatprep.mubr.bf16.mxu1 %v3094_v27 }
 0x223   :  { %3723 = vmatmul.mubr.bf16.gmra.mrb[92].mxu0 %v3018_v46  ;;  %v2875_v20 = vpop.permute.xlu1 %2874  ;;  %v2856_v1 = vpop.permute.xlu0 %2855 }
 0x224   :  { %v3046_v38 = vsel %vm10486_vm4, %v10055_v54, %v2856_v1  ;;  %v3067_v13 = vsel %vm10471_vm0, %v10487_v29, %v2875_v20  ;;  %vm10505_vm4 = vnez %v10359_v42 }
 0x225   :  { %3730 = vmatprep.mubr.bf16.mxu0 %v3046_v38  ;;  %v10506_v47 = vsel %vm10505_vm4, %v8633_v37, 0 }
 0x227   :  { %v2835_v22 = vpop.permute.xlu1 %2834  ;;  %v2897_v57 = vpop.permute.xlu0 %2896 }
 0x228   :  { %v3022_v54 = vsel %vm10492_vm14, %v10491_v39, %v2835_v22  ;;  %v3098_v11 = vsel %vm10493_vm2, %v2628_v26, %v2897_v57  ;;  %vm10510_vm14 = vmmov %vm10471_vm0 }
 0x229   :  { %3811 = vmatmul.mubr.bf16.gmra.mrb[92].mxu1 %v3067_v13  ;;  %vm10511_vm2 = vmmov %vm10471_vm0 }
 0x22a   :  { %3818 = vmatprep.mubr.bf16.mxu1 %v3098_v11 }
 0x22b   :  { %3731 = vmatmul.mubr.bf16.gmra.mrb[96].mxu0 %v3022_v54  ;;  %v2877_v28 = vpop.permute.xlu1 %2876 }
 0x22c   :  { %v3071_v55 = vsel %vm10497_vm12, %v10496_v34, %v2877_v28  ;;  %vm10518_vm12 = vmmov %vm10471_vm0 }
 0x22d   :  { %v2858_v60 = vpop.permute.xlu0 %2857 }
 0x22e   :  { %v3049_v45 = vsel %vm10494_vm6, %v10111_v49, %v2858_v60  ;;  %vm10513_vm6 = vmmov %vm10471_vm0 }
 0x22f   :  { %3738 = vmatprep.mubr.bf16.mxu0 %v3049_v45 }
 0x231   :  { %3819 = vmatmul.mubr.bf16.gmra.mrb[96].mxu1 %v3071_v55  ;;  %v2837_v10 = vpop.permute.xlu1 %2836  ;;  %v2899_v2 = vpop.permute.xlu0 %2898 }
 0x232   :  { %v3026_v49 = vsel %vm10502_vm7, %v10501_v6, %v2837_v10  ;;  %v3102_v23 = vsel %vm10503_vm15, %v2629_v50, %v2899_v2  ;;  %vm10524_vm7 = vmmov 0  }
 0x233   :  { %3739 = vmatmul.mubr.bf16.gmra.mrb[100].mxu0 %v3026_v49  ;;  %3826 = vmatprep.mubr.bf16.mxu1 %v3102_v23 }
 0x235   :  { %v2879_v43 = vpop.permute.xlu1 %2878 }
 0x236   :  { %v3075_v4 = vsel %vm10471_vm0, %v10506_v47, %v2879_v43 }
 0x239   :  { %v2860_v24 = vpop.permute.xlu0 %2859  ;;  %3827 = vmatmul.mubr.bf16.gmra.mrb[100].mxu1 %v3075_v4 }
 0x23a   :  { %v3052_v0 = vsel %vm10504_vm11, %v10138_v12, %v2860_v24  ;;  %v10509_v12 = vsel %vm10366_vm13, %v8691_v15, 0  ;;  %vm10519_vm13 = vmmov %vm10471_vm0 }
 0x23b   :  { %3746 = vmatprep.mubr.bf16.mxu0 %v3052_v0  ;;  %vm4397_vm8 = vmneg %vm10519_vm13 }
 0x23d   :  { %v2839_v25 = vpop.permute.xlu1 %2838  ;;  %v2901_v48 = vpop.permute.xlu0 %2900 }
 0x23e   :  { %v3030_v42 = vsel %vm10510_vm14, %v10509_v12, %v2839_v25  ;;  %v3106_v37 = vsel %vm10511_vm2, %v2630_v9, %v2901_v48 }
 0x23f   :  { %3747 = vmatmul.mubr.bf16.gmra.mrb[104].mxu0 %v3030_v42  ;;  %3834 = vmatprep.mubr.bf16.mxu1 %v3106_v37 }
 0x243   :  { %v2881_v41 = vpop.permute.xlu1 %2880 }
 0x244   :  { %v3079_v30 = vsel %vm10518_vm12, %v10517_v56, %v2881_v41 }
 0x245   :  { %v2862_v44 = vpop.permute.xlu0 %2861  ;;  %3835 = vmatmul.mubr.bf16.gmra.mrb[104].mxu1 %v3079_v30 }
 0x246   :  { %v3055_v17 = vsel %vm10513_vm6, %v10512_v58, %v2862_v44  ;;  %vm10526_vm6 = vcmask 1040384  }
 0x247   :  { %3754 = vmatprep.mubr.bf16.mxu0 %v3055_v17  ;;  %v2841_v61 = vpop.permute.xlu1 %2840  ;;  %vm10527_vm10 = vmmov %vm10526_vm6 }
 0x248   :  { %v3034_v18 = vsel %vm10522_vm5, %v10521_v40, %v2841_v61  ;;  %vm10529_vm5 = vmmov %vm10526_vm6 }
 0x249   :  { %v2883_v15 = vpop.permute.xlu0 %2882  ;;  %3755 = vmatmul.mubr.bf16.gmra.mrb[108].mxu0 %v3034_v18 }
 0x24a   :  { %4398 = vmatprep.mubr.msk.bf16.mxu1 %vm4397_vm8, %v2883_v15  ;;  %4830 = vmatprep.mubr.msk.f32.mxu0 %vm10524_vm7, %v10523_v35 }
 0x24d   :  { %4400 = vmatmul.mubr.msk.bf16.gmra.mrb[108].mxu1 %vm4397_vm8, %v2883_v15  ;;  %vm10528_vm8 = vmmov %vm10526_vm6 }
 0x259   :  { %v4454_v7 = vpop.f32.mrb[56].mxu0 }
 0x25a   :  { %v4455_v16 = vpop.f32.mrb[57].mxu0 }
 0x25b   :  { %v4456_v14 = vadd.f32 %v4455_v16, %v4454_v7  ;;  %v4457_v5 = vpop.f32.mrb[58].mxu0 }
 0x25c   :  { %v4458_v59 = vpop.f32.mrb[59].mxu0 }
 0x25d   :  { %v4459_v63 = vadd.f32 %v4458_v59, %v4457_v5  ;;  %v3533_v52 = vadd.f32 %v4456_v14, %v9016_v32 }
 0x25f   :  { %v3536_v27 = vadd.f32 %v4459_v63, %v9016_v32 }
 0x2b4   :  { %v4512_v51 = vpop.f32.mrb[56].mxu1 }
 0x2b5   :  { %v4513_v3 = vpop.f32.mrb[57].mxu1 }
 0x2b6   :  { %v4514_v53 = vadd.f32 %v4513_v3, %v4512_v51  ;;  %v4515_v8 = vpop.f32.mrb[58].mxu1  ;;  %v4460_v38 = vpop.f32.mrb[60].mxu0 }
 0x2b7   :  { %v4516_v46 = vpop.f32.mrb[59].mxu1  ;;  %v4461_v29 = vpop.f32.mrb[61].mxu0 }
 0x2b8   :  { %v9020_v20 = vadd.f32 %v4514_v53, %v3533_v52  ;;  %v4517_v1 = vadd.f32 %v4516_v46, %v4515_v8  ;;  %v4462_v22 = vadd.f32 %v4461_v29, %v4460_v38  ;;  %v4463_v57 = vpop.f32.mrb[62].mxu0 }
 0x2b9   :  { %v4464_v33 = vpop.f32.mrb[63].mxu0 }
 0x2ba   :  { %v9022_v13 = vadd.f32 %v4517_v1, %v3536_v27  ;;  %v4465_v26 = vadd.f32 %v4464_v33, %v4463_v57  ;;  %v3541_v11 = vadd.f32 %v4462_v22, %v9016_v32 }
 0x2bc   :  { %v4518_v39 = vpop.f32.mrb[60].mxu1  ;;  %v3544_v34 = vadd.f32 %v4465_v26, %v9016_v32 }
 0x2bd   :  { %v4519_v54 = vpop.f32.mrb[61].mxu1 }
 0x2be   :  { %v4520_v28 = vadd.f32 %v4519_v54, %v4518_v39  ;;  %v4521_v60 = vpop.f32.mrb[62].mxu1  ;;  %v4466_v2 = vpop.f32.mrb[64].mxu0 }
 0x2bf   :  { %v4522_v45 = vpop.f32.mrb[63].mxu1  ;;  %v4467_v21 = vpop.f32.mrb[65].mxu0 }
 0x2c0   :  { %v9026_v55 = vadd.f32 %v4520_v28, %v3541_v11  ;;  %v4523_v10 = vadd.f32 %v4522_v45, %v4521_v60  ;;  %v4468_v6 = vadd.f32 %v4467_v21, %v4466_v2  ;;  %v4469_v49 = vpop.f32.mrb[66].mxu0 }
 0x2c1   :  { %v4470_v23 = vpop.f32.mrb[67].mxu0 }
 0x2c2   :  { %v9028_v50 = vadd.f32 %v4523_v10, %v3544_v34  ;;  %v4471_v43 = vadd.f32 %v4470_v23, %v4469_v49  ;;  %v3549_v47 = vadd.f32 %v4468_v6, %v9016_v32 }
 0x2c4   :  { %v4524_v24 = vpop.f32.mrb[64].mxu1  ;;  %v3552_v48 = vadd.f32 %v4471_v43, %v9016_v32 }
 0x2c5   :  { %v4525_v0 = vpop.f32.mrb[65].mxu1 }
 0x2c6   :  { %v4526_v4 = vadd.f32 %v4525_v0, %v4524_v24  ;;  %v4527_v36 = vpop.f32.mrb[66].mxu1  ;;  %v4472_v42 = vpop.f32.mrb[68].mxu0 }
 0x2c7   :  { %v4528_v25 = vpop.f32.mrb[67].mxu1  ;;  %v4473_v37 = vpop.f32.mrb[69].mxu0 }
 0x2c8   :  { %v9032_v9 = vadd.f32 %v4526_v4, %v3549_v47  ;;  %v4529_v12 = vadd.f32 %v4528_v25, %v4527_v36  ;;  %v4474_v44 = vadd.f32 %v4473_v37, %v4472_v42  ;;  %v4475_v58 = vpop.f32.mrb[70].mxu0 }
 0x2c9   :  { %v4476_v17 = vpop.f32.mrb[71].mxu0 }
 0x2ca   :  { %v9034_v41 = vadd.f32 %v4529_v12, %v3552_v48  ;;  %v4477_v19 = vadd.f32 %v4476_v17, %v4475_v58  ;;  %v3557_v30 = vadd.f32 %v4474_v44, %v9016_v32 }
 0x2cc   :  { %v4530_v62 = vpop.f32.mrb[68].mxu1  ;;  %v3560_v40 = vadd.f32 %v4477_v19, %v9016_v32 }
 0x2cd   :  { %v4531_v56 = vpop.f32.mrb[69].mxu1 }
 0x2ce   :  { %v4532_v61 = vadd.f32 %v4531_v56, %v4530_v62  ;;  %v4533_v15 = vpop.f32.mrb[70].mxu1  ;;  %v4478_v16 = vpop.f32.mrb[72].mxu0 }
 0x2cf   :  { %v4534_v31 = vpop.f32.mrb[71].mxu1  ;;  %v4479_v14 = vpop.f32.mrb[73].mxu0 }
 0x2d0   :  { %v9038_v18 = vadd.f32 %v4532_v61, %v3557_v30  ;;  %v4535_v7 = vadd.f32 %v4534_v31, %v4533_v15  ;;  %v4480_v59 = vadd.f32 %v4479_v14, %v4478_v16  ;;  %v4481_v63 = vpop.f32.mrb[74].mxu0 }
 0x2d1   :  { %v4482_v51 = vpop.f32.mrb[75].mxu0 }
 0x2d2   :  { %v9040_v5 = vadd.f32 %v4535_v7, %v3560_v40  ;;  %v4483_v3 = vadd.f32 %v4482_v51, %v4481_v63  ;;  %v3565_v8 = vadd.f32 %v4480_v59, %v9016_v32 }
 0x2d4   :  { %v4536_v52 = vpop.f32.mrb[72].mxu1  ;;  %v3568_v38 = vadd.f32 %v4483_v3, %v9016_v32 }
 0x2d5   :  { %v4537_v53 = vpop.f32.mrb[73].mxu1 }
 0x2d6   :  { %v4538_v46 = vadd.f32 %v4537_v53, %v4536_v52  ;;  %v4539_v27 = vpop.f32.mrb[74].mxu1  ;;  %v4484_v57 = vpop.f32.mrb[76].mxu0 }
 0x2d7   :  { %v4540_v1 = vpop.f32.mrb[75].mxu1  ;;  %v4485_v33 = vpop.f32.mrb[77].mxu0 }
 0x2d8   :  { %v9044_v29 = vadd.f32 %v4538_v46, %v3565_v8  ;;  %v4541_v22 = vadd.f32 %v4540_v1, %v4539_v27  ;;  %v4486_v39 = vadd.f32 %v4485_v33, %v4484_v57  ;;  %v4487_v54 = vpop.f32.mrb[78].mxu0 }
 0x2d9   :  { %v4488_v11 = vpop.f32.mrb[79].mxu0 }
 0x2da   :  { %v9046_v26 = vadd.f32 %v4541_v22, %v3568_v38  ;;  %v4489_v28 = vadd.f32 %v4488_v11, %v4487_v54  ;;  %v3573_v34 = vadd.f32 %v4486_v39, %v9016_v32 }
 0x2dc   :  { %v4542_v60 = vpop.f32.mrb[76].mxu1  ;;  %v3576_v6 = vadd.f32 %v4489_v28, %v9016_v32 }
 0x2dd   :  { %v4543_v45 = vpop.f32.mrb[77].mxu1 }
 0x2de   :  { %v4544_v10 = vadd.f32 %v4543_v45, %v4542_v60  ;;  %v4545_v2 = vpop.f32.mrb[78].mxu1  ;;  %v4490_v43 = vpop.f32.mrb[80].mxu0 }
 0x2df   :  { %v4546_v21 = vpop.f32.mrb[79].mxu1  ;;  %v4491_v24 = vpop.f32.mrb[81].mxu0 }
 0x2e0   :  { %v9050_v49 = vadd.f32 %v4544_v10, %v3573_v34  ;;  %v4547_v23 = vadd.f32 %v4546_v21, %v4545_v2  ;;  %v4492_v47 = vadd.f32 %v4491_v24, %v4490_v43  ;;  %v4493_v4 = vpop.f32.mrb[82].mxu0 }
 0x2e1   :  { %v4494_v36 = vpop.f32.mrb[83].mxu0 }
 0x2e2   :  { %v9052_v0 = vadd.f32 %v4547_v23, %v3576_v6  ;;  %v3581_v12 = vadd.f32 %v4492_v47, %v9016_v32 }
 0x2e4   :  { %v4548_v25 = vpop.f32.mrb[80].mxu1 }
 0x2e5   :  { %v4549_v48 = vpop.f32.mrb[81].mxu1 }
 0x2e6   :  { %v4550_v42 = vadd.f32 %v4549_v48, %v4548_v25  ;;  %v4551_v37 = vpop.f32.mrb[82].mxu1  ;;  %v4570_v17 = vpop.f32.mrb[84].mxu0 }
 0x2e7   :  { %v4552_v44 = vpop.f32.mrb[83].mxu1  ;;  %v4571_v19 = vpop.f32.mrb[85].mxu0 }
 0x2e8   :  { %v9055_v58 = vadd.f32 %v4550_v42, %v3581_v12  ;;  %v4572_v62 = vadd.f32 %v4571_v19, %v4570_v17  ;;  %v4573_v56 = vpop.f32.mrb[86].mxu0 }
 0x2e9   :  { %v4574_v30 = vpop.f32.mrb[87].mxu0 }
 0x2ea   :  { %v3709_v61 = vadd.f32 %v4572_v62, %v9020_v20  ;;  %v4575_v15 = vadd.f32 %v4574_v30, %v4573_v56 }
 0x2ec   :  { %v4628_v31 = vpop.f32.mrb[84].mxu1  ;;  %v3712_v7 = vadd.f32 %v4575_v15, %v9022_v13 }
 0x2ed   :  { %v4629_v40 = vpop.f32.mrb[85].mxu1 }
 0x2ee   :  { %v4630_v16 = vadd.f32 %v4629_v40, %v4628_v31  ;;  %v4631_v14 = vpop.f32.mrb[86].mxu1  ;;  %v4576_v51 = vpop.f32.mrb[88].mxu0 }
 0x2ef   :  { %v4632_v32 = vpop.f32.mrb[87].mxu1  ;;  %v4577_v3 = vpop.f32.mrb[89].mxu0 }
 0x2f0   :  { %v9059_v59 = vadd.f32 %v4630_v16, %v3709_v61  ;;  %v4633_v63 = vadd.f32 %v4632_v32, %v4631_v14  ;;  %v4578_v53 = vadd.f32 %v4577_v3, %v4576_v51  ;;  %v4579_v8 = vpop.f32.mrb[90].mxu0 }
 0x2f1   :  { %v4580_v46 = vpop.f32.mrb[91].mxu0 }
 0x2f2   :  { %v9061_v52 = vadd.f32 %v4633_v63, %v3712_v7  ;;  %v3717_v27 = vadd.f32 %v4578_v53, %v9026_v55  ;;  %v4581_v1 = vadd.f32 %v4580_v46, %v4579_v8 }
 0x2f4   :  { %v3850_v20 = vadd.f32 %v9061_v52, %v9059_v59  ;;  %v4634_v13 = vpop.f32.mrb[88].mxu1  ;;  %v3720_v22 = vadd.f32 %v4581_v1, %v9028_v50 }
 0x2f5   :  { %v4635_v38 = vpop.f32.mrb[89].mxu1 }
 0x2f6   :  { %v4636_v57 = vadd.f32 %v4635_v38, %v4634_v13  ;;  %v4637_v33 = vpop.f32.mrb[90].mxu1  ;;  %v4582_v28 = vpop.f32.mrb[92].mxu0 }
 0x2f7   :  { %v4638_v39 = vpop.f32.mrb[91].mxu1  ;;  %v4583_v60 = vpop.f32.mrb[93].mxu0 }
 0x2f8   :  { %v9067_v54 = vadd.f32 %v4636_v57, %v3717_v27  ;;  %v4639_v11 = vadd.f32 %v4638_v39, %v4637_v33  ;;  %v4584_v10 = vadd.f32 %v4583_v60, %v4582_v28  ;;  %v4585_v2 = vpop.f32.mrb[94].mxu0 }
 0x2f9   :  { %v4586_v55 = vpop.f32.mrb[95].mxu0 }
 0x2fa   :  { %v3851_v45 = vadd.f32 %v3850_v20, %v9067_v54  ;;  %v9070_v34 = vadd.f32 %v4639_v11, %v3720_v22  ;;  %v3725_v6 = vadd.f32 %v4584_v10, %v9032_v9  ;;  %v4587_v50 = vadd.f32 %v4586_v55, %v4585_v2 }
 0x2fc   :  { %v3852_v21 = vadd.f32 %v3851_v45, %v9070_v34  ;;  %v4640_v23 = vpop.f32.mrb[92].mxu1  ;;  %v3728_v24 = vadd.f32 %v4587_v50, %v9034_v41 }
 0x2fd   :  { %v4641_v43 = vpop.f32.mrb[93].mxu1 }
 0x2fe   :  { %v4642_v47 = vadd.f32 %v4641_v43, %v4640_v23  ;;  %v4643_v4 = vpop.f32.mrb[94].mxu1  ;;  %v4588_v12 = vpop.f32.mrb[96].mxu0 }
 0x2ff   :  { %v4644_v36 = vpop.f32.mrb[95].mxu1  ;;  %v4589_v42 = vpop.f32.mrb[97].mxu0 }
 0x300   :  { %v9075_v25 = vadd.f32 %v4642_v47, %v3725_v6  ;;  %v4645_v48 = vadd.f32 %v4644_v36, %v4643_v4  ;;  %v4590_v17 = vadd.f32 %v4589_v42, %v4588_v12  ;;  %v4591_v19 = vpop.f32.mrb[98].mxu0 }
 0x301   :  { %v4592_v9 = vpop.f32.mrb[99].mxu0 }
 0x302   :  { %v3853_v37 = vadd.f32 %v3852_v21, %v9075_v25  ;;  %v9078_v44 = vadd.f32 %v4645_v48, %v3728_v24  ;;  %v3733_v56 = vadd.f32 %v4590_v17, %v9038_v18  ;;  %v4593_v41 = vadd.f32 %v4592_v9, %v4591_v19 }
 0x304   :  { %v3854_v62 = vadd.f32 %v3853_v37, %v9078_v44  ;;  %v4646_v30 = vpop.f32.mrb[96].mxu1  ;;  %v3736_v15 = vadd.f32 %v4593_v41, %v9040_v5 }
 0x305   :  { %v4647_v61 = vpop.f32.mrb[97].mxu1 }
 0x306   :  { %v4648_v31 = vadd.f32 %v4647_v61, %v4646_v30  ;;  %v4649_v40 = vpop.f32.mrb[98].mxu1  ;;  %v4594_v32 = vpop.f32.mrb[100].mxu0 }
 0x307   :  { %v4650_v7 = vpop.f32.mrb[99].mxu1  ;;  %v4595_v63 = vpop.f32.mrb[101].mxu0 }
 0x308   :  { %v9083_v16 = vadd.f32 %v4648_v31, %v3733_v56  ;;  %v4651_v14 = vadd.f32 %v4650_v7, %v4649_v40  ;;  %v4596_v53 = vadd.f32 %v4595_v63, %v4594_v32  ;;  %v4597_v8 = vpop.f32.mrb[102].mxu0 }
 0x309   :  { %v4598_v18 = vpop.f32.mrb[103].mxu0 }
 0x30a   :  { %v3855_v51 = vadd.f32 %v3854_v62, %v9083_v16  ;;  %v9086_v3 = vadd.f32 %v4651_v14, %v3736_v15  ;;  %v3741_v20 = vadd.f32 %v4596_v53, %v9044_v29  ;;  %v4599_v5 = vadd.f32 %v4598_v18, %v4597_v8 }
 0x30c   :  { %v3856_v46 = vadd.f32 %v3855_v51, %v9086_v3  ;;  %v4652_v27 = vpop.f32.mrb[100].mxu1  ;;  %v3744_v13 = vadd.f32 %v4599_v5, %v9046_v26 }
 0x30d   :  { %v4653_v1 = vpop.f32.mrb[101].mxu1 }
 0x30e   :  { %v4654_v38 = vadd.f32 %v4653_v1, %v4652_v27  ;;  %v4655_v22 = vpop.f32.mrb[102].mxu1 }
 0x30f   :  { %v4656_v57 = vpop.f32.mrb[103].mxu1 }
 0x310   :  { %v3829_v33 = vadd.f32 %v4654_v38, %v3741_v20  ;;  %v4657_v39 = vadd.f32 %v4656_v57, %v4655_v22 }
 0x312   :  { %v4600_v11 = vpop.f32.mrb[104].mxu0  ;;  %v3857_v60 = vadd.f32 %v3856_v46, %v3829_v33  ;;  %v3832_v45 = vadd.f32 %v4657_v39, %v3744_v13 }
 0x313   :  { %v4601_v28 = vpop.f32.mrb[105].mxu0 }
 0x314   :  { %v4602_v10 = vadd.f32 %v4601_v28, %v4600_v11  ;;  %v4603_v2 = vpop.f32.mrb[106].mxu0  ;;  %v3858_v21 = vadd.f32 %v3857_v60, %v3832_v45 }
 0x315   :  { %v4604_v55 = vpop.f32.mrb[107].mxu0 }
 0x316   :  { %v3749_v29 = vadd.f32 %v4602_v10, %v9050_v49  ;;  %v4605_v6 = vadd.f32 %v4604_v55, %v4603_v2 }
 0x318   :  { %v4658_v50 = vpop.f32.mrb[104].mxu1  ;;  %v3752_v26 = vadd.f32 %v4605_v6, %v9052_v0 }
 0x319   :  { %v4659_v23 = vpop.f32.mrb[105].mxu1 }
 0x31a   :  { %v4660_v43 = vadd.f32 %v4659_v23, %v4658_v50  ;;  %v4661_v24 = vpop.f32.mrb[106].mxu1 }
 0x31b   :  { %v4662_v47 = vpop.f32.mrb[107].mxu1 }
 0x31c   :  { %v3837_v4 = vadd.f32 %v4660_v43, %v3749_v29  ;;  %v4663_v36 = vadd.f32 %v4662_v47, %v4661_v24  ;;  %v4606_v48 = vpop.f32.mrb[108].mxu0 }
 0x31d   :  { %v4607_v12 = vpop.f32.mrb[109].mxu0 }
 0x31e   :  { %v3859_v42 = vadd.f32 %v3858_v21, %v3837_v4  ;;  %v3840_v37 = vadd.f32 %v4663_v36, %v3752_v26  ;;  %v4608_v17 = vadd.f32 %v4607_v12, %v4606_v48  ;;  %v4609_v19 = vpop.f32.mrb[110].mxu0 }
 0x31f   :  { %v4610_v9 = vpop.f32.mrb[111].mxu0 }
 0x320   :  { %v3860_v62 = vadd.f32 %v3859_v42, %v3840_v37  ;;  %v3757_v49 = vadd.f32 %v4608_v17, %v9055_v58  ;;  %v4664_v56 = vpop.f32.mrb[108].mxu1 }
 0x321   :  { %v4665_v41 = vpop.f32.mrb[109].mxu1 }
 0x322   :  { %v4666_v30 = vadd.f32 %v4665_v41, %v4664_v56  ;;  %v4667_v61 = vpop.f32.mrb[110].mxu1  ;;  %v10525_v56 = vld [vmem:[#allocation3_spill] sm:$0xff] }
 0x323   :  { %v4668_v0 = vpop.f32.mrb[111].mxu1  ;;  %v3925_v41 = vsub.s32 0, %v10525_v56 }
 0x324   :  { %v3845_v15 = vadd.f32 %v4666_v30, %v3757_v49  ;;  %v3918_v49 = vld [vmem:[%s9200_s5] sm:$0x1] }
 0x326   :  { %v3862_v31 = vsel %vm3861_vm9, %v3845_v15, 0.0 }
 0x327   :  { %v3863_v40 = vadd.f32 %v3862_v31, %v3860_v62 }
 0x329   :  { %v3864_v7 = vrot.slane %v3863_v40, 4 }
 0x32b   :  { %v3865_v14 = vadd.f32 %v3864_v7, %v3863_v40 }
 0x32d   :  { %v3866_v32 = vrot.slane %v3865_v14, 2 }
 0x32f   :  { %v3867_v63 = vadd.f32 %v3866_v32, %v3865_v14 }
 0x331   :  { %v3868_v51 = vrot.slane %v3867_v63, 1 }
 0x333   :  { %v3869_v53 = vadd.f32 %v3868_v51, %v3867_v63 }
 0x335   :  { %v3871_v8 = vmul.f32 0.010204081, %v3869_v53 }
 0x337   :  { %v3872_v18 = vsub.f32 %v9059_v59, %v3871_v8  ;;  %v3873_v58 = vsub.f32 %v9061_v52, %v3871_v8  ;;  %v3874_v46 = vsub.f32 %v9067_v54, %v3871_v8  ;;  %v3875_v20 = vsub.f32 %v9070_v34, %v3871_v8 }
 0x338   :  { %v3876_v5 = vsub.f32 %v9075_v25, %v3871_v8  ;;  %v3877_v27 = vsub.f32 %v9078_v44, %v3871_v8  ;;  %v3878_v1 = vsub.f32 %v9083_v16, %v3871_v8  ;;  %v3879_v13 = vsub.f32 %v9086_v3, %v3871_v8 }
 0x339   :  { %v9103_v38 = vsub.f32 %v3829_v33, %v3871_v8  ;;  %v9105_v22 = vsub.f32 %v3832_v45, %v3871_v8  ;;  %v9107_v57 = vsub.f32 %v3837_v4, %v3871_v8  ;;  %v9109_v59 = vsub.f32 %v3840_v37, %v3871_v8 }
 0x33a   :  { %v3884_v52 = vsub.f32 %v3845_v15, %v3871_v8  ;;  %v3885_v54 = vmul.f32 %v3872_v18, %v3872_v18  ;;  %v3886_v39 = vmul.f32 %v3873_v58, %v3873_v58  ;;  %v3887_v34 = vmul.f32 %v3874_v46, %v3874_v46  ;;  %v9127_v15 = vld [vmem:[%s9201_s6] ss:$0 sm:$0xff] }
 0x33b   :  { %v3888_v25 = vmul.f32 %v3875_v20, %v3875_v20  ;;  %v3889_v44 = vmul.f32 %v3876_v5, %v3876_v5  ;;  %v3890_v16 = vmul.f32 %v3877_v27, %v3877_v27  ;;  %v3891_v3 = vmul.f32 %v3878_v1, %v3878_v1 }
 0x33c   :  { %v3898_v11 = vadd.f32 %v3886_v39, %v3885_v54  ;;  %v3892_v2 = vmul.f32 %v3879_v13, %v3879_v13  ;;  %v3893_v55 = vmul.f32 %v9103_v38, %v9103_v38  ;;  %v3894_v29 = vmul.f32 %v9105_v22, %v9105_v22 }
 0x33d   :  { %v3895_v50 = vmul.f32 %v9107_v57, %v9107_v57  ;;  %v3897_v26 = vmul.f32 %v3884_v52, %v3884_v52  ;;  %v3896_v43 = vmul.f32 %v9109_v59, %v9109_v59 }
 0x33e   :  { %v3899_v28 = vadd.f32 %v3898_v11, %v3887_v34  ;;  %v9137_v11 = vld [vmem:[%s9202_s7 + $0x8] sm:$0xff] }
 0x33f   :  { %v3909_v4 = vsel %vm3861_vm9, %v3897_v26, 0.0 }
 0x340   :  { %v3900_v60 = vadd.f32 %v3899_v28, %v3888_v25  ;;  %v4000_v25 = vld [vmem:[%s9202_s7] sm:$0xff] }
 0x342   :  { %v3901_v10 = vadd.f32 %v3900_v60, %v3889_v44 }
 0x344   :  { %v3902_v33 = vadd.f32 %v3901_v10, %v3890_v16  ;;  %v4017_v16 = vrot.slane %v9137_v11, 7 }
 0x346   :  { %v3903_v45 = vadd.f32 %v3902_v33, %v3891_v3 }
 0x348   :  { %v3904_v21 = vadd.f32 %v3903_v45, %v3892_v2  ;;  %v4016_v2 = vrot.slane %v4000_v25, 7 }
 0x34a   :  { %v3905_v6 = vadd.f32 %v3904_v21, %v3893_v55  ;;  %v4002_v55 = vld [vmem:[%s9202_s7 + $0x10] sm:$0xff]  ;;  %v4003_v21 = vld [vmem:[%s9202_s7 + $0x18] sm:$0xff] }
 0x34c   :  { %v3906_v23 = vadd.f32 %v3905_v6, %v3894_v29 }
 0x34e   :  { %v3907_v24 = vadd.f32 %v3906_v23, %v3895_v50 }
 0x350   :  { %v3908_v47 = vadd.f32 %v3907_v24, %v3896_v43 }
 0x352   :  { %v3910_v36 = vadd.f32 %v3909_v4, %v3908_v47 }
 0x354   :  { %v3911_v48 = vrot.slane %v3910_v36, 4 }
 0x356   :  { %v3912_v12 = vadd.f32 %v3911_v48, %v3910_v36 }
 0x358   :  { %v3913_v42 = vrot.slane %v3912_v12, 2 }
 0x35a   :  { %v3914_v37 = vadd.f32 %v3913_v42, %v3912_v12  ;;  %v4006_v12 = vld [vmem:[%s9202_s7 + $0x30] sm:$0x1]  ;;  %v4021_v42 = vrot.slane %v4003_v21, 7 }
 0x35c   :  { %v3915_v17 = vrot.slane %v3914_v37, 1 }
 0x35e   :  { %v3916_v19 = vadd.f32 %v3915_v17, %v3914_v37  ;;  %v4005_v37 = vld [vmem:[%s9202_s7 + $0x28] sm:$0xff]  ;;  %v4036_v17 = vsel %vm10526_vm6, %v4006_v12, %v4016_v2  ;;  %vm4093_vm6 = vcmask 801792  }
 0x360   :  { %v3917_v9 = vmul.f32 0.010204081, %v3916_v19  ;;  %v4018_v19 = vsel %vm10527_vm10, %v4016_v2, %v4017_v16  ;;  %vm4176_vm10 = vcmask 1024  }
 0x362   :  { %v3919_v62 = vadd.f32 1e-05, %v3917_v9 }
 0x364   :  { %5001 = vrsqrt.f32 %v3919_v62 }
 0x36e   :  { %v5002_v30 = vpop.eup %5001 }
 0x36f   :  { %v3921_v61 = vmul.f32 %v5002_v30, %v3918_v49 }
 0x371   :  { %v3926_v0 = vrot.slane %v3921_v61, %v3925_v41 }
 0x373   :  { %v9129_v31 = vmul.f32 %v3926_v0, %v3884_v52  ;;  %v3929_v40 = vmul.f32 %v3926_v0, %v3873_v58  ;;  %v3928_v7 = vmul.f32 %v3926_v0, %v3872_v18  ;;  %v3930_v14 = vmul.f32 %v3926_v0, %v3874_v46 }
 0x374   :  { %v3931_v32 = vmul.f32 %v3926_v0, %v3875_v20  ;;  %v3932_v63 = vmul.f32 %v3926_v0, %v3876_v5  ;;  %v3933_v51 = vmul.f32 %v3926_v0, %v3877_v27  ;;  %v3934_v53 = vmul.f32 %v3926_v0, %v3878_v1 }
 0x375   :  { %v3949_v8 = vadd.f32 %v9127_v15, %v3929_v40  ;;  %v3948_v54 = vadd.f32 %v9127_v15, %v3928_v7  ;;  %v3950_v39 = vadd.f32 %v9127_v15, %v3930_v14  ;;  %v3935_v34 = vmul.f32 %v3926_v0, %v3879_v13 }
 0x376   :  { %v3951_v58 = vadd.f32 %v9127_v15, %v3931_v32  ;;  %v3952_v18 = vadd.f32 %v9127_v15, %v3932_v63  ;;  %v3953_v46 = vadd.f32 %v9127_v15, %v3933_v51  ;;  %v3954_v60 = vadd.f32 %v9127_v15, %v3934_v53 }
 0x377   :  { %vm3962_vm15 = vcmp.gt.f32.partialorder %v3949_v8, 0.0  ;;  %v3975_v20 = vmul.f32 0.2, %v3949_v8  ;;  %vm3961_vm11 = vcmp.gt.f32.partialorder %v3948_v54, 0.0  ;;  %v3974_v5 = vmul.f32 0.2, %v3948_v54 }
 0x378   :  { %vm3963_vm4 = vcmp.gt.f32.partialorder %v3950_v39, 0.0  ;;  %v3976_v27 = vmul.f32 0.2, %v3950_v39  ;;  %vm3964_vm0 = vcmp.gt.f32.partialorder %v3951_v58, 0.0  ;;  %v3977_v1 = vmul.f32 0.2, %v3951_v58 }
 0x379   :  { %v3988_v13 = vsel %vm3962_vm15, %v3949_v8, %v3975_v20  ;;  %v3987_v52 = vsel %vm3961_vm11, %v3948_v54, %v3974_v5  ;;  %v3978_v33 = vmul.f32 0.2, %v3952_v18  ;;  %vm3965_vm3 = vcmp.gt.f32.partialorder %v3952_v18, 0.0 }
 0x37a   :  { %v4038_v28 = vmul.f32 %v9137_v11, %v3988_v13  ;;  %v4037_v44 = vmul.f32 %v4000_v25, %v3987_v52  ;;  %v3989_v10 = vsel %vm3963_vm4, %v3950_v39, %v3976_v27  ;;  %v3990_v3 = vsel %vm3964_vm0, %v3951_v58, %v3977_v1  ;;  %vm10530_vm4 = vmmov %vm10529_vm5 }
 0x37b   :  { %vm3966_vm1 = vcmp.gt.f32.partialorder %v3953_v46, 0.0  ;;  %v3979_v45 = vmul.f32 0.2, %v3953_v46  ;;  %v3955_v29 = vadd.f32 %v9127_v15, %v3935_v34  ;;  %v3936_v6 = vmul.f32 %v3926_v0, %v9103_v38  ;;  %vm10531_vm0 = vmmov %vm10530_vm4 }
 0x37c   :  { %4052 = vadd.xlane.f32.xlu0 %v4038_v28  ;;  %4050 = vadd.xlane.f32.xlu1 %v4037_v44  ;;  %v3937_v50 = vmul.f32 %v3926_v0, %v9105_v22  ;;  %v3938_v23 = vmul.f32 %v3926_v0, %v9107_v57  ;;  %v4039_v26 = vmul.f32 %v4002_v55, %v3989_v10  ;;  %v3980_v24 = vmul.f32 0.2, %v3954_v60 }
 0x37d   :  { %v4040_v43 = vmul.f32 %v4003_v21, %v3990_v3  ;;  %v3939_v47 = vmul.f32 %v3926_v0, %v9109_v59  ;;  %v3991_v4 = vsel %vm3965_vm3, %v3952_v18, %v3978_v33  ;;  %v3992_v36 = vsel %vm3966_vm1, %v3953_v46, %v3979_v45  ;;  %v4004_v59 = vld [vmem:[%s9202_s7 + $0x20] sm:$0xff]  ;;  %vm10532_vm3 = vmmov %vm10531_vm0 }
 0x37e   :  { %vm3967_vm14 = vcmp.gt.f32.partialorder %v3954_v60, 0.0  ;;  %v3981_v48 = vmul.f32 0.2, %v3955_v29  ;;  %vm3968_vm2 = vcmp.gt.f32.partialorder %v3955_v29, 0.0  ;;  %v3956_v38 = vadd.f32 %v9127_v15, %v3936_v6 }
 0x37f   :  { %v3957_v22 = vadd.f32 %v9127_v15, %v3937_v50  ;;  %v4019_v57 = vrot.slane %v4002_v55, 7  ;;  %v4041_v9 = vmul.f32 %v4004_v59, %v3991_v4  ;;  %v4042_v62 = vmul.f32 %v4005_v37, %v3992_v36 }
 0x380   :  { %4054 = vadd.xlane.f32.xlu0 %v4039_v26  ;;  %4056 = vadd.xlane.f32.xlu1 %v4040_v43  ;;  %v3993_v49 = vsel %vm3967_vm14, %v3954_v60, %v3980_v24  ;;  %v3958_v41 = vadd.f32 %v9127_v15, %v3938_v23  ;;  %v3994_v30 = vsel %vm3968_vm2, %v3955_v29, %v3981_v48  ;;  %v3982_v61 = vmul.f32 0.2, %v3956_v38 }
 0x381   :  { %v3983_v0 = vmul.f32 0.2, %v3957_v22  ;;  %v3959_v40 = vadd.f32 %v9127_v15, %v3939_v47  ;;  %vm3969_vm12 = vcmp.gt.f32.partialorder %v3956_v38, 0.0  ;;  %vm3970_vm13 = vcmp.gt.f32.partialorder %v3957_v22, 0.0 }
 0x382   :  { %v3960_v7 = vadd.f32 %v9127_v15, %v9129_v31  ;;  %v4023_v14 = vrot.slane %v4004_v59, 7  ;;  %v4025_v32 = vrot.slane %v4005_v37, 7  ;;  %v4043_v63 = vmul.f32 %v4036_v17, %v3993_v49 }
 0x383   :  { %v4044_v51 = vmul.f32 %v4018_v19, %v3994_v30  ;;  %v4020_v53 = vsel %vm10528_vm8, %v4017_v16, %v4019_v57  ;;  %v4022_v8 = vsel %vm10529_vm5, %v4019_v57, %v4021_v42  ;;  %v3995_v54 = vsel %vm3969_vm12, %v3956_v38, %v3982_v61 }
 0x384   :  { %4058 = vadd.xlane.f32.xlu0 %v4041_v9  ;;  %4060 = vadd.xlane.f32.xlu1 %v4042_v62  ;;  %v3996_v39 = vsel %vm3970_vm13, %v3957_v22, %v3983_v0  ;;  %v3984_v34 = vmul.f32 0.2, %v3958_v41  ;;  %v3985_v11 = vmul.f32 0.2, %v3959_v40  ;;  %v4027_v58 = vrot.slane %v4006_v12, 7 }
 0x385   :  { %vm3971_vm7 = vcmp.gt.f32.partialorder %v3958_v41, 0.0  ;;  %vm3972_vm15 = vcmp.gt.f32.partialorder %v3959_v40, 0.0  ;;  %v3986_v18 = vmul.f32 0.2, %v3960_v7  ;;  %vm3973_vm11 = vcmp.gt.f32.partialorder %v3960_v7, 0.0 }
 0x386   :  { %v4045_v15 = vmul.f32 %v4020_v53, %v3995_v54  ;;  %v4046_v31 = vmul.f32 %v4022_v8, %v3996_v39  ;;  %v3997_v46 = vsel %vm3971_vm7, %v3958_v41, %v3984_v34  ;;  %v4024_v20 = vsel %vm10530_vm4, %v4021_v42, %v4023_v14 }
 0x387   :  { %v3998_v5 = vsel %vm3972_vm15, %v3959_v40, %v3985_v11  ;;  %v4026_v27 = vsel %vm10531_vm0, %v4023_v14, %v4025_v32  ;;  %v5012_v1 = vmov 0.0|0.0   ;;  %v3999_v13 = vsel %vm3973_vm11, %v3960_v7, %v3986_v18 }
 0x388   :  { %4062 = vadd.xlane.f32.xlu0 %v4043_v63  ;;  %4064 = vadd.xlane.f32.xlu1 %v4044_v51  ;;  %v4028_v52 = vsel %vm10532_vm3, %v4025_v32, %v4027_v58  ;;  %v4047_v25 = vmul.f32 %v4024_v20, %v3997_v46  ;;  %v4048_v28 = vmul.f32 %v4026_v27, %v3998_v5  ;;  %v14_v16 = vstv %s9203_s8 }
 0x389   :  { %4833 = vmatprep.subr.bf16.mxu0 %v5012_v1  ;;  %v4049_v44 = vmul.f32 %v4028_v52, %v3999_v13  ;;  %15 = vst [vmem:[#allocation2] sm:$0x1] %v14_v16  ;;  %v4081_v50 = vadd.s32 1, %v10525_v56  ;;  %v10533_v24 = vlaneseq  ;;  %v4079_v4 = vmul.u32 49, %v10525_v56 }
 0x38b   :  { %v4074_v60 = vsel %vm3861_vm9, %v4049_v44, 0.0  ;;  %v4078_v47 = vand.u32 127, %v10533_v24  ;;  %v4082_v36 = vmul.u32 49, %v4081_v50 }
 0x38c   :  { %4066 = vadd.xlane.f32.xlu0 %v4045_v15  ;;  %4068 = vadd.xlane.f32.xlu1 %v4046_v31 }
 0x38d   :  { %vm4080_vm1 = vcmp.ge.s32.totalorder %v4078_v47, %v4079_v4  ;;  %vm4083_vm14 = vcmp.lt.s32.totalorder %v4078_v47, %v4082_v36 }
 0x38e   :  { %vm4084_vm2 = vmand %vm4080_vm1, %vm4083_vm14 }
 0x38f   :  { %v4402_v59 = vsel %vm4084_vm2, 1.0, %v10523_v35 }
 0x390   :  { %4070 = vadd.xlane.f32.xlu0 %v4047_v25  ;;  %4072 = vadd.xlane.f32.xlu1 %v4048_v28  ;;  %v4403_v37 = vld [vmem:[#allocation2] ss:$0 sm:$0xff] }
 0x394   :  { %4075 = vadd.xlane.f32.xlu0 %v4074_v60 }
 0x409   :  { %v4053_v10 = vpop.xlane.xlu0 %4052  ;;  %v4051_v3 = vpop.xlane.xlu1 %4050 }
 0x40a   :  { %v4834_v33 = vpack.c.bf16 %v4053_v10, %v4051_v3 }
 0x40c   :  { %4835 = vmatpush3.bf16.msra.mxu0 %v4834_v33 }
 0x40d   :  { %v4055_v2 = vpop.xlane.xlu0 %4054  ;;  %v4057_v45 = vpop.xlane.xlu1 %4056  ;;  %4836 = vmatprep.subr.bf16.mxu0 %v5012_v1 }
 0x40e   :  { %v4837_v55 = vpack.c.bf16 %v4057_v45, %v4055_v2 }
 0x410   :  { %4838 = vmatpush3.bf16.msra.mxu0 %v4837_v55 }
 0x411   :  { %v4059_v21 = vpop.xlane.xlu0 %4058  ;;  %v4061_v29 = vpop.xlane.xlu1 %4060  ;;  %4839 = vmatprep.subr.bf16.mxu0 %v5012_v1 }
 0x412   :  { %v4840_v6 = vpack.c.bf16 %v4061_v29, %v4059_v21 }
 0x414   :  { %4841 = vmatpush3.bf16.msra.mxu0 %v4840_v6 }
 0x415   :  { %v4063_v23 = vpop.xlane.xlu0 %4062  ;;  %v4065_v26 = vpop.xlane.xlu1 %4064  ;;  %4842 = vmatprep.subr.bf16.mxu0 %v5012_v1 }
 0x416   :  { %v4843_v43 = vpack.c.bf16 %v4065_v26, %v4063_v23 }
 0x418   :  { %4844 = vmatpush3.bf16.msra.mxu0 %v4843_v43 }
 0x419   :  { %v4067_v48 = vpop.xlane.xlu0 %4066  ;;  %v4069_v12 = vpop.xlane.xlu1 %4068  ;;  %4845 = vmatprep.subr.bf16.mxu0 %v5012_v1 }
 0x41a   :  { %v4846_v38 = vpack.c.bf16 %v4069_v12, %v4067_v48 }
 0x41c   :  { %4847 = vmatpush3.bf16.msra.mxu0 %v4846_v38 }
 0x41d   :  { %v4071_v22 = vpop.xlane.xlu0 %4070  ;;  %v4073_v57 = vpop.xlane.xlu1 %4072  ;;  %4848 = vmatprep.subr.bf16.mxu0 %v5012_v1 }
 0x41e   :  { %v4849_v42 = vpack.c.bf16 %v4073_v57, %v4071_v22 }
 0x420   :  { %4850 = vmatpush3.bf16.msra.mxu0 %v4849_v42 }
 0x421   :  { %4828 = vmatprep.subr.mxu0 %v10523_v35  ;;  %v4076_v56 = vpop.xlane.xlu0 %4075 }
 0x424   :  { %4829 = vmatpush3.msk.msra.mxu0 %vm3861_vm9, %v4076_v56 }
 0x425   :  { %4831 = vmatmul.mubr.msk.f32.vlgmr.msra.gmra.mrb[112].mxu0 %vm4093_vm6, %v4402_v59 }
 0x4f8   :  { %v4166_v17 = vpop.f32.mrb[112].mxu0 }
 0x4f9   :  { %v4167_v19 = vadd.f32 %v4403_v37, %v4166_v17  ;;  %v4832_v9 = vpop.f32.mrb[113].mxu0 }
 0x4fb   :  { %v4170_v62 = vsub.f32 0.0, %v4167_v19 }
 0x4fd   :  { %v4171_v49 = vmul.f32 1.442695, %v4170_v62 }
 0x4ff   :  { %5003 = vpow2.f32 %v4171_v49 }
 0x509   :  { %v5004_v41 = vpop.eup %5003 }
 0x50a   :  { %v4173_v30 = vadd.f32 1.0, %v5004_v41 }
 0x50c   :  { %5005 = vrcp.f32 %v4173_v30 }
 0x516   :  { %v5006_v61 = vpop.eup %5005 }
 0x517   :  { %4177 = vst.msk [vmem:[%s9204_s9] sm:$0x3] %vm4176_vm10, %v5006_v61 }

</bundles_post_ra>
